<compile_context>
chip_gen: v7x
topology: tpu7x:2x2x1
jax: 0.10.0
libtpu: 0.0.40
codegen_flags: <defaults>
</compile_context>

<pallas_src>
import numpy as np
import jax
import jax.numpy as jnp
from jax.experimental import pallas as pl
from jax.experimental.pallas import tpu as pltpu


# ----------------------------------------------------------------------------
# beta schedule (verbatim port of the reference numpy code)
# ----------------------------------------------------------------------------
def get_beta_schedule(beta_schedule, *, beta_start, beta_end, num_diffusion_timesteps):
    def sigmoid(x):
        return 1 / (np.exp(-x) + 1)

    if beta_schedule == 'quad':
        betas = np.linspace(beta_start ** 0.5, beta_end ** 0.5,
                            num_diffusion_timesteps, dtype=np.float64)
    elif beta_schedule == 'linear':
        betas = np.linspace(beta_start, beta_end, num_diffusion_timesteps, dtype=np.float64)
    elif beta_schedule == 'const':
        betas = beta_end * np.ones(num_diffusion_timesteps, dtype=np.float64)
    elif beta_schedule == 'jsd':
        betas = 1.0 / np.linspace(num_diffusion_timesteps, 1,
                                  num_diffusion_timesteps, dtype=np.float64)
    elif beta_schedule == 'sigmoid':
        betas = np.linspace(-6, 6, num_diffusion_timesteps)
        betas = sigmoid(betas) * (beta_end - beta_start) + beta_start
    else:
        raise NotImplementedError(beta_schedule)
    assert betas.shape == (num_diffusion_timesteps,)
    return betas


# ----------------------------------------------------------------------------
# parameter packing layout (static row offsets inside the stacked param slabs)
# ----------------------------------------------------------------------------
def _pad8(n):
    return ((n + 7) // 8) * 8


def make_packing_layout(H, C, NC):
    """Row layout for the three per-block parameter slabs.

    wmat  (B, RW, H):  we2 | wn | wc[0..NC-1] | wg1            (lane width H)
    wvec  (B, RV, H):  we1, be1, be2, bn, bg1, bc[0..NC-1]     (one row each)
    wtail (B, RT, H2): wg2 | bg2 | wg3 (lanes 0:2) | bg3       (lane width H//2)
    """
    assert H % 8 == 0 and (H // 2) % 8 == 0, "hidden_dim must be a multiple of 16"
    H2 = H // 2
    off_we2 = 0
    off_wn = off_we2 + H
    off_wc = off_wn + _pad8(C)
    off_wg1 = off_wc + NC * H
    RW = _pad8(off_wg1 + H)
    RV = _pad8(5 + NC)
    off_wg2 = 0
    off_bg2 = off_wg2 + H
    off_wg3 = _pad8(off_bg2 + 1)
    off_bg3 = off_wg3 + H2
    RT = _pad8(off_bg3 + 1)
    return dict(off_we2=off_we2, off_wn=off_wn, off_wc=off_wc, off_wg1=off_wg1, RW=RW,
                RV=RV, off_wg2=off_wg2, off_bg2=off_bg2, off_wg3=off_wg3,
                off_bg3=off_bg3, RT=RT)


def pack_block_params(block_params, H, C, NC, nbt_pad):
    """Pack the per-block parameter dicts into 3 stacked slabs + stacked bond table."""
    L = make_packing_layout(H, C, NC)
    H2 = H // 2
    B = len(block_params)
    wmat = np.zeros((B, L['RW'], H), np.float32)
    wvec = np.zeros((B, L['RV'], H), np.float32)
    wtail = np.zeros((B, L['RT'], H2), np.float32)
    nbt = np.asarray(block_params[0]['bond_emb']).shape[0]
    bond = np.zeros((B, nbt_pad, H), np.float32)
    for b, p in enumerate(block_params):
        wmat[b, L['off_we2']:L['off_we2'] + H] = np.asarray(p['we2'])
        wmat[b, L['off_wn']:L['off_wn'] + C] = np.asarray(p['wn'])
        wc = np.asarray(p['wc'])
        bc = np.asarray(p['bc'])
        for k in range(NC):
            wmat[b, L['off_wc'] + k * H:L['off_wc'] + (k + 1) * H] = wc[k]
            wvec[b, 5 + k] = bc[k, 0]
        wmat[b, L['off_wg1']:L['off_wg1'] + H] = np.asarray(p['wg1'])
        wvec[b, 0] = np.asarray(p['we1'])[0]
        wvec[b, 1] = np.asarray(p['be1'])[0]
        wvec[b, 2] = np.asarray(p['be2'])[0]
        wvec[b, 3] = np.asarray(p['bn'])[0]
        wvec[b, 4] = np.asarray(p['bg1'])[0]
        wtail[b, L['off_wg2']:L['off_wg2'] + H] = np.asarray(p['wg2'])
        wtail[b, L['off_bg2']] = np.asarray(p['bg2'])[0]
        wtail[b, L['off_wg3']:L['off_wg3'] + H2, 0:2] = np.asarray(p['wg3'])
        wtail[b, L['off_bg3'], 0:2] = np.asarray(p['bg3'])[0]
        bond[b, :nbt] = np.asarray(p['bond_emb'])
    return (jnp.asarray(wmat), jnp.asarray(wvec), jnp.asarray(wtail),
            jnp.asarray(bond), L)


# ----------------------------------------------------------------------------
# the single fused Pallas kernel
# ----------------------------------------------------------------------------
def _vmem_spec():
    # tiny whole-array residency in VMEM (no gridding needed at these shapes)
    return pl.BlockSpec(memory_space=pltpu.MemorySpace.VMEM)


def _build_fused_kernel(H, C, NC, B, L, use_bf16):
    """Fused forward kernel: edge lengths + bond-type gather + B EDM blocks, unrolled."""
    H2 = H // 2
    cdt = jnp.bfloat16 if use_bf16 else jnp.float32
    # f32 verification path uses HIGHEST so packing bugs can't hide under matmul rounding
    prec = None if use_bf16 else jax.lax.Precision.HIGHEST

    def mm(a, b):
        # MXU matmul: operands in the compute dtype, f32 accumulation.
        # (astype is a no-op for pre-cast operands.)
        return jnp.dot(a.astype(cdt), b.astype(cdt),
                       preferred_element_type=jnp.float32, precision=prec)

    def kernel(sdiff_ref, mdst_ref, a_ref, tone_ref, z_ref, pos_ref,
               wmat_ref, wvec_ref, wtail_ref, bond_ref, out_ref):
        pos0 = pos_ref[...]                                             # (N, 2) f32

        # edge lengths from the precomputed (Ssrc - Sdst) operator: one exact f32
        # one-hot matmul (values in {-1,0,1} -> exact even at default precision),
        # computed ONCE from the initial positions, matching the reference forward.
        diff = jnp.dot(sdiff_ref[...], pos0, preferred_element_type=jnp.float32)  # (E,2)
        edge_len = jnp.sqrt(jnp.sum(diff * diff, axis=-1, keepdims=True))         # (E,1)

        # block-invariant operands: cast ONCE, outside the block / conv loops
        mdst_c = mdst_ref[...].astype(cdt)    # (N, E)
        a_c = a_ref[...].astype(cdt)          # (N, N) dense adjacency (precomputed)
        tone_c = tone_ref[...].astype(cdt)    # (E, NBT_PAD) bond-type one-hot
        z_c = z_ref[...].astype(cdt)          # (N, C)

        pos_cur = pos0
        for b in range(B):                    # static unroll over EDM blocks
            wm = wmat_ref[b]                  # (RW, H)   already in compute dtype
            wv = wvec_ref[b]                  # (RV, H)
            wt = wtail_ref[b]                 # (RT, H2)

            we1 = wv[0:1, :]
            be1 = wv[1:2, :]
            be2 = wv[2:3, :]
            bn = wv[3:4, :]
            bg1 = wv[4:5, :]
            we2 = wm[L['off_we2']:L['off_we2'] + H, :]
            wn = wm[L['off_wn']:L['off_wn'] + C, :]
            wg1 = wm[L['off_wg1']:L['off_wg1'] + H, :]
            wg2 = wt[L['off_wg2']:L['off_wg2'] + H, :]
            bg2 = wt[L['off_bg2']:L['off_bg2'] + 1, :]
            wg3 = wt[L['off_wg3']:L['off_wg3'] + H2, 0:2]
            bg3 = wt[L['off_bg3']:L['off_bg3'] + 1, 0:2]

            # bond-type embedding gather, in-kernel (exact one-hot row selection)
            te = mm(tone_c, bond_ref[b])                                 # (E, H)

            # edge_encoder_local: MLP(edge_length) * bond-type embedding
            # (K=1 first layer done as a VPU broadcast, kept in f32)
            h_e = jnp.maximum(edge_len * we1 + be1, 0.0)                 # (E, H)
            h_e = mm(h_e, we2) + be2
            edge_attr = h_e * te                                         # (E, H)

            # GCNEncoder: node projection + NC graph convolutions with residual
            h = mm(z_c, wn) + bn                                         # (N, H)
            e_agg = mm(mdst_c, edge_attr)                                # (N, H)
            for k in range(NC):
                wck = wm[L['off_wc'] + k * H:L['off_wc'] + (k + 1) * H, :]
                bck = wv[5 + k:6 + k, :]
                agg = mm(a_c, h) + e_agg
                h = jnp.maximum(mm(agg, wck) + bck, 0.0) + h

            # grad_local_dist_mlp: H -> H -> H//2 -> 2 (no activation after last layer)
            m = jnp.maximum(mm(h, wg1) + bg1, 0.0)
            m = jnp.maximum(mm(m, wg2) + bg2, 0.0)
            node_pos = mm(m, wg3) + bg3                                  # (N, 2)
            pos_cur = pos_cur + node_pos

        # pos_noise = pos_final - pos  (single fused output store)
        out_ref[...] = pos_cur - pos0

    return kernel


# ----------------------------------------------------------------------------
# parameter construction (deterministic, PyTorch-Linear-style uniform init)
# ----------------------------------------------------------------------------
def _linear(key, fan_in, fan_out):
    k1, k2 = jax.random.split(key)
    bound = 1.0 / np.sqrt(fan_in)
    w = jax.random.uniform(k1, (fan_in, fan_out), jnp.float32, -bound, bound)
    b = jax.random.uniform(k2, (1, fan_out), jnp.float32, -bound, bound)
    return w, b


def make_block_params(key, hidden_dim, node_channels, num_convs, num_bond_types=100):
    keys = jax.random.split(key, 8 + num_convs)
    H, H2 = hidden_dim, hidden_dim // 2
    p = {}
    # edge_encoder_local: bond embedding + MLP(1 -> [H, H])
    p['bond_emb'] = jax.random.normal(keys[0], (num_bond_types, H), jnp.float32)
    p['we1'], p['be1'] = _linear(keys[1], 1, H)
    p['we2'], p['be2'] = _linear(keys[2], H, H)
    # GCNEncoder
    p['wn'], p['bn'] = _linear(keys[3], node_channels, H)
    wcs, bcs = [], []
    for k in range(num_convs):
        w, b = _linear(keys[4 + k], H, H)
        wcs.append(w)
        bcs.append(b)
    p['wc'] = jnp.stack(wcs, axis=0)   # (num_convs, H, H)
    p['bc'] = jnp.stack(bcs, axis=0)   # (num_convs, 1, H)
    # grad_local_dist_mlp: H -> [H, H//2, 2]
    p['wg1'], p['bg1'] = _linear(keys[4 + num_convs], H, H)
    p['wg2'], p['bg2'] = _linear(keys[5 + num_convs], H, H2)
    p['wg3'], p['bg3'] = _linear(keys[6 + num_convs], H2, 2)
    return p


class Config:
    hidden_dim = 32
    num_convs_local = 2
    laplacian_eigenvector = 8      # node input channels
    mlp_act = 'relu'
    num_edm_block = 2
    edge_order = 3
    cutoff = 10.0
    type = 'diffusion'
    beta_schedule = 'sigmoid'
    beta_start = 1e-7
    beta_end = 2e-3
    num_diffusion_timesteps = 100


class GraphDiffusionNetworkPallas:
    def __init__(self, config, key, use_bf16_matmul=True, num_bond_types=100):
        self.config = config
        self.use_bf16_matmul = use_bf16_matmul
        self.num_bond_types = num_bond_types
        # bond-type axis padded to a lane-friendly multiple of 128 for the one-hot matmul
        self.nbt_pad = ((num_bond_types + 127) // 128) * 128
        keys = jax.random.split(key, config.num_edm_block + 1)
        self.block_params = [
            make_block_params(keys[i], config.hidden_dim,
                              config.laplacian_eigenvector, config.num_convs_local,
                              num_bond_types)
            for i in range(config.num_edm_block)
        ]
        # pack all per-block params once at init into 3 stacked slabs (+ stacked bond emb)
        (self.wmat, self.wvec, self.wtail, self.bond, self.layout) = pack_block_params(
            self.block_params, config.hidden_dim,
            config.laplacian_eigenvector, config.num_convs_local, self.nbt_pad)
        # pre-cast the matmul-operand slabs once (fast path) — no per-matmul VPU casts
        self.wmat_bf16 = self.wmat.astype(jnp.bfloat16)
        self.wvec_bf16 = self.wvec.astype(jnp.bfloat16)
        self.wtail_bf16 = self.wtail.astype(jnp.bfloat16)
        self.bond_bf16 = self.bond.astype(jnp.bfloat16)
        # encoder_global = nn.Linear(10, 20): created but unused in forward
        self.wg, self.bg = _linear(keys[-1], 10, 20)
        self.model_type = config.type
        if self.model_type == 'diffusion':
            betas = get_beta_schedule(
                beta_schedule=config.beta_schedule, beta_start=config.beta_start,
                beta_end=config.beta_end,
                num_diffusion_timesteps=config.num_diffusion_timesteps)
            self.betas = jnp.asarray(betas, jnp.float32)
            self.alphas = jnp.cumprod(1.0 - self.betas, axis=0)
            self.num_timesteps = self.betas.shape[0]
        # compiled forward cache: (N, E, use_bf16) -> jit(pallas_call)
        self._fwd_cache = {}

    # ------------------------------------------------------------------
    def prepare_graph(self, edge_index, edge_type, num_nodes):
        """Dense graph operators; depend only on (edge_index, edge_type, N) -> cache & reuse.

        Precomputes A = Mdst @ Ssrc, sdiff = Ssrc - Sdst and the bond-type one-hot so
        the per-call kernel critical path keeps only ONE graph-construction matmul."""
        src, dst = edge_index[0], edge_index[1]
        ar = jnp.arange(num_nodes)
        ssrc = (src[:, None] == ar[None, :]).astype(jnp.float32)   # (E, N)
        sdst = (dst[:, None] == ar[None, :]).astype(jnp.float32)   # (E, N)
        sdiff = ssrc - sdst                                        # (E, N) in {-1,0,1}
        mdst = sdst.T                                              # (N, E)
        A = jnp.zeros((num_nodes, num_nodes), jnp.float32).at[dst, src].add(1.0)  # (N, N)
        t_onehot = (edge_type[:, None] ==
                    jnp.arange(self.nbt_pad)[None, :]).astype(jnp.float32)        # (E, NBT)
        return sdiff, mdst, A, t_onehot

    # ------------------------------------------------------------------
    def _get_forward(self, N, E, use_bf16):
        """Build (once) and cache the jitted pallas_call for a given (N, E, dtype)."""
        key = (int(N), int(E), bool(use_bf16))
        fn = self._fwd_cache.get(key)
        if fn is not None:
            return fn
        cfg = self.config
        H, C = cfg.hidden_dim, cfg.laplacian_eigenvector
        NC, B = cfg.num_convs_local, cfg.num_edm_block
        H2 = H // 2
        nbt = self.nbt_pad
        kernel = _build_fused_kernel(H, C, NC, B, self.layout, use_bf16)

        # advisory scheduling hint for XLA around the (tiny) custom call
        per_block = (E * nbt * H + E * H * H + N * C * H + N * E * H
                     + NC * (N * N * H + N * H * H)
                     + N * H * H + N * H * H2 + N * H2 * 2)
        flops = int(2 * (E * N * 2 + B * per_block))
        wbytes = 2 if use_bf16 else 4
        bytes_accessed = int(
            4 * (E * N + N * E + N * N + E * nbt + N * C + 2 * N * 2)
            + wbytes * (self.wmat.size + self.wvec.size + self.wtail.size + self.bond.size))

        vspec = _vmem_spec()
        call = pl.pallas_call(
            kernel,
            out_shape=jax.ShapeDtypeStruct((N, 2), jnp.float32),
            in_specs=[vspec] * 10,
            out_specs=vspec,
            cost_estimate=pl.CostEstimate(flops=flops, transcendentals=int(E),
                                          bytes_accessed=bytes_accessed),
        )
        fn = jax.jit(call)
        self._fwd_cache[key] = fn
        return fn

    # ------------------------------------------------------------------
    def __call__(self, node_emb, node_type, node_degree, pos, edge_index,
                 edge_type, batch, time_step, graph_ops=None):
        # TODO(synk): extend_graph_order_radius (bond-order / radius edge extension) is
        # defined outside this module; the provided edges are used as-is.
        N = node_emb.shape[0]
        if graph_ops is None:
            graph_ops = self.prepare_graph(edge_index, edge_type, N)
        sdiff, mdst, A, t_onehot = graph_ops
        E = sdiff.shape[0]
        fwd = self._get_forward(N, E, self.use_bf16_matmul)
        if self.use_bf16_matmul:
            wmat, wvec, wtail, bond = (self.wmat_bf16, self.wvec_bf16,
                                       self.wtail_bf16, self.bond_bf16)
        else:
            wmat, wvec, wtail, bond = self.wmat, self.wvec, self.wtail, self.bond
        return fwd(sdiff, mdst, A, t_onehot, node_emb, pos, wmat, wvec, wtail, bond)


# ----------------------------------------------------------------------------
# pure-numpy reference forward (same math, f32) — used only for self-check
# ----------------------------------------------------------------------------
def _reference_forward_numpy(block_params, node_emb, pos, edge_index, edge_type):
    z = np.asarray(node_emb, np.float32)
    pos0 = np.asarray(pos, np.float32)
    src = np.asarray(edge_index[0])
    dst = np.asarray(edge_index[1])
    et = np.asarray(edge_type)
    N, E = z.shape[0], src.shape[0]
    relu = lambda x: np.maximum(x, 0.0)

    d = np.sqrt((((pos0[src] - pos0[dst]) ** 2).sum(-1, keepdims=True)))   # (E, 1)
    A = np.zeros((N, N), np.float32)
    np.add.at(A, (dst, src), 1.0)
    Mdst = np.zeros((N, E), np.float32)
    Mdst[dst, np.arange(E)] = 1.0

    pos_cur = pos0.copy()
    for p in block_params:
        temb = np.asarray(p['bond_emb'])[et]
        h_e = relu(d @ np.asarray(p['we1']) + np.asarray(p['be1']))
        h_e = h_e @ np.asarray(p['we2']) + np.asarray(p['be2'])
        edge_attr = h_e * temb
        h = z @ np.asarray(p['wn']) + np.asarray(p['bn'])
        e_agg = Mdst @ edge_attr
        wc, bc = np.asarray(p['wc']), np.asarray(p['bc'])
        for k in range(wc.shape[0]):
            agg = A @ h + e_agg
            h = relu(agg @ wc[k] + bc[k]) + h
        m = relu(h @ np.asarray(p['wg1']) + np.asarray(p['bg1']))
        m = relu(m @ np.asarray(p['wg2']) + np.asarray(p['bg2']))
        node_pos = m @ np.asarray(p['wg3']) + np.asarray(p['bg3'])
        pos_cur = pos_cur + node_pos
    return pos_cur - pos0


# ----------------------------------------------------------------------------
if __name__ == "__main__":
    cfg = Config()
    key = jax.random.PRNGKey(0)
    kmodel, kdata = jax.random.split(key)
    model = GraphDiffusionNetworkPallas(cfg, kmodel, use_bf16_matmul=True)

    N, E = 16, 32
    k1, k2, k3, k4, k5, k6 = jax.random.split(kdata, 6)
    node_emb = jax.random.normal(k1, (N, cfg.laplacian_eigenvector), jnp.float32)
    node_type = jax.random.randint(k2, (N,), 0, 5)
    node_degree = jax.random.randint(k3, (N,), 1, 4)
    pos = jax.random.normal(k4, (N, 2), jnp.float32)
    edge_index = jax.random.randint(k5, (2, E), 0, N)
    edge_type = jax.random.randint(k6, (E,), 0, 4)
    batch = jnp.zeros((N,), jnp.int32)
    time_step = jnp.zeros((1,), jnp.int32)

    # dense graph operators depend only on (edge_index, edge_type, N): build once & reuse
    graph_ops = model.prepare_graph(edge_index, edge_type, N)
    ref = _reference_forward_numpy(model.block_params, node_emb, pos, edge_index, edge_type)

    # strict check of the fused kernel / parameter packing: f32 matmuls at HIGHEST precision
    model.use_bf16_matmul = False
    out_f32 = model(node_emb, node_type, node_degree, pos, edge_index,
                    edge_type, batch, time_step, graph_ops=graph_ops)
    jax.block_until_ready(out_f32)
    assert np.max(np.abs(np.asarray(out_f32) - ref)) < 1e-4, "f32 kernel mismatch vs reference"

    # default fast path: pre-cast bf16 matmul operands, f32 accumulation (v6e/v7x MXU)
    model.use_bf16_matmul = True
    out = model(node_emb, node_type, node_degree, pos, edge_index,
                edge_type, batch, time_step, graph_ops=graph_ops)
    jax.block_until_ready(out)
    assert out.shape == (N, 2) and out.dtype == jnp.float32
    assert np.all(np.isfinite(np.asarray(out)))
    assert np.max(np.abs(np.asarray(out) - ref)) < 0.25, "bf16 kernel diverged from reference"

    # second call hits the cached compiled callable (no kernel rebuild / re-trace)
    out2 = model(node_emb, node_type, node_degree, pos, edge_index,
                 edge_type, batch, time_step, graph_ops=graph_ops)
    jax.block_until_ready(out2)
    assert np.array_equal(np.asarray(out), np.asarray(out2))
    print("KERNEL_OK")
</pallas_src>

<mosaic_0001>
module attributes {stable_mosaic.version = 11 : i64} {
  func.func @kernel(%arg0: memref<32x16xf32, #tpu.memory_space<vmem>>, %arg1: memref<16x32xf32, #tpu.memory_space<vmem>>, %arg2: memref<16x16xf32, #tpu.memory_space<vmem>>, %arg3: memref<32x128xf32, #tpu.memory_space<vmem>>, %arg4: memref<16x8xf32, #tpu.memory_space<vmem>>, %arg5: memref<16x2xf32, #tpu.memory_space<vmem>>, %arg6: memref<2x136x32xf32, #tpu.memory_space<vmem>>, %arg7: memref<2x8x32xf32, #tpu.memory_space<vmem>>, %arg8: memref<2x64x16xf32, #tpu.memory_space<vmem>>, %arg9: memref<2x128x32xf32, #tpu.memory_space<vmem>>, %arg10: memref<16x2xf32, #tpu.memory_space<vmem>>) attributes {dimension_semantics = [], scalar_prefetch = 0 : i64, scratch_operands = 0 : i64, tpu.core_type = #tpu.core_type<tc>} {
    %c0 = arith.constant 0 : index
    %c0_0 = arith.constant 0 : index
    %0 = vector.load %arg5[%c0, %c0_0] : memref<16x2xf32, #tpu.memory_space<vmem>>, vector<16x2xf32>
    %c0_1 = arith.constant 0 : index
    %c0_2 = arith.constant 0 : index
    %1 = vector.load %arg0[%c0_1, %c0_2] : memref<32x16xf32, #tpu.memory_space<vmem>>, vector<32x16xf32>
    %cst = arith.constant dense<0.000000e+00> : vector<32x2xf32>
    %2 = tpu.matmul %1, %0, %cst {dimension_numbers = #tpu.dot_dimension_numbers<[1], [0], [0], [1], [0, 0, 1, 1], [], []>} : vector<32x16xf32>, vector<16x2xf32>, vector<32x2xf32> -> vector<32x2xf32>
    %3 = arith.mulf %2, %2 : vector<32x2xf32>
    %cst_3 = arith.constant dense<0.000000e+00> : vector<32xf32>
    %4 = vector.multi_reduction <add>, %3, %cst_3 [1] : vector<32x2xf32> to vector<32xf32>
    %5 = vector.shape_cast %4 : vector<32xf32> to vector<32x1xf32>
    %6 = math.sqrt %5 : vector<32x1xf32>
    %c0_4 = arith.constant 0 : index
    %c0_5 = arith.constant 0 : index
    %7 = vector.load %arg1[%c0_4, %c0_5] : memref<16x32xf32, #tpu.memory_space<vmem>>, vector<16x32xf32>
    %c0_6 = arith.constant 0 : index
    %c0_7 = arith.constant 0 : index
    %8 = vector.load %arg2[%c0_6, %c0_7] : memref<16x16xf32, #tpu.memory_space<vmem>>, vector<16x16xf32>
    %c0_8 = arith.constant 0 : index
    %c0_9 = arith.constant 0 : index
    %9 = vector.load %arg3[%c0_8, %c0_9] : memref<32x128xf32, #tpu.memory_space<vmem>>, vector<32x128xf32>
    %c0_10 = arith.constant 0 : index
    %c0_11 = arith.constant 0 : index
    %10 = vector.load %arg4[%c0_10, %c0_11] : memref<16x8xf32, #tpu.memory_space<vmem>>, vector<16x8xf32>
    %c0_12 = arith.constant 0 : index
    %c0_13 = arith.constant 0 : index
    %c0_14 = arith.constant 0 : index
    %11 = vector.load %arg6[%c0_12, %c0_13, %c0_14] : memref<2x136x32xf32, #tpu.memory_space<vmem>>, vector<1x136x32xf32>
    %12 = vector.shape_cast %11 : vector<1x136x32xf32> to vector<136x32xf32>
    %c0_15 = arith.constant 0 : index
    %c0_16 = arith.constant 0 : index
    %c0_17 = arith.constant 0 : index
    %13 = vector.load %arg7[%c0_15, %c0_16, %c0_17] : memref<2x8x32xf32, #tpu.memory_space<vmem>>, vector<1x8x32xf32>
    %14 = vector.shape_cast %13 : vector<1x8x32xf32> to vector<8x32xf32>
    %c0_18 = arith.constant 0 : index
    %c0_19 = arith.constant 0 : index
    %c0_20 = arith.constant 0 : index
    %15 = vector.load %arg8[%c0_18, %c0_19, %c0_20] : memref<2x64x16xf32, #tpu.memory_space<vmem>>, vector<1x64x16xf32>
    %16 = vector.shape_cast %15 : vector<1x64x16xf32> to vector<64x16xf32>
    %17 = vector.extract_strided_slice %14 {offsets = [0, 0], sizes = [1, 32], strides = [1, 1]} : vector<8x32xf32> to vector<1x32xf32>
    %18 = vector.extract_strided_slice %14 {offsets = [1, 0], sizes = [1, 32], strides = [1, 1]} : vector<8x32xf32> to vector<1x32xf32>
    %19 = vector.extract_strided_slice %14 {offsets = [2, 0], sizes = [1, 32], strides = [1, 1]} : vector<8x32xf32> to vector<1x32xf32>
    %20 = vector.extract_strided_slice %14 {offsets = [3, 0], sizes = [1, 32], strides = [1, 1]} : vector<8x32xf32> to vector<1x32xf32>
    %21 = vector.extract_strided_slice %14 {offsets = [4, 0], sizes = [1, 32], strides = [1, 1]} : vector<8x32xf32> to vector<1x32xf32>
    %22 = vector.extract_strided_slice %12 {offsets = [0, 0], sizes = [32, 32], strides = [1, 1]} : vector<136x32xf32> to vector<32x32xf32>
    %23 = vector.extract_strided_slice %12 {offsets = [32, 0], sizes = [8, 32], strides = [1, 1]} : vector<136x32xf32> to vector<8x32xf32>
    %24 = vector.extract_strided_slice %12 {offsets = [104, 0], sizes = [32, 32], strides = [1, 1]} : vector<136x32xf32> to vector<32x32xf32>
    %25 = vector.extract_strided_slice %16 {offsets = [0, 0], sizes = [32, 16], strides = [1, 1]} : vector<64x16xf32> to vector<32x16xf32>
    %26 = vector.extract_strided_slice %16 {offsets = [32, 0], sizes = [1, 16], strides = [1, 1]} : vector<64x16xf32> to vector<1x16xf32>
    %27 = vector.extract_strided_slice %16 {offsets = [40, 0], sizes = [16, 2], strides = [1, 1]} : vector<64x16xf32> to vector<16x2xf32>
    %28 = vector.extract_strided_slice %16 {offsets = [56, 0], sizes = [1, 2], strides = [1, 1]} : vector<64x16xf32> to vector<1x2xf32>
    %c0_21 = arith.constant 0 : index
    %c0_22 = arith.constant 0 : index
    %c0_23 = arith.constant 0 : index
    %29 = vector.load %arg9[%c0_21, %c0_22, %c0_23] : memref<2x128x32xf32, #tpu.memory_space<vmem>>, vector<1x128x32xf32>
    %30 = vector.shape_cast %29 : vector<1x128x32xf32> to vector<128x32xf32>
    %cst_24 = arith.constant dense<0.000000e+00> : vector<32x32xf32>
    %31 = tpu.matmul %9, %30, %cst_24 {dimension_numbers = #tpu.dot_dimension_numbers<[1], [0], [0], [1], [0, 0, 1, 1], [], []>, precision = #tpu.contract_precision<fp32>} : vector<32x128xf32>, vector<128x32xf32>, vector<32x32xf32> -> vector<32x32xf32>
    %32 = vector.broadcast %6 : vector<32x1xf32> to vector<32x32xf32>
    %33 = vector.broadcast %17 : vector<1x32xf32> to vector<32x32xf32>
    %34 = arith.mulf %32, %33 : vector<32x32xf32>
    %35 = vector.broadcast %18 : vector<1x32xf32> to vector<32x32xf32>
    %36 = arith.addf %34, %35 : vector<32x32xf32>
    %cst_25 = arith.constant 0.000000e+00 : f32
    %37 = vector.broadcast %cst_25 : f32 to vector<32x32xf32>
    %38 = arith.maximumf %36, %37 : vector<32x32xf32>
    %cst_26 = arith.constant dense<0.000000e+00> : vector<32x32xf32>
    %39 = tpu.matmul %38, %22, %cst_26 {dimension_numbers = #tpu.dot_dimension_numbers<[1], [0], [0], [1], [0, 0, 1, 1], [], []>, precision = #tpu.contract_precision<fp32>} : vector<32x32xf32>, vector<32x32xf32>, vector<32x32xf32> -> vector<32x32xf32>
    %40 = vector.broadcast %19 : vector<1x32xf32> to vector<32x32xf32>
    %41 = arith.addf %39, %40 : vector<32x32xf32>
    %42 = arith.mulf %41, %31 : vector<32x32xf32>
    %cst_27 = arith.constant dense<0.000000e+00> : vector<16x32xf32>
    %43 = tpu.matmul %10, %23, %cst_27 {dimension_numbers = #tpu.dot_dimension_numbers<[1], [0], [0], [1], [0, 0, 1, 1], [], []>, precision = #tpu.contract_precision<fp32>} : vector<16x8xf32>, vector<8x32xf32>, vector<16x32xf32> -> vector<16x32xf32>
    %44 = vector.broadcast %20 : vector<1x32xf32> to vector<16x32xf32>
    %45 = arith.addf %43, %44 : vector<16x32xf32>
    %cst_28 = arith.constant dense<0.000000e+00> : vector<16x32xf32>
    %46 = tpu.matmul %7, %42, %cst_28 {dimension_numbers = #tpu.dot_dimension_numbers<[1], [0], [0], [1], [0, 0, 1, 1], [], []>, precision = #tpu.contract_precision<fp32>} : vector<16x32xf32>, vector<32x32xf32>, vector<16x32xf32> -> vector<16x32xf32>
    %47 = vector.extract_strided_slice %12 {offsets = [40, 0], sizes = [32, 32], strides = [1, 1]} : vector<136x32xf32> to vector<32x32xf32>
    %48 = vector.extract_strided_slice %14 {offsets = [5, 0], sizes = [1, 32], strides = [1, 1]} : vector<8x32xf32> to vector<1x32xf32>
    %cst_29 = arith.constant dense<0.000000e+00> : vector<16x32xf32>
    %49 = tpu.matmul %8, %45, %cst_29 {dimension_numbers = #tpu.dot_dimension_numbers<[1], [0], [0], [1], [0, 0, 1, 1], [], []>, precision = #tpu.contract_precision<fp32>} : vector<16x16xf32>, vector<16x32xf32>, vector<16x32xf32> -> vector<16x32xf32>
    %50 = arith.addf %49, %46 : vector<16x32xf32>
    %cst_30 = arith.constant dense<0.000000e+00> : vector<16x32xf32>
    %51 = tpu.matmul %50, %47, %cst_30 {dimension_numbers = #tpu.dot_dimension_numbers<[1], [0], [0], [1], [0, 0, 1, 1], [], []>, precision = #tpu.contract_precision<fp32>} : vector<16x32xf32>, vector<32x32xf32>, vector<16x32xf32> -> vector<16x32xf32>
    %52 = vector.broadcast %48 : vector<1x32xf32> to vector<16x32xf32>
    %53 = arith.addf %51, %52 : vector<16x32xf32>
    %cst_31 = arith.constant 0.000000e+00 : f32
    %54 = vector.broadcast %cst_31 : f32 to vector<16x32xf32>
    %55 = arith.maximumf %53, %54 : vector<16x32xf32>
    %56 = arith.addf %55, %45 : vector<16x32xf32>
    %57 = vector.extract_strided_slice %12 {offsets = [72, 0], sizes = [32, 32], strides = [1, 1]} : vector<136x32xf32> to vector<32x32xf32>
    %58 = vector.extract_strided_slice %14 {offsets = [6, 0], sizes = [1, 32], strides = [1, 1]} : vector<8x32xf32> to vector<1x32xf32>
    %cst_32 = arith.constant dense<0.000000e+00> : vector<16x32xf32>
    %59 = tpu.matmul %8, %56, %cst_32 {dimension_numbers = #tpu.dot_dimension_numbers<[1], [0], [0], [1], [0, 0, 1, 1], [], []>, precision = #tpu.contract_precision<fp32>} : vector<16x16xf32>, vector<16x32xf32>, vector<16x32xf32> -> vector<16x32xf32>
    %60 = arith.addf %59, %46 : vector<16x32xf32>
    %cst_33 = arith.constant dense<0.000000e+00> : vector<16x32xf32>
    %61 = tpu.matmul %60, %57, %cst_33 {dimension_numbers = #tpu.dot_dimension_numbers<[1], [0], [0], [1], [0, 0, 1, 1], [], []>, precision = #tpu.contract_precision<fp32>} : vector<16x32xf32>, vector<32x32xf32>, vector<16x32xf32> -> vector<16x32xf32>
    %62 = vector.broadcast %58 : vector<1x32xf32> to vector<16x32xf32>
    %63 = arith.addf %61, %62 : vector<16x32xf32>
    %cst_34 = arith.constant 0.000000e+00 : f32
    %64 = vector.broadcast %cst_34 : f32 to vector<16x32xf32>
    %65 = arith.maximumf %63, %64 : vector<16x32xf32>
    %66 = arith.addf %65, %56 : vector<16x32xf32>
    %cst_35 = arith.constant dense<0.000000e+00> : vector<16x32xf32>
    %67 = tpu.matmul %66, %24, %cst_35 {dimension_numbers = #tpu.dot_dimension_numbers<[1], [0], [0], [1], [0, 0, 1, 1], [], []>, precision = #tpu.contract_precision<fp32>} : vector<16x32xf32>, vector<32x32xf32>, vector<16x32xf32> -> vector<16x32xf32>
    %68 = vector.broadcast %21 : vector<1x32xf32> to vector<16x32xf32>
    %69 = arith.addf %67, %68 : vector<16x32xf32>
    %cst_36 = arith.constant 0.000000e+00 : f32
    %70 = vector.broadcast %cst_36 : f32 to vector<16x32xf32>
    %71 = arith.maximumf %69, %70 : vector<16x32xf32>
    %cst_37 = arith.constant dense<0.000000e+00> : vector<16x16xf32>
    %72 = tpu.matmul %71, %25, %cst_37 {dimension_numbers = #tpu.dot_dimension_numbers<[1], [0], [0], [1], [0, 0, 1, 1], [], []>, precision = #tpu.contract_precision<fp32>} : vector<16x32xf32>, vector<32x16xf32>, vector<16x16xf32> -> vector<16x16xf32>
    %73 = vector.broadcast %26 : vector<1x16xf32> to vector<16x16xf32>
    %74 = arith.addf %72, %73 : vector<16x16xf32>
    %cst_38 = arith.constant 0.000000e+00 : f32
    %75 = vector.broadcast %cst_38 : f32 to vector<16x16xf32>
    %76 = arith.maximumf %74, %75 : vector<16x16xf32>
    %cst_39 = arith.constant dense<0.000000e+00> : vector<16x2xf32>
    %77 = tpu.matmul %76, %27, %cst_39 {dimension_numbers = #tpu.dot_dimension_numbers<[1], [0], [0], [1], [0, 0, 1, 1], [], []>, precision = #tpu.contract_precision<fp32>} : vector<16x16xf32>, vector<16x2xf32>, vector<16x2xf32> -> vector<16x2xf32>
    %78 = vector.broadcast %28 : vector<1x2xf32> to vector<16x2xf32>
    %79 = arith.addf %77, %78 : vector<16x2xf32>
    %80 = arith.addf %0, %79 : vector<16x2xf32>
    %c1 = arith.constant 1 : index
    %c0_40 = arith.constant 0 : index
    %c0_41 = arith.constant 0 : index
    %81 = vector.load %arg6[%c1, %c0_40, %c0_41] : memref<2x136x32xf32, #tpu.memory_space<vmem>>, vector<1x136x32xf32>
    %82 = vector.shape_cast %81 : vector<1x136x32xf32> to vector<136x32xf32>
    %c1_42 = arith.constant 1 : index
    %c0_43 = arith.constant 0 : index
    %c0_44 = arith.constant 0 : index
    %83 = vector.load %arg7[%c1_42, %c0_43, %c0_44] : memref<2x8x32xf32, #tpu.memory_space<vmem>>, vector<1x8x32xf32>
    %84 = vector.shape_cast %83 : vector<1x8x32xf32> to vector<8x32xf32>
    %c1_45 = arith.constant 1 : index
    %c0_46 = arith.constant 0 : index
    %c0_47 = arith.constant 0 : index
    %85 = vector.load %arg8[%c1_45, %c0_46, %c0_47] : memref<2x64x16xf32, #tpu.memory_space<vmem>>, vector<1x64x16xf32>
    %86 = vector.shape_cast %85 : vector<1x64x16xf32> to vector<64x16xf32>
    %87 = vector.extract_strided_slice %84 {offsets = [0, 0], sizes = [1, 32], strides = [1, 1]} : vector<8x32xf32> to vector<1x32xf32>
    %88 = vector.extract_strided_slice %84 {offsets = [1, 0], sizes = [1, 32], strides = [1, 1]} : vector<8x32xf32> to vector<1x32xf32>
    %89 = vector.extract_strided_slice %84 {offsets = [2, 0], sizes = [1, 32], strides = [1, 1]} : vector<8x32xf32> to vector<1x32xf32>
    %90 = vector.extract_strided_slice %84 {offsets = [3, 0], sizes = [1, 32], strides = [1, 1]} : vector<8x32xf32> to vector<1x32xf32>
    %91 = vector.extract_strided_slice %84 {offsets = [4, 0], sizes = [1, 32], strides = [1, 1]} : vector<8x32xf32> to vector<1x32xf32>
    %92 = vector.extract_strided_slice %82 {offsets = [0, 0], sizes = [32, 32], strides = [1, 1]} : vector<136x32xf32> to vector<32x32xf32>
    %93 = vector.extract_strided_slice %82 {offsets = [32, 0], sizes = [8, 32], strides = [1, 1]} : vector<136x32xf32> to vector<8x32xf32>
    %94 = vector.extract_strided_slice %82 {offsets = [104, 0], sizes = [32, 32], strides = [1, 1]} : vector<136x32xf32> to vector<32x32xf32>
    %95 = vector.extract_strided_slice %86 {offsets = [0, 0], sizes = [32, 16], strides = [1, 1]} : vector<64x16xf32> to vector<32x16xf32>
    %96 = vector.extract_strided_slice %86 {offsets = [32, 0], sizes = [1, 16], strides = [1, 1]} : vector<64x16xf32> to vector<1x16xf32>
    %97 = vector.extract_strided_slice %86 {offsets = [40, 0], sizes = [16, 2], strides = [1, 1]} : vector<64x16xf32> to vector<16x2xf32>
    %98 = vector.extract_strided_slice %86 {offsets = [56, 0], sizes = [1, 2], strides = [1, 1]} : vector<64x16xf32> to vector<1x2xf32>
    %c1_48 = arith.constant 1 : index
    %c0_49 = arith.constant 0 : index
    %c0_50 = arith.constant 0 : index
    %99 = vector.load %arg9[%c1_48, %c0_49, %c0_50] : memref<2x128x32xf32, #tpu.memory_space<vmem>>, vector<1x128x32xf32>
    %100 = vector.shape_cast %99 : vector<1x128x32xf32> to vector<128x32xf32>
    %cst_51 = arith.constant dense<0.000000e+00> : vector<32x32xf32>
    %101 = tpu.matmul %9, %100, %cst_51 {dimension_numbers = #tpu.dot_dimension_numbers<[1], [0], [0], [1], [0, 0, 1, 1], [], []>, precision = #tpu.contract_precision<fp32>} : vector<32x128xf32>, vector<128x32xf32>, vector<32x32xf32> -> vector<32x32xf32>
    %102 = vector.broadcast %6 : vector<32x1xf32> to vector<32x32xf32>
    %103 = vector.broadcast %87 : vector<1x32xf32> to vector<32x32xf32>
    %104 = arith.mulf %102, %103 : vector<32x32xf32>
    %105 = vector.broadcast %88 : vector<1x32xf32> to vector<32x32xf32>
    %106 = arith.addf %104, %105 : vector<32x32xf32>
    %cst_52 = arith.constant 0.000000e+00 : f32
    %107 = vector.broadcast %cst_52 : f32 to vector<32x32xf32>
    %108 = arith.maximumf %106, %107 : vector<32x32xf32>
    %cst_53 = arith.constant dense<0.000000e+00> : vector<32x32xf32>
    %109 = tpu.matmul %108, %92, %cst_53 {dimension_numbers = #tpu.dot_dimension_numbers<[1], [0], [0], [1], [0, 0, 1, 1], [], []>, precision = #tpu.contract_precision<fp32>} : vector<32x32xf32>, vector<32x32xf32>, vector<32x32xf32> -> vector<32x32xf32>
    %110 = vector.broadcast %89 : vector<1x32xf32> to vector<32x32xf32>
    %111 = arith.addf %109, %110 : vector<32x32xf32>
    %112 = arith.mulf %111, %101 : vector<32x32xf32>
    %cst_54 = arith.constant dense<0.000000e+00> : vector<16x32xf32>
    %113 = tpu.matmul %10, %93, %cst_54 {dimension_numbers = #tpu.dot_dimension_numbers<[1], [0], [0], [1], [0, 0, 1, 1], [], []>, precision = #tpu.contract_precision<fp32>} : vector<16x8xf32>, vector<8x32xf32>, vector<16x32xf32> -> vector<16x32xf32>
    %114 = vector.broadcast %90 : vector<1x32xf32> to vector<16x32xf32>
    %115 = arith.addf %113, %114 : vector<16x32xf32>
    %cst_55 = arith.constant dense<0.000000e+00> : vector<16x32xf32>
    %116 = tpu.matmul %7, %112, %cst_55 {dimension_numbers = #tpu.dot_dimension_numbers<[1], [0], [0], [1], [0, 0, 1, 1], [], []>, precision = #tpu.contract_precision<fp32>} : vector<16x32xf32>, vector<32x32xf32>, vector<16x32xf32> -> vector<16x32xf32>
    %117 = vector.extract_strided_slice %82 {offsets = [40, 0], sizes = [32, 32], strides = [1, 1]} : vector<136x32xf32> to vector<32x32xf32>
    %118 = vector.extract_strided_slice %84 {offsets = [5, 0], sizes = [1, 32], strides = [1, 1]} : vector<8x32xf32> to vector<1x32xf32>
    %cst_56 = arith.constant dense<0.000000e+00> : vector<16x32xf32>
    %119 = tpu.matmul %8, %115, %cst_56 {dimension_numbers = #tpu.dot_dimension_numbers<[1], [0], [0], [1], [0, 0, 1, 1], [], []>, precision = #tpu.contract_precision<fp32>} : vector<16x16xf32>, vector<16x32xf32>, vector<16x32xf32> -> vector<16x32xf32>
    %120 = arith.addf %119, %116 : vector<16x32xf32>
    %cst_57 = arith.constant dense<0.000000e+00> : vector<16x32xf32>
    %121 = tpu.matmul %120, %117, %cst_57 {dimension_numbers = #tpu.dot_dimension_numbers<[1], [0], [0], [1], [0, 0, 1, 1], [], []>, precision = #tpu.contract_precision<fp32>} : vector<16x32xf32>, vector<32x32xf32>, vector<16x32xf32> -> vector<16x32xf32>
    %122 = vector.broadcast %118 : vector<1x32xf32> to vector<16x32xf32>
    %123 = arith.addf %121, %122 : vector<16x32xf32>
    %cst_58 = arith.constant 0.000000e+00 : f32
    %124 = vector.broadcast %cst_58 : f32 to vector<16x32xf32>
    %125 = arith.maximumf %123, %124 : vector<16x32xf32>
    %126 = arith.addf %125, %115 : vector<16x32xf32>
    %127 = vector.extract_strided_slice %82 {offsets = [72, 0], sizes = [32, 32], strides = [1, 1]} : vector<136x32xf32> to vector<32x32xf32>
    %128 = vector.extract_strided_slice %84 {offsets = [6, 0], sizes = [1, 32], strides = [1, 1]} : vector<8x32xf32> to vector<1x32xf32>
    %cst_59 = arith.constant dense<0.000000e+00> : vector<16x32xf32>
    %129 = tpu.matmul %8, %126, %cst_59 {dimension_numbers = #tpu.dot_dimension_numbers<[1], [0], [0], [1], [0, 0, 1, 1], [], []>, precision = #tpu.contract_precision<fp32>} : vector<16x16xf32>, vector<16x32xf32>, vector<16x32xf32> -> vector<16x32xf32>
    %130 = arith.addf %129, %116 : vector<16x32xf32>
    %cst_60 = arith.constant dense<0.000000e+00> : vector<16x32xf32>
    %131 = tpu.matmul %130, %127, %cst_60 {dimension_numbers = #tpu.dot_dimension_numbers<[1], [0], [0], [1], [0, 0, 1, 1], [], []>, precision = #tpu.contract_precision<fp32>} : vector<16x32xf32>, vector<32x32xf32>, vector<16x32xf32> -> vector<16x32xf32>
    %132 = vector.broadcast %128 : vector<1x32xf32> to vector<16x32xf32>
    %133 = arith.addf %131, %132 : vector<16x32xf32>
    %cst_61 = arith.constant 0.000000e+00 : f32
    %134 = vector.broadcast %cst_61 : f32 to vector<16x32xf32>
    %135 = arith.maximumf %133, %134 : vector<16x32xf32>
    %136 = arith.addf %135, %126 : vector<16x32xf32>
    %cst_62 = arith.constant dense<0.000000e+00> : vector<16x32xf32>
    %137 = tpu.matmul %136, %94, %cst_62 {dimension_numbers = #tpu.dot_dimension_numbers<[1], [0], [0], [1], [0, 0, 1, 1], [], []>, precision = #tpu.contract_precision<fp32>} : vector<16x32xf32>, vector<32x32xf32>, vector<16x32xf32> -> vector<16x32xf32>
    %138 = vector.broadcast %91 : vector<1x32xf32> to vector<16x32xf32>
    %139 = arith.addf %137, %138 : vector<16x32xf32>
    %cst_63 = arith.constant 0.000000e+00 : f32
    %140 = vector.broadcast %cst_63 : f32 to vector<16x32xf32>
    %141 = arith.maximumf %139, %140 : vector<16x32xf32>
    %cst_64 = arith.constant dense<0.000000e+00> : vector<16x16xf32>
    %142 = tpu.matmul %141, %95, %cst_64 {dimension_numbers = #tpu.dot_dimension_numbers<[1], [0], [0], [1], [0, 0, 1, 1], [], []>, precision = #tpu.contract_precision<fp32>} : vector<16x32xf32>, vector<32x16xf32>, vector<16x16xf32> -> vector<16x16xf32>
    %143 = vector.broadcast %96 : vector<1x16xf32> to vector<16x16xf32>
    %144 = arith.addf %142, %143 : vector<16x16xf32>
    %cst_65 = arith.constant 0.000000e+00 : f32
    %145 = vector.broadcast %cst_65 : f32 to vector<16x16xf32>
    %146 = arith.maximumf %144, %145 : vector<16x16xf32>
    %cst_66 = arith.constant dense<0.000000e+00> : vector<16x2xf32>
    %147 = tpu.matmul %146, %97, %cst_66 {dimension_numbers = #tpu.dot_dimension_numbers<[1], [0], [0], [1], [0, 0, 1, 1], [], []>, precision = #tpu.contract_precision<fp32>} : vector<16x16xf32>, vector<16x2xf32>, vector<16x2xf32> -> vector<16x2xf32>
    %148 = vector.broadcast %98 : vector<1x2xf32> to vector<16x2xf32>
    %149 = arith.addf %147, %148 : vector<16x2xf32>
    %150 = arith.addf %80, %149 : vector<16x2xf32>
    %151 = arith.subf %150, %0 : vector<16x2xf32>
    %c0_67 = arith.constant 0 : index
    %c0_68 = arith.constant 0 : index
    %152 = vector.load %arg10[%c0_67, %c0_68] : memref<16x2xf32, #tpu.memory_space<vmem>>, vector<16x2xf32>
    tpu.vector_store %arg10[%c0_67, %c0_68], %151 {strides = array<i32>} : memref<16x2xf32, #tpu.memory_space<vmem>>, vector<16x2xf32>,
    return
  }
}

</mosaic_0001>

<bundles_post_ra>
// kernel: tpu_custom_call.1
= control target key start
LH: loop header
LB: loop body
LE: loop exit
PB: predicated region body
PF: predicated region fallthrough
CT: control target
= control target key end

     0   :  { %vm41_vm0 = vcmask 130048   ;;  %vm143_vm1 = vcmask 15360   ;;  %vm1030_vm4 = vcmask 261120   ;;  %vm1665_vm11 = vcmask 64512   ;;  %s18210_s5 = inlined_call_operand.vmem [shape: f32[16,2], index: 5, kind: input, shape index: {}]   ;;  %s18211_s0 = inlined_call_operand.vmem [shape: f32[32,16], index: 0, kind: input, shape index: {}]   ;;  %s18212_s9 = inlined_call_operand.vmem [shape: f32[2,128,32], index: 9, kind: input, shape index: {}]   ;;  %s18213_s3 = inlined_call_operand.vmem [shape: f32[32,128], index: 3, kind: input, shape index: {}]   ;;  %s18214_s6 = inlined_call_operand.vmem [shape: f32[2,136,32], index: 6, kind: input, shape index: {}]   ;;  %s18215_s7 = inlined_call_operand.vmem [shape: f32[2,8,32], index: 7, kind: input, shape index: {}]   ;;  %s18216_s4 = inlined_call_operand.vmem [shape: f32[16,8], index: 4, kind: input, shape index: {}]   ;;  %s18217_s1 = inlined_call_operand.vmem [shape: f32[16,32], index: 1, kind: input, shape index: {}]   ;;  %s18218_s2 = inlined_call_operand.vmem [shape: f32[16,16], index: 2, kind: input, shape index: {}]   ;;  %s18219_s8 = inlined_call_operand.vmem [shape: f32[2,64,16], index: 8, kind: input, shape index: {}]   ;;  %s18220_s10 = inlined_call_operand.vmem [shape: f32[16,2], index: 10, kind: output, shape index: {}]  }
   0x1   :  { %v35_v0 = vld [vmem:[%s18210_s5] sm:$0xff]  ;;  %v36_v1 = vld [vmem:[%s18210_s5 + $0x8] sm:$0xff]  ;;  %v222_v6 = vld [vmem:[%s18212_s9 + $0x10] sm:$0xff] }
   0x2   :  { %v37_v2 = vld [vmem:[%s18211_s0] sm:$0xff]  ;;  %v15098_v3 = vpack.c.bf16 %v36_v1, %v35_v0  ;;  %v221_v5 = vld [vmem:[%s18212_s9 + $0x8] sm:$0xff]  ;;  %v223_v9 = vld [vmem:[%s18212_s9 + $0x18] sm:$0xff]  ;;  %v243_v10 = vand.u32 4294901760, %v222_v6 }
   0x3   :  { %13496 = vmatprep.mubr.msk.f32.mxu0 %vm41_vm0, %v37_v2  ;;  %v220_v4 = vld [vmem:[%s18212_s9] sm:$0xff]  ;;  %v240_v8 = vand.u32 4294901760, %v221_v5  ;;  %v16605_v12 = vld [vmem:[%s18212_s9 + $0x28] sm:$0xff]  ;;  %v246_v14 = vand.u32 4294901760, %v223_v9  ;;  %v39_v15 = vld [vmem:[%s18211_s0 + $0x10] sm:$0xff] }
   0x4   :  { %15099 = vmatprep.subr.bf16.mxu0 %v15098_v3  ;;  %v237_v7 = vand.u32 4294901760, %v220_v4  ;;  %v224_v11 = vld [vmem:[%s18212_s9 + $0x20] sm:$0xff]  ;;  %v38_v13 = vld [vmem:[%s18211_s0 + $0x8] sm:$0xff]  ;;  %v252_v18 = vand.u32 4294901760, %v16605_v12  ;;  %v16621_v20 = vld [vmem:[%s18212_s9 + $0x30] sm:$0xff]  ;;  %v16716_v48 = vsub.f32 %v222_v6, %v243_v10 }
   0x5   :  { %15101 = vmatpush3.bf16.msra.mxu0 %v15098_v3  ;;  %v249_v17 = vand.u32 4294901760, %v224_v11  ;;  %v16616_v19 = vpack.c.bf16 %v246_v14, %v243_v10  ;;  %v16626_v21 = vld [vmem:[%s18212_s9 + $0x38] sm:$0xff]  ;;  %v188_v22 = vld [vmem:[%s18213_s3] sm:$0xff]  ;;  %v255_v26 = vand.u32 4294901760, %v16621_v20  ;;  %v16653_v29 = vld [vmem:[%s18212_s9 + $0x48] sm:$0xff]  ;;  %v16689_v40 = vsub.f32 %v221_v5, %v240_v8 }
   0x6   :  { %v16613_v16 = vpack.c.bf16 %v240_v8, %v237_v7  ;;  %v40_v23 = vld [vmem:[%s18211_s0 + $0x18] sm:$0xff]  ;;  %v16638_v24 = vand.u32 4294901760, %v188_v22  ;;  %v258_v27 = vand.u32 4294901760, %v16626_v21  ;;  %v16648_v28 = vld [vmem:[%s18212_s9 + $0x40] sm:$0xff]  ;;  %v264_v34 = vand.u32 4294901760, %v16653_v29  ;;  %v16675_v35 = vld [vmem:[%s18212_s9 + $0x50] sm:$0xff] }
   0x7   :  { %v16641_v25 = vpack.c.bf16 %v252_v18, %v249_v17  ;;  %v261_v33 = vand.u32 4294901760, %v16648_v28  ;;  %v16680_v36 = vld [vmem:[%s18212_s9 + $0x58] sm:$0xff]  ;;  %v16687_v39 = vsub.f32 %v220_v4, %v237_v7  ;;  %v189_v41 = vld [vmem:[%s18213_s3 + $0x8] sm:$0xff]  ;;  %v267_v43 = vand.u32 4294901760, %v16675_v35  ;;  %v16706_v45 = vld [vmem:[%s18212_s9 + $0x60] sm:$0xff] }
   0x8   :  { %13497 = vmatmul.mubr.msk.f32.vlgmr.msra.gmra.mrb[0].mxu0 %vm41_vm0, %v38_v13  ;;  %15103 = vmatprep.subr.bf16.mxu1 %v16613_v16  ;;  %v16656_v30 = vsub.f32 %v188_v22, %v16638_v24  ;;  %v16668_v32 = vpack.c.bf16 %v258_v27, %v255_v26  ;;  %v270_v44 = vand.u32 4294901760, %v16680_v36  ;;  %v16711_v46 = vld [vmem:[%s18212_s9 + $0x68] sm:$0xff]  ;;  %v16714_v47 = vand.u32 4294901760, %v189_v41  ;;  %v16733_v54 = vld [vmem:[%s18212_s9 + $0x70] sm:$0xff]  ;;  %v16738_v55 = vld [vmem:[%s18212_s9 + $0x78] sm:$0xff] }
   0x9   :  { %13499 = vmatprep.mubr.msk.f32.mxu0 %vm41_vm0, %v39_v15  ;;  %15105 = vmatpush3.bf16.msra.mxu1 %v16613_v16  ;;  %v16699_v42 = vpack.c.bf16 %v264_v34, %v261_v33  ;;  %v360_v49 = vand.u32 4294901760, %v16687_v39  ;;  %v367_v50 = vand.u32 4294901760, %v16689_v40  ;;  %v273_v52 = vand.u32 4294901760, %v16706_v45  ;;  %v190_v58 = vld [vmem:[%s18213_s3 + $0x10] sm:$0xff]  ;;  %v191_v5 = vld [vmem:[%s18213_s3 + $0x18] sm:$0xff] }
   0xa   :  { %15107 = vmatprep.subr.bf16.mxu1 %v16616_v19  ;;  %v16661_v31 = vand.u32 4294901760, %v16656_v30  ;;  %v16726_v51 = vpack.c.bf16 %v270_v44, %v267_v43  ;;  %v276_v53 = vand.u32 4294901760, %v16711_v46  ;;  %v16740_v56 = vsub.f32 %v223_v9, %v246_v14 }
   0xb   :  { %v16742_v57 = vsub.f32 %v224_v11, %v249_v17  ;;  %v16748_v59 = vsub.f32 %v189_v41, %v16714_v47  ;;  %v374_v60 = vand.u32 4294901760, %v16716_v48  ;;  %v16752_v61 = vsub.f32 %v16605_v12, %v252_v18 }
   0xc   :  { %13500 = vmatmul.mubr.msk.f32.gmra.mrb[2].mxu0 %vm41_vm0, %v40_v23  ;;  %18271 = vst [vmem:[#allocation2_spill] sm:$0xff] %v16661_v31  ;;  %v320_v37 = vsub.f32 %v16656_v30, %v16661_v31  ;;  %v279_v62 = vand.u32 4294901760, %v16733_v54  ;;  %v282_v63 = vand.u32 4294901760, %v16738_v55  ;;  %v361_v0 = vsub.f32 %v16687_v39, %v360_v49 }
   0xd   :  { %15109 = vmatpush3.bf16.msra.mxu1 %v16616_v19  ;;  %v368_v1 = vsub.f32 %v16689_v40, %v367_v50  ;;  %v16768_v2 = vpack.c.bf16 %v276_v53, %v273_v52  ;;  %v381_v3 = vand.u32 4294901760, %v16740_v56  ;;  %v16771_v4 = vand.u32 4294901760, %v190_v58 }
   0xe   :  { %15111 = vmatprep.subr.bf16.mxu1 %v16641_v25  ;;  %v16685_v38 = vand.u32 4294901760, %v320_v37  ;;  %v18222_v6 = vand.u32 4294901760, %v16742_v57  ;;  %v16778_v7 = vand.u32 4294901760, %v16748_v59  ;;  %v375_v8 = vsub.f32 %v16716_v48, %v374_v60 }
   0xf   :  { %v18221_v9 = vand.u32 4294901760, %v16752_v61  ;;  %v16785_v10 = vsub.f32 %v190_v58, %v16771_v4  ;;  %v16792_v11 = vpack.c.bf16 %v282_v63, %v279_v62  ;;  %v362_v12 = vand.u32 4294901760, %v361_v0 }
  0x10   :  { %13534 = vmatprep.mubr.f32.mxu1 %v16685_v38  ;;  %18272 = vst [vmem:[#allocation3_spill] sm:$0xff] %v16778_v7  ;;  %v369_v13 = vand.u32 4294901760, %v368_v1  ;;  %v16794_v14 = vand.u32 4294901760, %v191_v5  ;;  %v382_v15 = vsub.f32 %v16740_v56, %v381_v3  ;;  %v16803_v17 = vsub.f32 %v16621_v20, %v255_v26 }
  0x11   :  { %15113 = vmatpush3.bf16.msra.mxu1 %v16641_v25  ;;  %v16808_v18 = vsub.f32 %v16626_v21, %v258_v27  ;;  %v16811_v22 = vand.u32 4294901760, %v16785_v10  ;;  %v330_v37 = vsub.f32 %v16748_v59, %v16778_v7  ;;  %v376_v41 = vand.u32 4294901760, %v375_v8 }
  0x12   :  { %15115 = vmatprep.subr.bf16.mxu1 %v16668_v32  ;;  %v16814_v23 = vsub.f32 %v191_v5, %v16794_v14  ;;  %v389_v20 = vsub.f32 %v16742_v57, %v18222_v6  ;;  %v396_v26 = vsub.f32 %v16752_v61, %v18221_v9  ;;  %v15134_v21 = vpack.c.bf16 %v369_v13, %v362_v12 }
  0x13   :  { %18273 = vst [vmem:[#allocation4_spill] sm:$0xff] %v16811_v22  ;;  %v16828_v27 = vsub.f32 %v16648_v28, %v261_v33  ;;  %v340_v58 = vsub.f32 %v16785_v10, %v16811_v22  ;;  %v383_v1 = vand.u32 4294901760, %v382_v15  ;;  %v402_v5 = vand.u32 4294901760, %v16803_v17 }
  0x14   :  { %18274 = vst [vmem:[#allocation5_spill] sm:$0xff] %v16814_v23  ;;  %v16833_v0 = vand.u32 4294901760, %v16814_v23  ;;  %v18223_v8 = vand.u32 4294901760, %v16808_v18  ;;  %v16841_v12 = vsub.f32 %v16653_v29, %v264_v34  ;;  %v16843_v28 = vand.u32 4294901760, %v330_v37 }
  0x15   :  { %15117 = vmatpush3.bf16.msra.mxu1 %v16668_v32  ;;  %v390_v33 = vand.u32 4294901760, %v389_v20  ;;  %v16848_v13 = vsub.f32 %v16675_v35, %v267_v43  ;;  %v397_v9 = vand.u32 4294901760, %v396_v26  ;;  %v18224_v6 = vand.u32 4294901760, %v16828_v27 }
  0x16   :  { %15119 = vmatprep.subr.bf16.mxu1 %v16699_v42  ;;  %18275 = vst [vmem:[#allocation6_spill] sm:$0xff] %v16833_v0  ;;  %v350_v15 = vsub.f32 %v16814_v23, %v16833_v0  ;;  %v16857_v29 = vsub.f32 %v16680_v36, %v270_v44  ;;  %v16859_v34 = vand.u32 4294901760, %v340_v58  ;;  %v15138_v37 = vpack.c.bf16 %v383_v1, %v376_v41 }
  0x17   :  { %v403_v35 = vsub.f32 %v16803_v17, %v402_v5  ;;  %v410_v43 = vsub.f32 %v16808_v18, %v18223_v8  ;;  %v423_v20 = vand.u32 4294901760, %v16841_v12  ;;  %v18226_v26 = vand.u32 4294901760, %v16848_v13 }
  0x18   :  { %v16870_v36 = vand.u32 4294901760, %v350_v15  ;;  %v417_v44 = vsub.f32 %v16828_v27, %v18224_v6  ;;  %v18225_v41 = vand.u32 4294901760, %v16857_v29  ;;  %v16879_v58 = vsub.f32 %v16706_v45, %v273_v52 }
  0x19   :  { %15121 = vmatpush3.bf16.msra.mxu1 %v16699_v42  ;;  %v16884_v1 = vsub.f32 %v16711_v46, %v276_v53  ;;  %v404_v15 = vand.u32 4294901760, %v403_v35  ;;  %v411_v8 = vand.u32 4294901760, %v410_v43  ;;  %v424_v6 = vsub.f32 %v16841_v12, %v423_v20 }
  0x1a   :  { %15123 = vmatprep.subr.bf16.mxu1 %v16726_v51  ;;  %v431_v45 = vsub.f32 %v16848_v13, %v18226_v26  ;;  %v418_v52 = vand.u32 4294901760, %v417_v44  ;;  %v438_v46 = vsub.f32 %v16857_v29, %v18225_v41  ;;  %v444_v53 = vand.u32 4294901760, %v16879_v58 }
  0x1b   :  { %v425_v35 = vand.u32 4294901760, %v424_v6  ;;  %v16903_v43 = vsub.f32 %v16733_v54, %v279_v62 }
  0x1c   :  { %v432_v44 = vand.u32 4294901760, %v431_v45  ;;  %v439_v41 = vand.u32 4294901760, %v438_v46  ;;  %v445_v26 = vsub.f32 %v16879_v58, %v444_v53 }
  0x1d   :  { %15125 = vmatpush3.bf16.msra.mxu1 %v16726_v51  ;;  %v458_v54 = vand.u32 4294901760, %v16903_v43 }
  0x1e   :  { %15127 = vmatprep.subr.bf16.mxu1 %v16768_v2 }
  0x21   :  { %15129 = vmatpush3.bf16.msra.mxu1 %v16768_v2 }
  0x22   :  { %15131 = vmatprep.subr.bf16.mxu1 %v16792_v11 }
  0x25   :  { %15133 = vmatpush3.bf16.msra.mxu1 %v16792_v11 }
  0x26   :  { %15135 = vmatprep.subr.bf16.mxu1 %v15134_v21 }
  0x28   :  { %13535 = vmatmul.mubr.f32.vlgmr.msra.gmra.mrb[0].mxu1 %v16843_v28 }
  0x29   :  { %15137 = vmatpush3.bf16.msra.mxu1 %v15134_v21  ;;  %13537 = vmatprep.mubr.f32.mxu1 %v16859_v34  ;;  %v15142_v21 = vpack.c.bf16 %v397_v9, %v390_v33  ;;  %v451_v9 = vand.u32 4294901760, %v16884_v1  ;;  %v15146_v33 = vpack.c.bf16 %v411_v8, %v404_v15  ;;  %v15150_v8 = vpack.c.bf16 %v425_v35, %v418_v52 }
  0x2a   :  { %15139 = vmatprep.subr.bf16.mxu1 %v15138_v37  ;;  %v459_v15 = vsub.f32 %v16903_v43, %v458_v54 }
  0x2b   :  { %v452_v6 = vsub.f32 %v16884_v1, %v451_v9 }
  0x2c   :  { %13538 = vmatmul.mubr.f32.gmra.mrb[2].mxu1 %v16870_v36  ;;  %v460_v46 = vand.u32 4294901760, %v459_v15  ;;  %v15230_v15 = vpack.c.bf16 %v367_v50, %v360_v49  ;;  %v18279_v50 = vand.u32 4294901760, %v16828_v27 }
  0x2d   :  { %15141 = vmatpush3.bf16.msra.mxu1 %v15138_v37  ;;  %13572 = vmatprep.mubr.f32.mxu1 %v16638_v24  ;;  %v16908_v37 = vsub.f32 %v16738_v55, %v282_v63  ;;  %v446_v55 = vand.u32 4294901760, %v445_v26  ;;  %v15154_v63 = vpack.c.bf16 %v439_v41, %v432_v44  ;;  %v15166_v26 = vpack.c.bf16 %v16689_v40, %v16687_v39 }
  0x2e   :  { %15143 = vmatprep.subr.bf16.mxu1 %v15142_v21  ;;  %v15170_v41 = vpack.c.bf16 %v16740_v56, %v16716_v48  ;;  %v15174_v44 = vpack.c.bf16 %v16752_v61, %v16742_v57  ;;  %v18277_v39 = vand.u32 4294901760, %v16752_v61  ;;  %v18278_v48 = vand.u32 4294901760, %v16808_v18 }
  0x2f   :  { %v465_v62 = vand.u32 4294901760, %v16908_v37  ;;  %v15246_v56 = vpack.c.bf16 %v423_v20, %v18279_v50 }
  0x30   :  { %v15242_v49 = vpack.c.bf16 %v18278_v48, %v402_v5 }
  0x31   :  { %15145 = vmatpush3.bf16.msra.mxu1 %v15142_v21  ;;  %v453_v21 = vand.u32 4294901760, %v452_v6  ;;  %v466_v45 = vsub.f32 %v16908_v37, %v465_v62  ;;  %v15182_v6 = vpack.c.bf16 %v16841_v12, %v16828_v27 }
  0x32   :  { %15147 = vmatprep.subr.bf16.mxu1 %v15146_v33 }
  0x33   :  { %v15158_v52 = vpack.c.bf16 %v453_v21, %v446_v55  ;;  %v467_v35 = vand.u32 4294901760, %v466_v45  ;;  %v15186_v55 = vpack.c.bf16 %v16857_v29, %v16848_v13  ;;  %v15194_v21 = vpack.c.bf16 %v16908_v37, %v16903_v43 }
  0x34   :  { %v15234_v45 = vpack.c.bf16 %v381_v3, %v374_v60  ;;  %v18281_v60 = vand.u32 4294901760, %v16857_v29  ;;  %v15254_v3 = vpack.c.bf16 %v451_v9, %v444_v53  ;;  %v195_v29 = vld [vmem:[%s18214_s6 + $0x8] sm:$0xff]  ;;  %v197_v53 = vld [vmem:[%s18214_s6 + $0x18] sm:$0xff] }
  0x35   :  { %15149 = vmatpush3.bf16.msra.mxu1 %v15146_v33  ;;  %v15162_v33 = vpack.c.bf16 %v467_v35, %v460_v46  ;;  %v1053_v37 = vand.u32 4294901760, %v197_v53 }
  0x36   :  { %15151 = vmatprep.subr.bf16.mxu1 %v15150_v8 }
  0x39   :  { %15153 = vmatpush3.bf16.msra.mxu1 %v15150_v8  ;;  %v15178_v8 = vpack.c.bf16 %v16808_v18, %v16803_v17  ;;  %v15258_v17 = vpack.c.bf16 %v465_v62, %v458_v54 }
  0x3a   :  { %15155 = vmatprep.subr.bf16.mxu1 %v15154_v63 }
  0x3d   :  { %15157 = vmatpush3.bf16.msra.mxu1 %v15154_v63  ;;  %v15190_v63 = vpack.c.bf16 %v16884_v1, %v16879_v58  ;;  %v1047_v58 = vand.u32 4294901760, %v195_v29  ;;  %v196_v1 = vld [vmem:[%s18214_s6 + $0x10] sm:$0xff] }
  0x3e   :  { %15159 = vmatprep.subr.bf16.mxu1 %v15158_v52  ;;  %v1050_v43 = vand.u32 4294901760, %v196_v1 }
  0x3f   :  { %v1161_v62 = vsub.f32 %v195_v29, %v1047_v58 }
  0x40   :  { %v17042_v46 = vpack.c.bf16 %v1053_v37, %v1050_v43 }
  0x41   :  { %15161 = vmatpush3.bf16.msra.mxu1 %v15158_v52  ;;  %v18276_v52 = vand.u32 4294901760, %v16742_v57  ;;  %v18280_v57 = vand.u32 4294901760, %v16848_v13  ;;  %v194_v13 = vld [vmem:[%s18214_s6] sm:$0xff] }
  0x42   :  { %15163 = vmatprep.subr.bf16.mxu1 %v15162_v33  ;;  %v1044_v20 = vand.u32 4294901760, %v194_v13 }
  0x43   :  { %v15238_v40 = vpack.c.bf16 %v18277_v39, %v18276_v52  ;;  %v15250_v61 = vpack.c.bf16 %v18281_v60, %v18280_v57 }
  0x44   :  { %v17039_v9 = vpack.c.bf16 %v1047_v58, %v1044_v20  ;;  %v1154_v54 = vsub.f32 %v194_v13, %v1044_v20 }
  0x45   :  { %15165 = vmatpush3.bf16.msra.mxu1 %v15162_v33  ;;  %v1162_v33 = vand.u32 4294901760, %v1161_v62 }
  0x46   :  { %15167 = vmatprep.subr.bf16.mxu1 %v15166_v26  ;;  %15295 = vmatprep.subr.bf16.mxu0 %v17039_v9  ;;  %v1155_v35 = vand.u32 4294901760, %v1154_v54 }
  0x47   :  { %15297 = vmatpush3.bf16.msra.mxu0 %v17039_v9 }
  0x48   :  { %13573 = vmatmul.mubr.f32.vlgmr.msra.gmra.mrb[0].mxu1 %v16714_v47  ;;  %15299 = vmatprep.subr.bf16.mxu0 %v17042_v46 }
  0x49   :  { %15169 = vmatpush3.bf16.msra.mxu1 %v15166_v26  ;;  %13575 = vmatprep.mubr.f32.mxu1 %v16771_v4  ;;  %v1156_v26 = vsub.f32 %v1154_v54, %v1155_v35 }
  0x4a   :  { %15171 = vmatprep.subr.bf16.mxu1 %v15170_v41 }
  0x4b   :  { %15301 = vmatpush3.bf16.msra.mxu0 %v17042_v46 }
  0x4c   :  { %13576 = vmatmul.mubr.f32.gmra.mrb[2].mxu1 %v16794_v14 }
  0x4d   :  { %15173 = vmatpush3.bf16.msra.mxu1 %v15170_v41  ;;  %13610 = vmatprep.mubr.f32.mxu1 %v16656_v30  ;;  %v1163_v41 = vsub.f32 %v1161_v62, %v1162_v33 }
  0x4e   :  { %15175 = vmatprep.subr.bf16.mxu1 %v15174_v44 }
  0x51   :  { %15177 = vmatpush3.bf16.msra.mxu1 %v15174_v44  ;;  %v1168_v44 = vsub.f32 %v196_v1, %v1050_v43 }
  0x52   :  { %15179 = vmatprep.subr.bf16.mxu1 %v15178_v8 }
  0x55   :  { %15181 = vmatpush3.bf16.msra.mxu1 %v15178_v8  ;;  %v1175_v8 = vsub.f32 %v197_v53, %v1053_v37 }
  0x56   :  { %15183 = vmatprep.subr.bf16.mxu1 %v15182_v6 }
  0x57   :  { %v17054_v50 = vpack.c.bf16 %v1175_v8, %v1168_v44 }
  0x59   :  { %15185 = vmatpush3.bf16.msra.mxu1 %v15182_v6  ;;  %v1157_v6 = vand.u32 4294901760, %v1156_v26 }
  0x5a   :  { %15187 = vmatprep.subr.bf16.mxu1 %v15186_v55 }
  0x5d   :  { %15189 = vmatpush3.bf16.msra.mxu1 %v15186_v55  ;;  %v1164_v55 = vand.u32 4294901760, %v1163_v41 }
  0x5e   :  { %15191 = vmatprep.subr.bf16.mxu1 %v15190_v63 }
  0x61   :  { %15193 = vmatpush3.bf16.msra.mxu1 %v15190_v63  ;;  %v1169_v63 = vand.u32 4294901760, %v1168_v44 }
  0x62   :  { %15195 = vmatprep.subr.bf16.mxu1 %v15194_v21 }
  0x65   :  { %15197 = vmatpush3.bf16.msra.mxu1 %v15194_v21  ;;  %v1176_v21 = vand.u32 4294901760, %v1175_v8 }
  0x66   :  { %15199 = vmatprep.subr.bf16.mxu1 %v16613_v16 }
  0x67   :  { %v1177_v52 = vsub.f32 %v1175_v8, %v1176_v21  ;;  %v17058_v57 = vpack.c.bf16 %v1176_v21, %v1169_v63 }
  0x68   :  { %13611 = vmatmul.mubr.f32.vlgmr.msra.gmra.mrb[0].mxu1 %v16748_v59 }
  0x69   :  { %15201 = vmatpush3.bf16.msra.mxu1 %v16613_v16  ;;  %13613 = vmatprep.mubr.f32.mxu1 %v16785_v10 }
  0x6a   :  { %15203 = vmatprep.subr.bf16.mxu1 %v16616_v19 }
  0x6c   :  { %13614 = vmatmul.mubr.f32.gmra.mrb[2].mxu1 %v16814_v23 }
  0x6d   :  { %15205 = vmatpush3.bf16.msra.mxu1 %v16616_v19  ;;  %13648 = vmatprep.mubr.f32.mxu1 %v16661_v31 }
  0x6e   :  { %15207 = vmatprep.subr.bf16.mxu1 %v16641_v25 }
  0x71   :  { %15209 = vmatpush3.bf16.msra.mxu1 %v16641_v25 }
  0x72   :  { %15211 = vmatprep.subr.bf16.mxu1 %v16668_v32 }
  0x75   :  { %15213 = vmatpush3.bf16.msra.mxu1 %v16668_v32 }
  0x76   :  { %15215 = vmatprep.subr.bf16.mxu1 %v16699_v42 }
  0x79   :  { %15217 = vmatpush3.bf16.msra.mxu1 %v16699_v42 }
  0x7a   :  { %15219 = vmatprep.subr.bf16.mxu1 %v16726_v51 }
  0x7d   :  { %15221 = vmatpush3.bf16.msra.mxu1 %v16726_v51 }
  0x7e   :  { %15223 = vmatprep.subr.bf16.mxu1 %v16768_v2 }
  0x81   :  { %15225 = vmatpush3.bf16.msra.mxu1 %v16768_v2 }
  0x82   :  { %15227 = vmatprep.subr.bf16.mxu1 %v16792_v11 }
  0x85   :  { %15229 = vmatpush3.bf16.msra.mxu1 %v16792_v11 }
  0x86   :  { %15231 = vmatprep.subr.bf16.mxu1 %v15230_v15 }
  0x88   :  { %13649 = vmatmul.mubr.f32.vlgmr.msra.gmra.mrb[0].mxu1 %v16778_v7 }
  0x89   :  { %15233 = vmatpush3.bf16.msra.mxu1 %v15230_v15  ;;  %13651 = vmatprep.mubr.f32.mxu1 %v16811_v22  ;;  %v17047_v15 = vpack.c.bf16 %v1164_v55, %v1157_v6 }
  0x8a   :  { %15235 = vmatprep.subr.bf16.mxu1 %v15234_v45 }
  0x8b   :  { %15303 = vmatprep.subr.bf16.mxu0 %v17047_v15 }
  0x8c   :  { %13652 = vmatmul.mubr.f32.gmra.mrb[2].mxu1 %v16833_v0 }
  0x8d   :  { %15237 = vmatpush3.bf16.msra.mxu1 %v15234_v45  ;;  %13686 = vmatprep.mubr.f32.mxu1 %v16638_v24  ;;  %v1170_v45 = vsub.f32 %v1168_v44, %v1169_v63 }
  0x8e   :  { %15239 = vmatprep.subr.bf16.mxu1 %v15238_v40 }
  0x8f   :  { %v1171_v39 = vand.u32 4294901760, %v1170_v45 }
  0x91   :  { %15241 = vmatpush3.bf16.msra.mxu1 %v15238_v40  ;;  %v1178_v40 = vand.u32 4294901760, %v1177_v52 }
  0x92   :  { %15243 = vmatprep.subr.bf16.mxu1 %v15242_v49 }
  0x93   :  { %v17050_v48 = vpack.c.bf16 %v1178_v40, %v1171_v39 }
  0x95   :  { %15245 = vmatpush3.bf16.msra.mxu1 %v15242_v49  ;;  %v17052_v49 = vpack.c.bf16 %v1161_v62, %v1154_v54 }
  0x96   :  { %15247 = vmatprep.subr.bf16.mxu1 %v15246_v56 }
  0x99   :  { %15249 = vmatpush3.bf16.msra.mxu1 %v15246_v56  ;;  %v17056_v56 = vpack.c.bf16 %v1162_v33, %v1155_v35 }
  0x9a   :  { %15251 = vmatprep.subr.bf16.mxu1 %v15250_v61 }
  0x9d   :  { %15253 = vmatpush3.bf16.msra.mxu1 %v15250_v61  ;;  %v1006_v61 = vlaneseq }
  0x9e   :  { %15255 = vmatprep.subr.bf16.mxu1 %v15254_v3 }
  0xa1   :  { %15257 = vmatpush3.bf16.msra.mxu1 %v15254_v3  ;;  %v17060_v3 = vshrl.u32 %v1006_v61, 7 }
  0xa2   :  { %15259 = vmatprep.subr.bf16.mxu1 %v15258_v17 }
  0xa5   :  { %15261 = vmatpush3.bf16.msra.mxu1 %v15258_v17 }
  0xa6   :  { %15263 = vmatprep.subr.bf16.mxu1 %v16613_v16 }
  0xa8   :  { %13687 = vmatmul.mubr.f32.vlgmr.msra.gmra.mrb[0].mxu1 %v16714_v47 }
  0xa9   :  { %15265 = vmatpush3.bf16.msra.mxu1 %v16613_v16  ;;  %13689 = vmatprep.mubr.f32.mxu1 %v16771_v4 }
  0xaa   :  { %15267 = vmatprep.subr.bf16.mxu1 %v16616_v19 }
  0xac   :  { %13690 = vmatmul.mubr.f32.gmra.mrb[2].mxu1 %v16794_v14 }
  0xad   :  { %15269 = vmatpush3.bf16.msra.mxu1 %v16616_v19  ;;  %13724 = vmatprep.mubr.f32.mxu1 %v16638_v24 }
  0xae   :  { %15271 = vmatprep.subr.bf16.mxu1 %v16641_v25 }
  0xb1   :  { %15273 = vmatpush3.bf16.msra.mxu1 %v16641_v25 }
  0xb2   :  { %15275 = vmatprep.subr.bf16.mxu1 %v16668_v32 }
  0xb5   :  { %15277 = vmatpush3.bf16.msra.mxu1 %v16668_v32 }
  0xb6   :  { %15279 = vmatprep.subr.bf16.mxu1 %v16699_v42 }
  0xb9   :  { %15281 = vmatpush3.bf16.msra.mxu1 %v16699_v42 }
  0xba   :  { %15283 = vmatprep.subr.bf16.mxu1 %v16726_v51 }
  0xbd   :  { %15285 = vmatpush3.bf16.msra.mxu1 %v16726_v51 }
  0xbe   :  { %15287 = vmatprep.subr.bf16.mxu1 %v16768_v2 }
  0xc1   :  { %15289 = vmatpush3.bf16.msra.mxu1 %v16768_v2 }
  0xc2   :  { %15291 = vmatprep.subr.bf16.mxu1 %v16792_v11 }
  0xc5   :  { %15293 = vmatpush3.bf16.msra.mxu1 %v16792_v11 }
  0xc8   :  { %13725 = vmatmul.mubr.f32.vlgmr.msra.gmra.mrb[0].mxu1 %v16714_v47 }
  0xc9   :  { %13727 = vmatprep.mubr.f32.mxu1 %v16771_v4 }
  0xcc   :  { %13728 = vmatmul.mubr.f32.gmra.mrb[2].mxu1 %v16794_v14 }
  0xdb   :  { %v13498_v16 = vpop.f32.mrb[0].mxu0 }
  0xdc   :  { %v120_v19 = vpop.f32.mrb[1].mxu0  ;;  %v140_v32 = vmul.f32 %v13498_v16, %v13498_v16 }
  0xdd   :  { %v139_v25 = vmul.f32 %v120_v19, %v120_v19  ;;  %v17063_v19 = vsub.s32 0, %v17060_v3 }
  0xde   :  { %v147_v11 = vsel %vm143_vm1, %v140_v32, 0.0  ;;  %v17068_v32 = vld [vmem:[%s18215_s7] sm:$0xff] }
  0xdf   :  { %v13501_v42 = vpop.f32.mrb[2].mxu0  ;;  %v144_v51 = vsel %vm143_vm1, %v139_v25, 0.0  ;;  %18282 = vst [vmem:[#allocation7_spill] sm:$0xff] %v17063_v19 }
  0xe0   :  { %145 = vadd.xlane.f32.xlu0 %v144_v51  ;;  %v130_v2 = vpop.f32.mrb[3].mxu0  ;;  %v142_v27 = vmul.f32 %v13501_v42, %v13501_v42  ;;  %v12585_v42 = vld [vmem:[%s18215_s7 + $0x8] sm:$0xff]  ;;  %v1016_v51 = vsub.s32 1, %v17060_v3 }
  0xe1   :  { %v141_v18 = vmul.f32 %v130_v2, %v130_v2 }
  0xe2   :  { %v153_v12 = vsel %vm143_vm1, %v142_v27, 0.0  ;;  %v1009_v27 = vrot.slane %v17068_v32, %v17063_v19  ;;  %v1017_v13 = vrot.slane %v17068_v32, %v1016_v51  ;;  %v7210_v29 = vrot.slane %v12585_v42, %v1016_v51 }
  0xe3   :  { %v150_v5 = vsel %vm143_vm1, %v141_v18, 0.0 }
  0xe4   :  { %148 = vadd.xlane.f32.xlu0 %v147_v11  ;;  %151 = vadd.xlane.f32.xlu1 %v150_v5  ;;  %v7202_v11 = vrot.slane %v12585_v42, %v17063_v19 }
  0xe8   :  { %154 = vadd.xlane.f32.xlu1 %v153_v12 }
 0x16d   :  { %v146_v60 = vpop.xlane.xlu0 %145 }
 0x16e   :  { %16510 = vrsqrt.f32 %v146_v60  ;;  %vm158_vm2 = vcmp.eq.f32.partialorder %v146_v60, inf  ;;  %v161_v5 = vand.u32 2147483648, %v146_v60  ;;  %vm160_vm3 = vcmp.eq.f32.partialorder %v146_v60, 0.0 }
 0x171   :  { %v149_v17 = vpop.xlane.xlu0 %148  ;;  %v152_v16 = vpop.xlane.xlu1 %151 }
 0x172   :  { %16512 = vrsqrt.f32 %v149_v17  ;;  %vm165_vm5 = vcmp.eq.f32.partialorder %v149_v17, inf  ;;  %vm167_vm6 = vcmp.eq.f32.partialorder %v149_v17, 0.0  ;;  %v168_v54 = vand.u32 2147483648, %v149_v17 }
 0x173   :  { %16514 = vrsqrt.f32 %v152_v16  ;;  %vm172_vm7 = vcmp.eq.f32.partialorder %v152_v16, inf  ;;  %v175_v33 = vand.u32 2147483648, %v152_v16  ;;  %vm174_vm8 = vcmp.eq.f32.partialorder %v152_v16, 0.0 }
 0x175   :  { %v155_v25 = vpop.xlane.xlu1 %154 }
 0x176   :  { %16516 = vrsqrt.f32 %v155_v25  ;;  %vm179_vm9 = vcmp.eq.f32.partialorder %v155_v25, inf  ;;  %v182_v52 = vand.u32 2147483648, %v155_v25  ;;  %vm181_vm10 = vcmp.eq.f32.partialorder %v155_v25, 0.0 }
 0x178   :  { %v16511_v2 = vpop.eup %16510 }
 0x179   :  { %v157_v18 = vmul.f32 %v16511_v2, %v146_v60 }
 0x17b   :  { %v159_v12 = vsel %vm158_vm2, %v146_v60, %v157_v18 }
 0x17c   :  { %v16513_v20 = vpop.eup %16512  ;;  %v162_v58 = vsel %vm160_vm3, %v161_v5, %v159_v12 }
 0x17d   :  { %v16515_v1 = vpop.eup %16514  ;;  %v164_v53 = vmul.f32 %v16513_v20, %v149_v17  ;;  %v1010_v43 = vmul.f32 %v1009_v27, %v162_v58  ;;  %v7203_v37 = vmul.f32 %v7202_v11, %v162_v58 }
 0x17e   :  { %v171_v62 = vmul.f32 %v16515_v1, %v152_v16 }
 0x17f   :  { %v166_v35 = vsel %vm165_vm5, %v149_v17, %v164_v53  ;;  %v1018_v26 = vadd.f32 %v1017_v13, %v1010_v43  ;;  %v17078_v41 = vadd.f32 %v7210_v29, %v7203_v37 }
 0x180   :  { %v16517_v44 = vpop.eup %16516  ;;  %v169_v8 = vsel %vm167_vm6, %v168_v54, %v166_v35  ;;  %v173_v6 = vsel %vm172_vm7, %v152_v16, %v171_v62 }
 0x181   :  { %v1011_v55 = vmul.f32 %v1009_v27, %v169_v8  ;;  %v7204_v63 = vmul.f32 %v7202_v11, %v169_v8  ;;  %v176_v21 = vsel %vm174_vm8, %v175_v33, %v173_v6  ;;  %v178_v45 = vmul.f32 %v16517_v44, %v155_v25 }
 0x182   :  { %v1022_v39 = vmax.f32 %v1018_v26, 0.0  ;;  %v1012_v40 = vmul.f32 %v1009_v27, %v176_v21  ;;  %v7205_v60 = vmul.f32 %v7202_v11, %v176_v21 }
 0x183   :  { %v1019_v61 = vadd.f32 %v1017_v13, %v1011_v55  ;;  %v17080_v42 = vadd.f32 %v7210_v29, %v7204_v63  ;;  %v180_v17 = vsel %vm179_vm9, %v155_v25, %v178_v45 }
 0x184   :  { %v183_v51 = vsel %vm181_vm10, %v182_v52, %v180_v17  ;;  %v1032_v2 = vsel %vm1030_vm4, %v1022_v39, 0  ;;  %v1020_v18 = vadd.f32 %v1017_v13, %v1012_v40  ;;  %v17085_v1 = vadd.f32 %v7210_v29, %v7205_v60 }
 0x185   :  { %v1023_v5 = vmax.f32 %v1019_v61, 0.0  ;;  %v1013_v16 = vmul.f32 %v1009_v27, %v183_v51  ;;  %v7206_v12 = vmul.f32 %v7202_v11, %v183_v51  ;;  %v17083_v20 = vand.u32 4294901760, %v1032_v2 }
 0x186   :  { %v1024_v58 = vmax.f32 %v1020_v18, 0.0  ;;  %v193_v18 = vld [vmem:[%s18216_s4 + $0x8] sm:$0xff] }
 0x187   :  { %v1035_v53 = vsel %vm1030_vm4, %v1023_v5, 0  ;;  %v1021_v43 = vadd.f32 %v1017_v13, %v1013_v16  ;;  %v17088_v37 = vadd.f32 %v7210_v29, %v7206_v12  ;;  %v1113_v25 = vsub.f32 %v1032_v2, %v17083_v20 }
 0x188   :  { %v17090_v54 = vand.u32 4294901760, %v1035_v53  ;;  %v1038_v62 = vsel %vm1030_vm4, %v1024_v58, 0  ;;  %v1670_v16 = vsel %vm1665_vm11, %v193_v18, 0 }
 0x189   :  { %v17094_v35 = vand.u32 4294901760, %v1038_v62  ;;  %v1025_v27 = vmax.f32 %v1021_v43, 0.0  ;;  %v1114_v11 = vand.u32 4294901760, %v1113_v25 }
 0x18a   :  { %v1123_v33 = vsub.f32 %v1035_v53, %v17090_v54  ;;  %v17139_v53 = vand.u32 4294901760, %v1670_v16 }
 0x18b   :  { %v1133_v26 = vsub.f32 %v1038_v62, %v17094_v35  ;;  %v1041_v44 = vsel %vm1030_vm4, %v1025_v27, 0  ;;  %v1115_v8 = vsub.f32 %v1113_v25, %v1114_v11 }
 0x18c   :  { %v1124_v13 = vand.u32 4294901760, %v1123_v33  ;;  %v17099_v29 = vand.u32 4294901760, %v1041_v44 }
 0x18d   :  { %v1134_v6 = vand.u32 4294901760, %v1133_v26  ;;  %v1116_v55 = vand.u32 4294901760, %v1115_v8 }
 0x18e   :  { %v1125_v63 = vsub.f32 %v1123_v33, %v1124_v13  ;;  %v1143_v21 = vsub.f32 %v1041_v44, %v17099_v29 }
 0x18f   :  { %v1135_v45 = vsub.f32 %v1133_v26, %v1134_v6  ;;  %13738 = vmatprep.mubr.f32.mxu0 %v1116_v55 }
 0x190   :  { %v1126_v52 = vand.u32 4294901760, %v1125_v63  ;;  %v1144_v39 = vand.u32 4294901760, %v1143_v21 }
 0x191   :  { %v1136_v40 = vand.u32 4294901760, %v1135_v45 }
 0x192   :  { %13739 = vmatmul.mubr.f32.vlgmr.msra.gmra.mrb[4].mxu0 %v1126_v52  ;;  %v1145_v60 = vsub.f32 %v1143_v21, %v1144_v39 }
 0x193   :  { %13741 = vmatprep.mubr.f32.mxu0 %v1136_v40  ;;  %15305 = vmatpush3.bf16.msra.mxu0 %v17047_v15  ;;  %v185_v40 = vld [vmem:[%s18217_s1 + $0x8] sm:$0xff] }
 0x194   :  { %v1146_v61 = vand.u32 4294901760, %v1145_v60  ;;  %15307 = vmatprep.subr.bf16.mxu0 %v17050_v48  ;;  %v18227_v60 = vsub.s32 2, %v17060_v3 }
 0x196   :  { %13742 = vmatmul.mubr.f32.gmra.mrb[6].mxu0 %v1146_v61  ;;  %v2165_v61 = vsel %vm1030_vm4, %v185_v40, 0 }
 0x197   :  { %15309 = vmatpush3.bf16.msra.mxu0 %v17050_v48  ;;  %13752 = vmatprep.mubr.f32.mxu0 %v17083_v20 }
 0x198   :  { %15311 = vmatprep.subr.bf16.mxu0 %v17052_v49 }
 0x19a   :  { %13753 = vmatmul.mubr.f32.vlgmr.msra.gmra.mrb[4].mxu0 %v17090_v54 }
 0x19b   :  { %13755 = vmatprep.mubr.f32.mxu0 %v17094_v35  ;;  %15313 = vmatpush3.bf16.msra.mxu0 %v17052_v49  ;;  %v17110_v17 = vpop.f32.mrb[0].mxu1  ;;  %v198_v49 = vld [vmem:[%s18214_s6 + $0x20] sm:$0xff] }
 0x19c   :  { %15315 = vmatprep.subr.bf16.mxu0 %v17054_v50  ;;  %v17113_v15 = vpop.f32.mrb[1].mxu1  ;;  %v1673_v2 = vand.u32 4294901760, %v198_v49 }
 0x19e   :  { %13756 = vmatmul.mubr.f32.gmra.mrb[6].mxu0 %v17099_v29  ;;  %v1760_v58 = vsub.f32 %v198_v49, %v1673_v2  ;;  %v1029_v49 = vrot.slane %v17068_v32, %v18227_v60 }
 0x19f   :  { %15317 = vmatpush3.bf16.msra.mxu0 %v17054_v50  ;;  %13766 = vmatprep.mubr.f32.mxu0 %v1113_v25  ;;  %v17117_v48 = vpop.f32.mrb[2].mxu1  ;;  %v192_v50 = vld [vmem:[%s18216_s4] sm:$0xff] }
 0x1a0   :  { %15319 = vmatprep.subr.bf16.mxu0 %v17039_v9  ;;  %v17120_v51 = vpop.f32.mrb[3].mxu1  ;;  %v1667_v5 = vsel %vm1665_vm11, %v192_v50, 0  ;;  %v1761_v25 = vand.u32 4294901760, %v1760_v58  ;;  %v17228_v50 = vand.u32 4294901760, %v2165_v61 }
 0x1a1   :  { %v17136_v12 = vand.u32 4294901760, %v1667_v5 }
 0x1a2   :  { %13767 = vmatmul.mubr.f32.vlgmr.msra.gmra.mrb[4].mxu0 %v1123_v33  ;;  %18290 = vst [vmem:[#allocation15_spill] sm:$0xff] %v17228_v50 }
 0x1a3   :  { %13769 = vmatprep.mubr.f32.mxu0 %v1133_v26  ;;  %15321 = vmatpush3.bf16.msra.mxu0 %v17039_v9  ;;  %v17144_v43 = vsub.f32 %v1667_v5, %v17136_v12 }
 0x1a4   :  { %15323 = vmatprep.subr.bf16.mxu0 %v17042_v46 }
 0x1a5   :  { %v17154_v62 = vand.u32 4294901760, %v17144_v43 }
 0x1a6   :  { %13770 = vmatmul.mubr.f32.gmra.mrb[6].mxu0 %v1143_v21 }
 0x1a7   :  { %15325 = vmatpush3.bf16.msra.mxu0 %v17042_v46  ;;  %13780 = vmatprep.mubr.f32.mxu0 %v1114_v11  ;;  %v1741_v11 = vsub.f32 %v17144_v43, %v17154_v62 }
 0x1a8   :  { %15327 = vmatprep.subr.bf16.mxu0 %v17056_v56 }
 0x1a9   :  { %v17169_v26 = vand.u32 4294901760, %v1741_v11 }
 0x1aa   :  { %13781 = vmatmul.mubr.f32.vlgmr.msra.gmra.mrb[4].mxu0 %v1124_v13 }
 0x1ab   :  { %13783 = vmatprep.mubr.f32.mxu0 %v1134_v6  ;;  %15329 = vmatpush3.bf16.msra.mxu0 %v17056_v56  ;;  %v17149_v56 = vsub.f32 %v1670_v16, %v17139_v53  ;;  %v186_v6 = vld [vmem:[%s18218_s2] sm:$0xff] }
 0x1ac   :  { %15331 = vmatprep.subr.bf16.mxu0 %v17058_v57  ;;  %v2696_v55 = vsel %vm41_vm0, %v186_v6, 0 }
 0x1ad   :  { %v17159_v27 = vand.u32 4294901760, %v17149_v56  ;;  %v17207_v63 = vand.u32 4294901760, %v2696_v55 }
 0x1ae   :  { %13784 = vmatmul.mubr.f32.gmra.mrb[6].mxu0 %v1144_v39 }
 0x1af   :  { %15333 = vmatpush3.bf16.msra.mxu0 %v17058_v57  ;;  %13794 = vmatprep.mubr.f32.mxu0 %v17083_v20  ;;  %v1762_v57 = vsub.f32 %v1760_v58, %v1761_v25  ;;  %v1751_v33 = vsub.f32 %v17149_v56, %v17159_v27  ;;  %18286 = vst [vmem:[#allocation11_spill] sm:$0xff] %v17207_v63 }
 0x1b0   :  { %15335 = vmatprep.subr.bf16.mxu0 %v17039_v9  ;;  %v17210_v21 = vsub.f32 %v2696_v55, %v17207_v63 }
 0x1b2   :  { %13795 = vmatmul.mubr.f32.vlgmr.msra.gmra.mrb[4].mxu0 %v17090_v54  ;;  %18287 = vst [vmem:[#allocation12_spill] sm:$0xff] %v17210_v21  ;;  %v17213_v45 = vand.u32 4294901760, %v17210_v21 }
 0x1b3   :  { %13797 = vmatprep.mubr.f32.mxu0 %v17094_v35  ;;  %15337 = vmatpush3.bf16.msra.mxu0 %v17039_v9  ;;  %v1763_v9 = vand.u32 4294901760, %v1762_v57 }
 0x1b4   :  { %15339 = vmatprep.subr.bf16.mxu0 %v17042_v46  ;;  %18288 = vst [vmem:[#allocation13_spill] sm:$0xff] %v17213_v45  ;;  %v2771_v52 = vsub.f32 %v17210_v21, %v17213_v45 }
 0x1b6   :  { %13798 = vmatmul.mubr.f32.gmra.mrb[6].mxu0 %v17099_v29  ;;  %v17217_v39 = vand.u32 4294901760, %v2771_v52 }
 0x1b7   :  { %15341 = vmatpush3.bf16.msra.mxu0 %v17042_v46  ;;  %13808 = vmatprep.mubr.f32.mxu0 %v17083_v20  ;;  %v17172_v46 = vand.u32 4294901760, %v1751_v33  ;;  %v184_v20 = vld [vmem:[%s18217_s1] sm:$0xff] }
 0x1b8   :  { %13814 = vmatprep.subr.mxu0 %v1673_v2  ;;  %18289 = vst [vmem:[#allocation14_spill] sm:$0xff] %v17217_v39  ;;  %14022 = vmatprep.mubr.f32.mxu1 %v17217_v39 }
 0x1ba   :  { %13809 = vmatmul.mubr.f32.vlgmr.msra.gmra.mrb[4].mxu0 %v17090_v54  ;;  %v2162_v54 = vsel %vm1030_vm4, %v184_v20, 0 }
 0x1bb   :  { %13811 = vmatprep.mubr.f32.mxu0 %v17094_v35  ;;  %13815 = vmatpush3.msra.mxu0 %v1673_v2  ;;  %v17190_v35 = vand.u32 4294901760, %v2162_v54 }
 0x1bc   :  { %13819 = vmatprep.subr.mxu0 %v1763_v9 }
 0x1bd   :  { %18283 = vst [vmem:[#allocation8_spill] sm:$0xff] %v17190_v35  ;;  %v17193_v44 = vsub.f32 %v2162_v54, %v17190_v35 }
 0x1be   :  { %13812 = vmatmul.mubr.f32.gmra.mrb[6].mxu0 %v17099_v29 }
 0x1bf   :  { %13816 = vmatprep.mubr.f32.mxu0 %v17169_v26  ;;  %18284 = vst [vmem:[#allocation9_spill] sm:$0xff] %v17193_v44  ;;  %v17196_v8 = vand.u32 4294901760, %v17193_v44 }
 0x1c1   :  { %18285 = vst [vmem:[#allocation10_spill] sm:$0xff] %v17196_v8  ;;  %v2239_v13 = vsub.f32 %v17193_v44, %v17196_v8 }
 0x1c2   :  { %13817 = vmatmul.mubr.f32.vlgmr.msra.gmra.mrb[8].mxu0 %v17172_v46 }
 0x1c3   :  { %13820 = vmatpush3.msra.mxu0 %v1763_v9  ;;  %13821 = vmatprep.mubr.f32.mxu0 %v17136_v12  ;;  %v17200_v29 = vand.u32 4294901760, %v2239_v13 }
 0x1c4   :  { %13824 = vmatprep.subr.mxu0 %v1760_v58 }
 0x1ca   :  { %13822 = vmatmul.mubr.f32.vlgmr.msra.gmra.mrb[8].mxu0 %v17139_v53 }
 0x1cb   :  { %13825 = vmatpush3.msra.mxu0 %v1760_v58  ;;  %13826 = vmatprep.mubr.f32.mxu0 %v17144_v43  ;;  %v17231_v58 = vsub.f32 %v2165_v61, %v17228_v50 }
 0x1cc   :  { %13829 = vmatprep.subr.mxu0 %v1673_v2 }
 0x1cd   :  { %18291 = vst [vmem:[#allocation16_spill] sm:$0xff] %v17231_v58  ;;  %v17236_v6 = vand.u32 4294901760, %v17231_v58 }
 0x1cf   :  { %18292 = vst [vmem:[#allocation17_spill] sm:$0xff] %v17236_v6 }
 0x1d2   :  { %13827 = vmatmul.mubr.f32.vlgmr.msra.gmra.mrb[8].mxu0 %v17149_v56 }
 0x1d3   :  { %13830 = vmatpush3.msra.mxu0 %v1673_v2  ;;  %13831 = vmatprep.mubr.f32.mxu0 %v17154_v62 }
 0x1d4   :  { %13834 = vmatprep.subr.mxu0 %v1761_v25 }
 0x1da   :  { %13832 = vmatmul.mubr.f32.vlgmr.msra.gmra.mrb[8].mxu0 %v17159_v27 }
 0x1db   :  { %13835 = vmatpush3.msra.mxu0 %v1761_v25  ;;  %13836 = vmatprep.mubr.f32.mxu0 %v17136_v12 }
 0x1dc   :  { %13839 = vmatprep.subr.mxu0 %v1673_v2 }
 0x1e2   :  { %13837 = vmatmul.mubr.f32.vlgmr.msra.gmra.mrb[8].mxu0 %v17139_v53 }
 0x1e3   :  { %13840 = vmatpush3.msra.mxu0 %v1673_v2  ;;  %13841 = vmatprep.mubr.f32.mxu0 %v17136_v12 }
 0x1ea   :  { %13842 = vmatmul.mubr.f32.vlgmr.msra.gmra.mrb[8].mxu0 %v17139_v53 }
 0x1eb   :  { %13852 = vmatprep.mubr.f32.mxu0 %v17200_v29 }
 0x28d   :  { %v13810_v2 = vpop.f32.mrb[4].mxu0 }
 0x28e   :  { %v16206_v18 = vadd.f32 %v13810_v2, %v1029_v49  ;;  %v1635_v5 = vpop.f32.mrb[5].mxu0 }
 0x28f   :  { %v16207_v16 = vadd.f32 %v1635_v5, %v1029_v49  ;;  %v2249_v5 = vsub.f32 %v17231_v58, %v17236_v6 }
 0x290   :  { %v1658_v25 = vmul.f32 %v16206_v18, %v17110_v17 }
 0x291   :  { %v1657_v57 = vmul.f32 %v16207_v16, %v17113_v15  ;;  %v13813_v11 = vpop.f32.mrb[6].mxu0 }
 0x292   :  { %v2171_v9 = vand.u32 4294901760, %v1658_v25  ;;  %v16208_v33 = vadd.f32 %v13813_v11, %v1029_v49  ;;  %v1647_v20 = vpop.f32.mrb[7].mxu0 }
 0x293   :  { %v2168_v54 = vand.u32 4294901760, %v1657_v57  ;;  %v16209_v13 = vadd.f32 %v1647_v20, %v1029_v49 }
 0x294   :  { %v2265_v55 = vsub.f32 %v1658_v25, %v2171_v9  ;;  %v1660_v52 = vmul.f32 %v16208_v33, %v17117_v48 }
 0x295   :  { %v17239_v40 = vpack.c.bf16 %v2171_v9, %v2168_v54  ;;  %v2258_v61 = vsub.f32 %v1657_v57, %v2168_v54  ;;  %v1659_v2 = vmul.f32 %v16209_v13, %v17120_v51  ;;  %v17249_v54 = vand.u32 4294901760, %v2249_v5 }
 0x296   :  { %v2177_v17 = vand.u32 4294901760, %v1660_v52  ;;  %v2266_v18 = vand.u32 4294901760, %v2265_v55 }
 0x297   :  { %v2174_v15 = vand.u32 4294901760, %v1659_v2  ;;  %15343 = vmatprep.subr.bf16.mxu0 %v17239_v40  ;;  %v2259_v49 = vand.u32 4294901760, %v2258_v61  ;;  %v15358_v16 = vpack.c.bf16 %v2265_v55, %v2258_v61  ;;  %18293 = vst [vmem:[#allocation18_spill] sm:$0xff] %v17249_v54 }
 0x298   :  { %v2279_v11 = vsub.f32 %v1660_v52, %v2177_v17  ;;  %15345 = vmatpush3.bf16.msra.mxu0 %v17239_v40  ;;  %v2267_v25 = vsub.f32 %v2265_v55, %v2266_v18 }
 0x299   :  { %v17246_v48 = vpack.c.bf16 %v2177_v17, %v2174_v15  ;;  %v2272_v9 = vsub.f32 %v1659_v2, %v2174_v15  ;;  %v2260_v57 = vsub.f32 %v2258_v61, %v2259_v49  ;;  %v15374_v33 = vpack.c.bf16 %v2266_v18, %v2259_v49 }
 0x29a   :  { %v2268_v51 = vand.u32 4294901760, %v2267_v25  ;;  %v2280_v20 = vand.u32 4294901760, %v2279_v11 }
 0x29b   :  { %15347 = vmatprep.subr.bf16.mxu0 %v17246_v48  ;;  %v2261_v13 = vand.u32 4294901760, %v2260_v57  ;;  %v2273_v60 = vand.u32 4294901760, %v2272_v9  ;;  %v15362_v0 = vpack.c.bf16 %v2279_v11, %v2272_v9 }
 0x29c   :  { %15349 = vmatpush3.bf16.msra.mxu0 %v17246_v48  ;;  %v2281_v52 = vsub.f32 %v2279_v11, %v2280_v20 }
 0x29d   :  { %v15350_v22 = vpack.c.bf16 %v2268_v51, %v2261_v13  ;;  %v2274_v7 = vsub.f32 %v2272_v9, %v2273_v60  ;;  %v15378_v55 = vpack.c.bf16 %v2280_v20, %v2273_v60 }
 0x29e   :  { %v2282_v17 = vand.u32 4294901760, %v2281_v52 }
 0x29f   :  { %13853 = vmatmul.mubr.f32.vlgmr.msra.gmra.mrb[10].mxu0 %v17249_v54  ;;  %15351 = vmatprep.subr.bf16.mxu0 %v15350_v22  ;;  %v2275_v61 = vand.u32 4294901760, %v2274_v7  ;;  %v187_v7 = vld [vmem:[%s18218_s2 + $0x8] sm:$0xff] }
 0x2a0   :  { %15353 = vmatpush3.bf16.msra.mxu0 %v15350_v22  ;;  %13863 = vmatprep.mubr.f32.mxu0 %v17190_v35  ;;  %v2699_v22 = vsel %vm41_vm0, %v187_v7, 0 }
 0x2a1   :  { %v15354_v2 = vpack.c.bf16 %v2282_v17, %v2275_v61  ;;  %v17268_v60 = vand.u32 4294901760, %v2699_v22 }
 0x2a3   :  { %15355 = vmatprep.subr.bf16.mxu0 %v15354_v2  ;;  %18294 = vst [vmem:[#allocation19_spill] sm:$0xff] %v17268_v60  ;;  %v17275_v15 = vsub.f32 %v2699_v22, %v17268_v60 }
 0x2a4   :  { %15357 = vmatpush3.bf16.msra.mxu0 %v15354_v2 }
 0x2a5   :  { %15359 = vmatprep.subr.bf16.mxu0 %v15358_v16  ;;  %18295 = vst [vmem:[#allocation20_spill] sm:$0xff] %v17275_v15  ;;  %v17284_v25 = vand.u32 4294901760, %v17275_v15 }
 0x2a7   :  { %13864 = vmatmul.mubr.f32.vlgmr.msra.gmra.mrb[10].mxu0 %v17228_v50  ;;  %18296 = vst [vmem:[#allocation21_spill] sm:$0xff] %v17284_v25  ;;  %v2781_v13 = vsub.f32 %v17275_v15, %v17284_v25 }
 0x2a8   :  { %15361 = vmatpush3.bf16.msra.mxu0 %v15358_v16  ;;  %13874 = vmatprep.mubr.f32.mxu0 %v17193_v44 }
 0x2a9   :  { %15363 = vmatprep.subr.bf16.mxu0 %v15362_v0  ;;  %v17297_v17 = vand.u32 4294901760, %v2781_v13 }
 0x2ab   :  { %18297 = vst [vmem:[#allocation22_spill] sm:$0xff] %v17297_v17 }
 0x2ac   :  { %15365 = vmatpush3.bf16.msra.mxu0 %v15362_v0  ;;  %v18231_v0 = vsub.s32 3, %v17060_v3 }
 0x2ad   :  { %15367 = vmatprep.subr.bf16.mxu0 %v17239_v40 }
 0x2ae   :  { %v1664_v18 = vrot.slane %v17068_v32, %v18231_v0 }
 0x2af   :  { %13875 = vmatmul.mubr.f32.vlgmr.msra.gmra.mrb[10].mxu0 %v17231_v58 }
 0x2b0   :  { %15369 = vmatpush3.bf16.msra.mxu0 %v17239_v40  ;;  %13885 = vmatprep.mubr.f32.mxu0 %v17196_v8 }
 0x2b1   :  { %15371 = vmatprep.subr.bf16.mxu0 %v17246_v48 }
 0x2b4   :  { %15373 = vmatpush3.bf16.msra.mxu0 %v17246_v48 }
 0x2b5   :  { %15375 = vmatprep.subr.bf16.mxu0 %v15374_v33 }
 0x2b7   :  { %13886 = vmatmul.mubr.f32.vlgmr.msra.gmra.mrb[10].mxu0 %v17236_v6 }
 0x2b8   :  { %15377 = vmatpush3.bf16.msra.mxu0 %v15374_v33  ;;  %13896 = vmatprep.mubr.f32.mxu0 %v17190_v35 }
 0x2b9   :  { %15379 = vmatprep.subr.bf16.mxu0 %v15378_v55 }
 0x2bc   :  { %15381 = vmatpush3.bf16.msra.mxu0 %v15378_v55 }
 0x2bd   :  { %v13843_v5 = vpop.f32.mrb[8].mxu0  ;;  %15383 = vmatprep.subr.bf16.mxu0 %v17239_v40 }
 0x2be   :  { %v17278_v49 = vadd.f32 %v13843_v5, %v1664_v18  ;;  %v2151_v16 = vpop.f32.mrb[9].mxu0  ;;  %v199_v5 = vld [vmem:[%s18214_s6 + $0x28] sm:$0xff] }
 0x2bf   :  { %v17280_v11 = vadd.f32 %v2151_v16, %v1664_v18  ;;  %13897 = vmatmul.mubr.f32.vlgmr.msra.gmra.mrb[10].mxu0 %v17228_v50  ;;  %v200_v16 = vld [vmem:[%s18214_s6 + $0x30] sm:$0xff] }
 0x2c0   :  { %v2705_v9 = vand.u32 4294901760, %v17278_v49  ;;  %15385 = vmatpush3.bf16.msra.mxu0 %v17239_v40  ;;  %13907 = vmatprep.mubr.f32.mxu0 %v17190_v35 }
 0x2c1   :  { %v2702_v57 = vand.u32 4294901760, %v17280_v11  ;;  %15387 = vmatprep.subr.bf16.mxu0 %v17246_v48 }
 0x2c2   :  { %v2797_v33 = vsub.f32 %v17278_v49, %v2705_v9 }
 0x2c3   :  { %v15390_v51 = vpack.c.bf16 %v2705_v9, %v2702_v57  ;;  %v2790_v20 = vsub.f32 %v17280_v11, %v2702_v57  ;;  %v3214_v9 = vand.u32 4294901760, %v199_v5  ;;  %v3217_v57 = vand.u32 4294901760, %v200_v16 }
 0x2c4   :  { %15389 = vmatpush3.bf16.msra.mxu0 %v17246_v48  ;;  %v2798_v52 = vand.u32 4294901760, %v2797_v33 }
 0x2c5   :  { %15391 = vmatprep.subr.bf16.mxu0 %v15390_v51  ;;  %v2791_v55 = vand.u32 4294901760, %v2790_v20  ;;  %v15398_v48 = vpack.c.bf16 %v2797_v33, %v2790_v20  ;;  %v3304_v13 = vsub.f32 %v199_v5, %v3214_v9 }
 0x2c6   :  { %v2799_v40 = vsub.f32 %v2797_v33, %v2798_v52  ;;  %v17317_v33 = vpack.c.bf16 %v3217_v57, %v3214_v9 }
 0x2c7   :  { %13908 = vmatmul.mubr.f32.vlgmr.msra.gmra.mrb[10].mxu0 %v17228_v50  ;;  %v2792_v61 = vsub.f32 %v2790_v20, %v2791_v55  ;;  %v15406_v18 = vpack.c.bf16 %v2798_v52, %v2791_v55  ;;  %v202_v20 = vld [vmem:[%s18214_s6 + $0x40] sm:$0xff]  ;;  %v3311_v52 = vsub.f32 %v200_v16, %v3217_v57 }
 0x2c8   :  { %15393 = vmatpush3.bf16.msra.mxu0 %v15390_v51  ;;  %13914 = vmatprep.mubr.f32.mxu0 %v17217_v39  ;;  %v2800_v2 = vand.u32 4294901760, %v2799_v40  ;;  %v3223_v40 = vand.u32 4294901760, %v202_v20 }
 0x2c9   :  { %v2793_v7 = vand.u32 4294901760, %v2792_v61  ;;  %v3305_v61 = vand.u32 4294901760, %v3304_v13  ;;  %v15430_v54 = vpack.c.bf16 %v3311_v52, %v3304_v13 }
 0x2ca   :  { %v3325_v0 = vsub.f32 %v202_v20, %v3223_v40 }
 0x2cb   :  { %13915 = vmatmul.mubr.f32.vlgmr.msra.gmra.mrb[12].mxu0 %v17297_v17  ;;  %v15394_v22 = vpack.c.bf16 %v2800_v2, %v2793_v7  ;;  %v3312_v2 = vand.u32 4294901760, %v3311_v52 }
 0x2cc   :  { %13921 = vmatprep.mubr.f32.mxu0 %v17207_v63  ;;  %v3326_v16 = vand.u32 4294901760, %v3325_v0 }
 0x2cd   :  { %15395 = vmatprep.subr.bf16.mxu0 %v15394_v22  ;;  %v15446_v31 = vpack.c.bf16 %v3312_v2, %v3305_v61 }
 0x2ce   :  { %15397 = vmatpush3.bf16.msra.mxu0 %v15394_v22  ;;  %v3306_v22 = vsub.f32 %v3304_v13, %v3305_v61  ;;  %v3327_v58 = vsub.f32 %v3325_v0, %v3326_v16 }
 0x2cf   :  { %15399 = vmatprep.subr.bf16.mxu0 %v15398_v48 }
 0x2d0   :  { %v3307_v6 = vand.u32 4294901760, %v3306_v22  ;;  %v3328_v50 = vand.u32 4294901760, %v3327_v58 }
 0x2d3   :  { %13922 = vmatmul.mubr.f32.vlgmr.msra.gmra.mrb[12].mxu0 %v17268_v60 }
 0x2d4   :  { %15401 = vmatpush3.bf16.msra.mxu0 %v15398_v48  ;;  %13928 = vmatprep.mubr.f32.mxu0 %v17210_v21  ;;  %v3313_v48 = vsub.f32 %v3311_v52, %v3312_v2 }
 0x2d5   :  { %15403 = vmatprep.subr.bf16.mxu0 %v15390_v51 }
 0x2d6   :  { %v3314_v8 = vand.u32 4294901760, %v3313_v48 }
 0x2d8   :  { %v15422_v9 = vpack.c.bf16 %v3314_v8, %v3307_v6 }
 0x2db   :  { %13929 = vmatmul.mubr.f32.vlgmr.msra.gmra.mrb[12].mxu0 %v17275_v15 }
 0x2dc   :  { %15405 = vmatpush3.bf16.msra.mxu0 %v15390_v51  ;;  %13935 = vmatprep.mubr.f32.mxu0 %v17213_v45 }
 0x2dd   :  { %15407 = vmatprep.subr.bf16.mxu0 %v15406_v18 }
 0x2e3   :  { %13936 = vmatmul.mubr.f32.vlgmr.msra.gmra.mrb[12].mxu0 %v17284_v25 }
 0x2e4   :  { %15409 = vmatpush3.bf16.msra.mxu0 %v15406_v18  ;;  %13942 = vmatprep.mubr.f32.mxu0 %v17207_v63 }
 0x2e5   :  { %15411 = vmatprep.subr.bf16.mxu0 %v15390_v51 }
 0x2eb   :  { %13943 = vmatmul.mubr.f32.vlgmr.msra.gmra.mrb[12].mxu0 %v17268_v60 }
 0x2ec   :  { %15413 = vmatpush3.bf16.msra.mxu0 %v15390_v51  ;;  %13949 = vmatprep.mubr.f32.mxu0 %v17207_v63  ;;  %v201_v51 = vld [vmem:[%s18214_s6 + $0x38] sm:$0xff] }
 0x2ed   :  { %v3220_v55 = vand.u32 4294901760, %v201_v51  ;;  %15415 = vmatprep.subr.bf16.mxu0 %v17317_v33 }
 0x2ef   :  { %v17327_v7 = vpack.c.bf16 %v3223_v40, %v3220_v55  ;;  %v3318_v18 = vsub.f32 %v201_v51, %v3220_v55 }
 0x2f1   :  { %v3319_v5 = vand.u32 4294901760, %v3318_v18  ;;  %v15434_v39 = vpack.c.bf16 %v3325_v0, %v3318_v18 }
 0x2f3   :  { %13950 = vmatmul.mubr.f32.vlgmr.msra.gmra.mrb[12].mxu0 %v17268_v60  ;;  %v3320_v57 = vsub.f32 %v3318_v18, %v3319_v5  ;;  %v15450_v51 = vpack.c.bf16 %v3326_v16, %v3319_v5 }
 0x2f4   :  { %15417 = vmatpush3.bf16.msra.mxu0 %v17317_v33 }
 0x2f5   :  { %15419 = vmatprep.subr.bf16.mxu0 %v17327_v7  ;;  %v3321_v44 = vand.u32 4294901760, %v3320_v57 }
 0x2f7   :  { %v15426_v35 = vpack.c.bf16 %v3328_v50, %v3321_v44 }
 0x2f8   :  { %15421 = vmatpush3.bf16.msra.mxu0 %v17327_v7 }
 0x2f9   :  { %15423 = vmatprep.subr.bf16.mxu0 %v15422_v9 }
 0x39a   :  { %v13909_v20 = vpop.f32.mrb[10].mxu0 }
 0x39b   :  { %v2685_v55 = vpop.f32.mrb[11].mxu0  ;;  %v17331_v40 = vadd.f32 nan, %v13909_v20 }
 0x39c   :  { %v17333_v22 = vadd.f32 nan, %v2685_v55 }
 0x3c6   :  { %v13951_v48 = vpop.f32.mrb[12].mxu0 }
 0x3c7   :  { %v16212_v23 = vadd.f32 %v13951_v48, %v17331_v40  ;;  %v3193_v8 = vpop.f32.mrb[13].mxu0 }
 0x3c8   :  { %v16213_v6 = vadd.f32 %v3193_v8, %v17333_v22 }
 0x3c9   :  { %v3211_v57 = vsel %vm1030_vm4, %v16212_v23, 0  ;;  %v18245_v23 = vsub.s32 5, %v17060_v3 }
 0x3ca   :  { %v3292_v58 = vand.u32 4294901760, %v3211_v57  ;;  %v3208_v44 = vsel %vm1030_vm4, %v16213_v6, 0 }
 0x3cb   :  { %v3282_v50 = vand.u32 4294901760, %v3208_v44 }
 0x3cc   :  { %v3293_v0 = vsub.f32 %v3211_v57, %v3292_v58 }
 0x3cd   :  { %v3283_v13 = vsub.f32 %v3208_v44, %v3282_v50 }
 0x3ce   :  { %v3294_v52 = vand.u32 4294901760, %v3293_v0 }
 0x3cf   :  { %v3284_v61 = vand.u32 4294901760, %v3283_v13 }
 0x3d0   :  { %v3295_v2 = vsub.f32 %v3293_v0, %v3294_v52 }
 0x3d1   :  { %v3285_v18 = vsub.f32 %v3283_v13, %v3284_v61 }
 0x3d2   :  { %v3296_v16 = vand.u32 4294901760, %v3295_v2  ;;  %v204_v2 = vld [vmem:[%s18214_s6 + $0x50] sm:$0xff] }
 0x3d3   :  { %v3286_v5 = vand.u32 4294901760, %v3285_v18 }
 0x3d5   :  { %13960 = vmatprep.mubr.f32.mxu0 %v3286_v5  ;;  %v4261_v5 = vand.u32 4294901760, %v204_v2 }
 0x3d6   :  { %13961 = vmatmul.mubr.f32.vlgmr.msra.gmra.mrb[14].mxu0 %v3296_v16 }
 0x3d7   :  { %15425 = vmatpush3.bf16.msra.mxu0 %v15422_v9  ;;  %13971 = vmatprep.mubr.f32.mxu0 %v3282_v50 }
 0x3d8   :  { %15427 = vmatprep.subr.bf16.mxu0 %v15426_v35 }
 0x3db   :  { %15429 = vmatpush3.bf16.msra.mxu0 %v15426_v35 }
 0x3dc   :  { %15431 = vmatprep.subr.bf16.mxu0 %v15430_v54 }
 0x3de   :  { %13972 = vmatmul.mubr.f32.vlgmr.msra.gmra.mrb[14].mxu0 %v3292_v58 }
 0x3df   :  { %15433 = vmatpush3.bf16.msra.mxu0 %v15430_v54  ;;  %13982 = vmatprep.mubr.f32.mxu0 %v3283_v13 }
 0x3e0   :  { %15435 = vmatprep.subr.bf16.mxu0 %v15434_v39 }
 0x3e3   :  { %15437 = vmatpush3.bf16.msra.mxu0 %v15434_v39 }
 0x3e4   :  { %15439 = vmatprep.subr.bf16.mxu0 %v17317_v33 }
 0x3e6   :  { %13983 = vmatmul.mubr.f32.vlgmr.msra.gmra.mrb[14].mxu0 %v3293_v0 }
 0x3e7   :  { %15441 = vmatpush3.bf16.msra.mxu0 %v17317_v33  ;;  %13993 = vmatprep.mubr.f32.mxu0 %v3284_v61  ;;  %v203_v61 = vld [vmem:[%s18214_s6 + $0x48] sm:$0xff] }
 0x3e8   :  { %15443 = vmatprep.subr.bf16.mxu0 %v17327_v7  ;;  %v4258_v18 = vand.u32 4294901760, %v203_v61 }
 0x3ea   :  { %v17378_v16 = vpack.c.bf16 %v4261_v5, %v4258_v18 }
 0x3eb   :  { %15445 = vmatpush3.bf16.msra.mxu0 %v17327_v7 }
 0x3ec   :  { %15447 = vmatprep.subr.bf16.mxu0 %v15446_v31 }
 0x3ee   :  { %13994 = vmatmul.mubr.f32.vlgmr.msra.gmra.mrb[14].mxu0 %v3294_v52 }
 0x3ef   :  { %15449 = vmatpush3.bf16.msra.mxu0 %v15446_v31  ;;  %14004 = vmatprep.mubr.f32.mxu0 %v3282_v50  ;;  %v3206_v31 = vrot.slane %v17068_v32, %v18245_v23 }
 0x3f0   :  { %15451 = vmatprep.subr.bf16.mxu0 %v15450_v51 }
 0x3f3   :  { %15453 = vmatpush3.bf16.msra.mxu0 %v15450_v51 }
 0x3f4   :  { %15455 = vmatprep.subr.bf16.mxu0 %v17317_v33 }
 0x3f6   :  { %14005 = vmatmul.mubr.f32.vlgmr.msra.gmra.mrb[14].mxu0 %v3292_v58 }
 0x3f7   :  { %15457 = vmatpush3.bf16.msra.mxu0 %v17317_v33  ;;  %14015 = vmatprep.mubr.f32.mxu0 %v3282_v50 }
 0x3f8   :  { %15459 = vmatprep.subr.bf16.mxu0 %v17327_v7 }
 0x3fb   :  { %15461 = vmatpush3.bf16.msra.mxu0 %v17327_v7 }
 0x3fc   :  { %15487 = vmatprep.subr.bf16.mxu0 %v17378_v16 }
 0x3fe   :  { %14016 = vmatmul.mubr.f32.vlgmr.msra.gmra.mrb[14].mxu0 %v3292_v58 }
 0x3ff   :  { %15489 = vmatpush3.bf16.msra.mxu0 %v17378_v16 }
 0x4d1   :  { %v14017_v35 = vpop.f32.mrb[14].mxu0 }
 0x4d2   :  { %v16214_v39 = vadd.f32 %v14017_v35, %v3206_v31  ;;  %v3731_v54 = vpop.f32.mrb[15].mxu0  ;;  %v206_v35 = vld [vmem:[%s18214_s6 + $0x60] sm:$0xff] }
 0x4d3   :  { %v16215_v9 = vadd.f32 %v3731_v54, %v3206_v31  ;;  %v205_v31 = vld [vmem:[%s18214_s6 + $0x58] sm:$0xff]  ;;  %v4355_v54 = vsub.f32 %v204_v2, %v4261_v5 }
 0x4d4   :  { %v3742_v51 = vmax.f32 %v16214_v39, 0.0  ;;  %v4348_v39 = vsub.f32 %v203_v61, %v4258_v18 }
 0x4d5   :  { %v3741_v20 = vmax.f32 %v16215_v9, 0.0  ;;  %v4264_v9 = vand.u32 4294901760, %v205_v31 }
 0x4d6   :  { %v17352_v33 = vadd.f32 %v17278_v49, %v3742_v51  ;;  %v4267_v51 = vand.u32 4294901760, %v206_v35  ;;  %v15502_v18 = vpack.c.bf16 %v4355_v54, %v4348_v39 }
 0x4d7   :  { %v17355_v55 = vadd.f32 %v17280_v11, %v3741_v20  ;;  %v4349_v20 = vand.u32 4294901760, %v4348_v39 }
 0x4d8   :  { %v3749_v7 = vand.u32 4294901760, %v17352_v33 }
 0x4d9   :  { %v3746_v48 = vand.u32 4294901760, %v17355_v55 }
 0x4da   :  { %v3841_v8 = vsub.f32 %v17352_v33, %v3749_v7 }
 0x4db   :  { %v15462_v6 = vpack.c.bf16 %v3749_v7, %v3746_v48  ;;  %v3834_v32 = vsub.f32 %v17355_v55, %v3746_v48  ;;  %v4356_v7 = vand.u32 4294901760, %v4355_v54  ;;  %v17388_v48 = vpack.c.bf16 %v4267_v51, %v4264_v9 }
 0x4dc   :  { %v3842_v57 = vand.u32 4294901760, %v3841_v8 }
 0x4dd   :  { %15463 = vmatprep.subr.bf16.mxu1 %v15462_v6  ;;  %v3835_v58 = vand.u32 4294901760, %v3834_v32  ;;  %v15470_v13 = vpack.c.bf16 %v3841_v8, %v3834_v32  ;;  %15491 = vmatprep.subr.bf16.mxu0 %v17388_v48  ;;  %v15518_v23 = vpack.c.bf16 %v4356_v7, %v4349_v20 }
 0x4de   :  { %15465 = vmatpush3.bf16.msra.mxu1 %v15462_v6  ;;  %v3843_v44 = vsub.f32 %v3841_v8, %v3842_v57  ;;  %v4350_v8 = vsub.f32 %v4348_v39, %v4349_v20  ;;  %15493 = vmatpush3.bf16.msra.mxu0 %v17388_v48 }
 0x4df   :  { %v3836_v50 = vsub.f32 %v3834_v32, %v3835_v58  ;;  %v15478_v52 = vpack.c.bf16 %v3842_v57, %v3835_v58  ;;  %v4362_v32 = vsub.f32 %v205_v31, %v4264_v9  ;;  %v4369_v57 = vsub.f32 %v206_v35, %v4267_v51 }
 0x4e0   :  { %v3844_v49 = vand.u32 4294901760, %v3843_v44  ;;  %v4351_v58 = vand.u32 4294901760, %v4350_v8 }
 0x4e1   :  { %14023 = vmatmul.mubr.f32.vlgmr.msra.gmra.mrb[4].mxu1 %v17297_v17  ;;  %v3837_v11 = vand.u32 4294901760, %v3836_v50  ;;  %v4363_v50 = vand.u32 4294901760, %v4362_v32  ;;  %v15506_v5 = vpack.c.bf16 %v4369_v57, %v4362_v32 }
 0x4e2   :  { %14029 = vmatprep.mubr.f32.mxu1 %v17207_v63 }
 0x4e3   :  { %v15466_v0 = vpack.c.bf16 %v3844_v49, %v3837_v11  ;;  %v4370_v49 = vand.u32 4294901760, %v4369_v57 }
 0x4e5   :  { %15467 = vmatprep.subr.bf16.mxu1 %v15466_v0  ;;  %v15522_v31 = vpack.c.bf16 %v4370_v49, %v4363_v50 }
 0x4e6   :  { %15469 = vmatpush3.bf16.msra.mxu1 %v15466_v0  ;;  %v4364_v0 = vsub.f32 %v4362_v32, %v4363_v50  ;;  %v210_v32 = vld [vmem:[%s18214_s6 + $0x80] sm:$0xff] }
 0x4e7   :  { %15471 = vmatprep.subr.bf16.mxu1 %v15470_v13 }
 0x4e9   :  { %14030 = vmatmul.mubr.f32.vlgmr.msra.gmra.mrb[4].mxu1 %v17268_v60 }
 0x4ea   :  { %15473 = vmatpush3.bf16.msra.mxu1 %v15470_v13  ;;  %14036 = vmatprep.mubr.f32.mxu1 %v17210_v21  ;;  %v4371_v13 = vsub.f32 %v4369_v57, %v4370_v49  ;;  %v4809_v57 = vand.u32 4294901760, %v210_v32 }
 0x4eb   :  { %15475 = vmatprep.subr.bf16.mxu1 %v15462_v6 }
 0x4ec   :  { %v4372_v61 = vand.u32 4294901760, %v4371_v13 }
 0x4f1   :  { %14037 = vmatmul.mubr.f32.vlgmr.msra.gmra.mrb[4].mxu1 %v17275_v15 }
 0x4f2   :  { %15477 = vmatpush3.bf16.msra.mxu1 %v15462_v6  ;;  %14043 = vmatprep.mubr.f32.mxu1 %v17213_v45 }
 0x4f3   :  { %15479 = vmatprep.subr.bf16.mxu1 %v15478_v52 }
 0x4f9   :  { %14044 = vmatmul.mubr.f32.vlgmr.msra.gmra.mrb[4].mxu1 %v17284_v25 }
 0x4fa   :  { %15481 = vmatpush3.bf16.msra.mxu1 %v15478_v52  ;;  %14050 = vmatprep.mubr.f32.mxu1 %v17207_v63  ;;  %v4365_v52 = vand.u32 4294901760, %v4364_v0 }
 0x4fb   :  { %15483 = vmatprep.subr.bf16.mxu1 %v15462_v6 }
 0x4fc   :  { %v15498_v2 = vpack.c.bf16 %v4372_v61, %v4365_v52 }
 0x501   :  { %14051 = vmatmul.mubr.f32.vlgmr.msra.gmra.mrb[4].mxu1 %v17268_v60 }
 0x502   :  { %15485 = vmatpush3.bf16.msra.mxu1 %v15462_v6  ;;  %14057 = vmatprep.mubr.f32.mxu1 %v17207_v63  ;;  %v4357_v6 = vsub.f32 %v4355_v54, %v4356_v7 }
 0x504   :  { %v4358_v44 = vand.u32 4294901760, %v4357_v6 }
 0x506   :  { %v15494_v11 = vpack.c.bf16 %v4358_v44, %v4351_v58 }
 0x508   :  { %15495 = vmatprep.subr.bf16.mxu0 %v15494_v11 }
 0x509   :  { %14058 = vmatmul.mubr.f32.vlgmr.msra.gmra.mrb[4].mxu1 %v17268_v60 }
 0x5dc   :  { %v14059_v35 = vpop.f32.mrb[4].mxu1 }
 0x5dd   :  { %v16216_v9 = vadd.f32 %v14059_v35, %v17331_v40  ;;  %v4237_v51 = vpop.f32.mrb[5].mxu1  ;;  %v208_v40 = vld [vmem:[%s18214_s6 + $0x70] sm:$0xff] }
 0x5de   :  { %v16217_v8 = vadd.f32 %v4237_v51, %v17333_v22 }
 0x5df   :  { %v4255_v6 = vsel %vm1030_vm4, %v16216_v9, 0 }
 0x5e0   :  { %v4336_v25 = vand.u32 4294901760, %v4255_v6  ;;  %v4252_v58 = vsel %vm1030_vm4, %v16217_v8, 0 }
 0x5e1   :  { %v4326_v44 = vand.u32 4294901760, %v4252_v58 }
 0x5e2   :  { %v4337_v45 = vsub.f32 %v4255_v6, %v4336_v25 }
 0x5e3   :  { %v4327_v0 = vsub.f32 %v4252_v58, %v4326_v44 }
 0x5e4   :  { %v4338_v13 = vand.u32 4294901760, %v4337_v45 }
 0x5e5   :  { %v4328_v52 = vand.u32 4294901760, %v4327_v0 }
 0x5e6   :  { %v4339_v39 = vsub.f32 %v4337_v45, %v4338_v13 }
 0x5e7   :  { %v4329_v54 = vsub.f32 %v4327_v0, %v4328_v52 }
 0x5e8   :  { %v4340_v7 = vand.u32 4294901760, %v4339_v39 }
 0x5e9   :  { %v4330_v20 = vand.u32 4294901760, %v4329_v54 }
 0x5eb   :  { %14068 = vmatprep.mubr.f32.mxu0 %v4330_v20 }
 0x5ec   :  { %14069 = vmatmul.mubr.f32.vlgmr.msra.gmra.mrb[16].mxu0 %v4340_v7 }
 0x5ed   :  { %15497 = vmatpush3.bf16.msra.mxu0 %v15494_v11  ;;  %14079 = vmatprep.mubr.f32.mxu0 %v4326_v44 }
 0x5ee   :  { %15499 = vmatprep.subr.bf16.mxu0 %v15498_v2 }
 0x5f1   :  { %15501 = vmatpush3.bf16.msra.mxu0 %v15498_v2 }
 0x5f2   :  { %15503 = vmatprep.subr.bf16.mxu0 %v15502_v18 }
 0x5f4   :  { %14080 = vmatmul.mubr.f32.vlgmr.msra.gmra.mrb[16].mxu0 %v4336_v25 }
 0x5f5   :  { %15505 = vmatpush3.bf16.msra.mxu0 %v15502_v18  ;;  %14090 = vmatprep.mubr.f32.mxu0 %v4327_v0 }
 0x5f6   :  { %15507 = vmatprep.subr.bf16.mxu0 %v15506_v5 }
 0x5f9   :  { %15509 = vmatpush3.bf16.msra.mxu0 %v15506_v5 }
 0x5fa   :  { %15511 = vmatprep.subr.bf16.mxu0 %v17378_v16 }
 0x5fc   :  { %14091 = vmatmul.mubr.f32.vlgmr.msra.gmra.mrb[16].mxu0 %v4337_v45  ;;  %v207_v45 = vld [vmem:[%s18214_s6 + $0x68] sm:$0xff] }
 0x5fd   :  { %15513 = vmatpush3.bf16.msra.mxu0 %v17378_v16  ;;  %14101 = vmatprep.mubr.f32.mxu0 %v4328_v52  ;;  %v4800_v22 = vand.u32 4294901760, %v207_v45 }
 0x5fe   :  { %15515 = vmatprep.subr.bf16.mxu0 %v17388_v48 }
 0x5ff   :  { %v4890_v50 = vsub.f32 %v207_v45, %v4800_v22 }
 0x601   :  { %15517 = vmatpush3.bf16.msra.mxu0 %v17388_v48  ;;  %v4891_v61 = vand.u32 4294901760, %v4890_v50 }
 0x602   :  { %15519 = vmatprep.subr.bf16.mxu0 %v15518_v23 }
 0x603   :  { %v4892_v18 = vsub.f32 %v4890_v50, %v4891_v61 }
 0x604   :  { %14102 = vmatmul.mubr.f32.vlgmr.msra.gmra.mrb[16].mxu0 %v4338_v13 }
 0x605   :  { %15521 = vmatpush3.bf16.msra.mxu0 %v15518_v23  ;;  %14112 = vmatprep.mubr.f32.mxu0 %v4326_v44  ;;  %v4803_v23 = vand.u32 4294901760, %v208_v40  ;;  %v4893_v9 = vand.u32 4294901760, %v4892_v18 }
 0x606   :  { %15523 = vmatprep.subr.bf16.mxu0 %v15522_v31 }
 0x607   :  { %v4897_v49 = vsub.f32 %v208_v40, %v4803_v23  ;;  %v18251_v40 = vsub.s32 6, %v17060_v3 }
 0x609   :  { %15525 = vmatpush3.bf16.msra.mxu0 %v15522_v31  ;;  %v4898_v2 = vand.u32 4294901760, %v4897_v49  ;;  %v4911_v31 = vsub.f32 %v210_v32, %v4809_v57  ;;  %v15550_v54 = vpack.c.bf16 %v4897_v49, %v4890_v50 }
 0x60a   :  { %15527 = vmatprep.subr.bf16.mxu0 %v17378_v16 }
 0x60b   :  { %v4899_v35 = vsub.f32 %v4897_v49, %v4898_v2  ;;  %v4912_v8 = vand.u32 4294901760, %v4911_v31  ;;  %v15566_v7 = vpack.c.bf16 %v4898_v2, %v4891_v61 }
 0x60c   :  { %14113 = vmatmul.mubr.f32.vlgmr.msra.gmra.mrb[16].mxu0 %v4336_v25 }
 0x60d   :  { %15529 = vmatpush3.bf16.msra.mxu0 %v17378_v16  ;;  %14123 = vmatprep.mubr.f32.mxu0 %v4326_v44  ;;  %v209_v16 = vld [vmem:[%s18214_s6 + $0x78] sm:$0xff]  ;;  %v4900_v6 = vand.u32 4294901760, %v4899_v35  ;;  %v4913_v44 = vsub.f32 %v4911_v31, %v4912_v8 }
 0x60e   :  { %15531 = vmatprep.subr.bf16.mxu0 %v17388_v48 }
 0x60f   :  { %v15542_v0 = vpack.c.bf16 %v4900_v6, %v4893_v9  ;;  %v4914_v52 = vand.u32 4294901760, %v4913_v44 }
 0x611   :  { %15533 = vmatpush3.bf16.msra.mxu0 %v17388_v48  ;;  %v17416_v48 = vpack.c.bf16 %v4803_v23, %v4800_v22  ;;  %v17428_v22 = vld [vmem:[%s18215_s7] sm:$0xff] }
 0x612   :  { %v4250_v23 = vrot.slane %v17428_v22, %v18251_v40 }
 0x613   :  { %15535 = vmatprep.subr.bf16.mxu1 %v17416_v48 }
 0x614   :  { %14124 = vmatmul.mubr.f32.vlgmr.msra.gmra.mrb[16].mxu0 %v4336_v25  ;;  %v4806_v25 = vand.u32 4294901760, %v209_v16  ;;  %15537 = vmatpush3.bf16.msra.mxu1 %v17416_v48 }
 0x616   :  { %v17419_v11 = vpack.c.bf16 %v4809_v57, %v4806_v25  ;;  %v4904_v5 = vsub.f32 %v209_v16, %v4806_v25 }
 0x618   :  { %15539 = vmatprep.subr.bf16.mxu1 %v17419_v11  ;;  %v4905_v51 = vand.u32 4294901760, %v4904_v5  ;;  %v15554_v20 = vpack.c.bf16 %v4911_v31, %v4904_v5 }
 0x619   :  { %15541 = vmatpush3.bf16.msra.mxu1 %v17419_v11 }
 0x61a   :  { %v4906_v58 = vsub.f32 %v4904_v5, %v4905_v51  ;;  %15543 = vmatprep.subr.bf16.mxu1 %v15542_v0  ;;  %v15570_v45 = vpack.c.bf16 %v4912_v8, %v4905_v51 }
 0x61c   :  { %v4907_v13 = vand.u32 4294901760, %v4906_v58 }
 0x61e   :  { %v15546_v39 = vpack.c.bf16 %v4914_v52, %v4907_v13 }
 0x6e7   :  { %v14125_v16 = vpop.f32.mrb[16].mxu0 }
 0x6e8   :  { %v16218_v32 = vadd.f32 %v14125_v16, %v4250_v23  ;;  %v4775_v25 = vpop.f32.mrb[17].mxu0 }
 0x6e9   :  { %v16219_v57 = vadd.f32 %v4775_v25, %v4250_v23 }
 0x6ea   :  { %v4786_v18 = vmax.f32 %v16218_v32, 0.0 }
 0x6eb   :  { %v4785_v50 = vmax.f32 %v16219_v57, 0.0 }
 0x6ec   :  { %v4788_v49 = vadd.f32 %v4786_v18, %v17352_v33  ;;  %v212_v33 = vld [vmem:[%s18219_s8] sm:$0xff] }
 0x6ed   :  { %v4787_v61 = vadd.f32 %v4785_v50, %v17355_v55  ;;  %v213_v55 = vld [vmem:[%s18219_s8 + $0x8] sm:$0xff] }
 0x6ee   :  { %v4797_v2 = vsel %vm1030_vm4, %v4788_v49, 0 }
 0x6ef   :  { %v4878_v5 = vand.u32 4294901760, %v4797_v2  ;;  %v4794_v31 = vsel %vm1030_vm4, %v4787_v61, 0 }
 0x6f0   :  { %v4868_v35 = vand.u32 4294901760, %v4794_v31 }
 0x6f1   :  { %v4879_v9 = vsub.f32 %v4797_v2, %v4878_v5 }
 0x6f2   :  { %v4869_v51 = vsub.f32 %v4794_v31, %v4868_v35 }
 0x6f3   :  { %v4880_v8 = vand.u32 4294901760, %v4879_v9 }
 0x6f4   :  { %v4870_v6 = vand.u32 4294901760, %v4869_v51 }
 0x6f5   :  { %v4881_v58 = vsub.f32 %v4879_v9, %v4880_v8 }
 0x6f6   :  { %v4871_v44 = vsub.f32 %v4869_v51, %v4870_v6 }
 0x6f7   :  { %v4882_v52 = vand.u32 4294901760, %v4881_v58 }
 0x6f8   :  { %v4872_v13 = vand.u32 4294901760, %v4871_v44 }
 0x6fa   :  { %14134 = vmatprep.mubr.f32.mxu1 %v4872_v13 }
 0x6fb   :  { %14135 = vmatmul.mubr.f32.vlgmr.msra.gmra.mrb[6].mxu1 %v4882_v52 }
 0x6fc   :  { %15545 = vmatpush3.bf16.msra.mxu1 %v15542_v0  ;;  %14145 = vmatprep.mubr.f32.mxu1 %v4868_v35  ;;  %v5340_v0 = vand.u32 4294901760, %v212_v33 }
 0x6fd   :  { %15547 = vmatprep.subr.bf16.mxu1 %v15546_v39 }
 0x700   :  { %15549 = vmatpush3.bf16.msra.mxu1 %v15546_v39  ;;  %v5343_v39 = vand.u32 4294901760, %v213_v55 }
 0x701   :  { %15551 = vmatprep.subr.bf16.mxu1 %v15550_v54 }
 0x703   :  { %14146 = vmatmul.mubr.f32.vlgmr.msra.gmra.mrb[6].mxu1 %v4878_v5 }
 0x704   :  { %15553 = vmatpush3.bf16.msra.mxu1 %v15550_v54  ;;  %14156 = vmatprep.mubr.f32.mxu1 %v4869_v51  ;;  %v17451_v54 = vpack.c.bf16 %v5343_v39, %v5340_v0 }
 0x705   :  { %15555 = vmatprep.subr.bf16.mxu1 %v15554_v20 }
 0x706   :  { %15583 = vmatprep.subr.bf16.mxu0 %v17451_v54 }
 0x707   :  { %15585 = vmatpush3.bf16.msra.mxu0 %v17451_v54 }
 0x708   :  { %15557 = vmatpush3.bf16.msra.mxu1 %v15554_v20  ;;  %v5430_v20 = vsub.f32 %v212_v33, %v5340_v0 }
 0x709   :  { %15559 = vmatprep.subr.bf16.mxu1 %v17416_v48 }
 0x70a   :  { %v5431_v16 = vand.u32 4294901760, %v5430_v20 }
 0x70b   :  { %14157 = vmatmul.mubr.f32.vlgmr.msra.gmra.mrb[6].mxu1 %v4879_v9 }
 0x70c   :  { %15561 = vmatpush3.bf16.msra.mxu1 %v17416_v48  ;;  %14167 = vmatprep.mubr.f32.mxu1 %v4870_v6  ;;  %v5432_v57 = vsub.f32 %v5430_v20, %v5431_v16 }
 0x70d   :  { %15563 = vmatprep.subr.bf16.mxu1 %v17419_v11 }
 0x70e   :  { %v5433_v61 = vand.u32 4294901760, %v5432_v57 }
 0x710   :  { %15565 = vmatpush3.bf16.msra.mxu1 %v17419_v11 }
 0x711   :  { %15567 = vmatprep.subr.bf16.mxu1 %v15566_v7 }
 0x713   :  { %14168 = vmatmul.mubr.f32.vlgmr.msra.gmra.mrb[6].mxu1 %v4880_v8 }
 0x714   :  { %15569 = vmatpush3.bf16.msra.mxu1 %v15566_v7  ;;  %14178 = vmatprep.mubr.f32.mxu1 %v4868_v35  ;;  %v214_v7 = vld [vmem:[%s18219_s8 + $0x10] sm:$0xff] }
 0x715   :  { %15571 = vmatprep.subr.bf16.mxu1 %v15570_v45 }
 0x718   :  { %15573 = vmatpush3.bf16.msra.mxu1 %v15570_v45  ;;  %v5346_v45 = vand.u32 4294901760, %v214_v7 }
 0x719   :  { %15575 = vmatprep.subr.bf16.mxu1 %v17416_v48 }
 0x71a   :  { %v5444_v50 = vsub.f32 %v214_v7, %v5346_v45 }
 0x71b   :  { %14179 = vmatmul.mubr.f32.vlgmr.msra.gmra.mrb[6].mxu1 %v4878_v5 }
 0x71c   :  { %15577 = vmatpush3.bf16.msra.mxu1 %v17416_v48  ;;  %14189 = vmatprep.mubr.f32.mxu1 %v4868_v35  ;;  %v5437_v48 = vsub.f32 %v213_v55, %v5343_v39  ;;  %v18250_v55 = vsub.s32 4, %v17060_v3 }
 0x71d   :  { %15579 = vmatprep.subr.bf16.mxu1 %v17419_v11 }
 0x71e   :  { %v5438_v32 = vand.u32 4294901760, %v5437_v48  ;;  %v15598_v44 = vpack.c.bf16 %v5437_v48, %v5430_v20  ;;  %v4792_v0 = vrot.slane %v17428_v22, %v18250_v55 }
 0x720   :  { %15581 = vmatpush3.bf16.msra.mxu1 %v17419_v11  ;;  %v215_v11 = vld [vmem:[%s18219_s8 + $0x18] sm:$0xff]  ;;  %v5439_v18 = vsub.f32 %v5437_v48, %v5438_v32  ;;  %v15614_v52 = vpack.c.bf16 %v5438_v32, %v5431_v16 }
 0x721   :  { %v5349_v23 = vand.u32 4294901760, %v215_v11 }
 0x722   :  { %v5440_v2 = vand.u32 4294901760, %v5439_v18 }
 0x723   :  { %14190 = vmatmul.mubr.f32.vlgmr.msra.gmra.mrb[6].mxu1 %v4878_v5  ;;  %v17461_v25 = vpack.c.bf16 %v5349_v23, %v5346_v45  ;;  %v5451_v49 = vsub.f32 %v215_v11, %v5349_v23  ;;  %v5445_v5 = vand.u32 4294901760, %v5444_v50 }
 0x724   :  { %v15590_v35 = vpack.c.bf16 %v5440_v2, %v5433_v61 }
 0x725   :  { %15587 = vmatprep.subr.bf16.mxu0 %v17461_v25  ;;  %v5452_v31 = vand.u32 4294901760, %v5451_v49  ;;  %v5446_v9 = vsub.f32 %v5444_v50, %v5445_v5  ;;  %v15602_v13 = vpack.c.bf16 %v5451_v49, %v5444_v50 }
 0x726   :  { %15589 = vmatpush3.bf16.msra.mxu0 %v17461_v25 }
 0x727   :  { %v5453_v51 = vsub.f32 %v5451_v49, %v5452_v31  ;;  %15591 = vmatprep.subr.bf16.mxu0 %v15590_v35  ;;  %v5447_v8 = vand.u32 4294901760, %v5446_v9  ;;  %v17465_v33 = vpack.c.bf16 %v5452_v31, %v5445_v5  ;;  %v7215_v9 = vmax.f32 %v17078_v41, 0.0 }
 0x729   :  { %v5454_v6 = vand.u32 4294901760, %v5453_v51  ;;  %v12569_v51 = vld [vmem:[%s18214_s6 + $0x90] sm:$0xff] }
 0x72b   :  { %v15594_v58 = vpack.c.bf16 %v5454_v6, %v5447_v8  ;;  %v7224_v8 = vsel %vm1030_vm4, %v7215_v9, 0  ;;  %v7216_v6 = vmax.f32 %v17080_v42, 0.0 }
 0x72d   :  { %v7227_v42 = vsel %vm1030_vm4, %v7216_v6, 0 }
 0x7f6   :  { %v14191_v39 = vpop.f32.mrb[6].mxu1 }
 0x7f7   :  { %v16220_v7 = vadd.f32 %v14191_v39, %v4792_v0  ;;  %v5317_v11 = vpop.f32.mrb[7].mxu1  ;;  %v7217_v39 = vmax.f32 %v17085_v1, 0.0  ;;  %v17511_v1 = vand.u32 4294901760, %v7227_v42 }
 0x7f8   :  { %v16221_v45 = vadd.f32 %v5317_v11, %v4792_v0  ;;  %v12571_v0 = vld [vmem:[%s18214_s6 + $0xa0] sm:$0xff] }
 0x7f9   :  { %v5328_v23 = vmax.f32 %v16220_v7, 0.0  ;;  %v7218_v7 = vmax.f32 %v17088_v37, 0.0 }
 0x7fa   :  { %v5327_v57 = vmax.f32 %v16221_v45, 0.0  ;;  %v7245_v45 = vand.u32 4294901760, %v12571_v0 }
 0x7fb   :  { %v5337_v18 = vsel %vm1030_vm4, %v5328_v23, 0 }
 0x7fc   :  { %v17472_v61 = vand.u32 4294901760, %v5337_v18  ;;  %v5334_v20 = vsel %vm1030_vm4, %v5327_v57, 0 }
 0x7fd   :  { %v5408_v48 = vand.u32 4294901760, %v5334_v20 }
 0x7fe   :  { %v5419_v16 = vsub.f32 %v5337_v18, %v17472_v61 }
 0x7ff   :  { %v5409_v32 = vsub.f32 %v5334_v20, %v5408_v48  ;;  %v7230_v20 = vsel %vm1030_vm4, %v7217_v39, 0 }
 0x800   :  { %v5420_v50 = vand.u32 4294901760, %v5419_v16 }
 0x801   :  { %v5410_v49 = vand.u32 4294901760, %v5409_v32 }
 0x802   :  { %v5421_v2 = vsub.f32 %v5419_v16, %v5420_v50 }
 0x803   :  { %v5411_v22 = vsub.f32 %v5409_v32, %v5410_v49 }
 0x804   :  { %v5422_v31 = vand.u32 4294901760, %v5421_v2  ;;  %v17522_v2 = vand.u32 4294901760, %v7230_v20 }
 0x805   :  { %v5412_v5 = vand.u32 4294901760, %v5411_v22  ;;  %v17529_v22 = vsub.f32 %v7227_v42, %v17511_v1 }
 0x807   :  { %14200 = vmatprep.mubr.f32.mxu0 %v5412_v5  ;;  %v7316_v6 = vand.u32 4294901760, %v17529_v22 }
 0x808   :  { %14201 = vmatmul.mubr.f32.vlgmr.msra.gmra.mrb[18].mxu0 %v5422_v31 }
 0x809   :  { %15593 = vmatpush3.bf16.msra.mxu0 %v15590_v35  ;;  %14211 = vmatprep.mubr.f32.mxu0 %v5408_v48  ;;  %v12568_v35 = vld [vmem:[%s18214_s6 + $0x88] sm:$0xff] }
 0x80a   :  { %15595 = vmatprep.subr.bf16.mxu0 %v15594_v58  ;;  %v7236_v41 = vand.u32 4294901760, %v12568_v35 }
 0x80c   :  { %v17502_v23 = vsub.f32 %v12568_v35, %v7236_v41 }
 0x80d   :  { %15597 = vmatpush3.bf16.msra.mxu0 %v15594_v58  ;;  %v7239_v58 = vand.u32 4294901760, %v12569_v51 }
 0x80e   :  { %15599 = vmatprep.subr.bf16.mxu0 %v15598_v44  ;;  %v7347_v37 = vand.u32 4294901760, %v17502_v23 }
 0x80f   :  { %v17504_v57 = vsub.f32 %v12569_v51, %v7239_v58  ;;  %v7325_v51 = vsub.f32 %v7230_v20, %v17522_v2 }
 0x810   :  { %14212 = vmatmul.mubr.f32.vlgmr.msra.gmra.mrb[18].mxu0 %v17472_v61  ;;  %v7348_v31 = vsub.f32 %v17502_v23, %v7347_v37 }
 0x811   :  { %15601 = vmatpush3.bf16.msra.mxu0 %v15598_v44  ;;  %14222 = vmatprep.mubr.f32.mxu0 %v5409_v32  ;;  %v17490_v44 = vand.u32 4294901760, %v7224_v8 }
 0x812   :  { %15603 = vmatprep.subr.bf16.mxu0 %v15602_v13 }
 0x813   :  { %v17507_v18 = vsub.f32 %v7224_v8, %v17490_v44 }
 0x815   :  { %15605 = vmatpush3.bf16.msra.mxu0 %v15602_v13  ;;  %v12570_v13 = vld [vmem:[%s18214_s6 + $0x98] sm:$0xff] }
 0x816   :  { %15607 = vmatprep.subr.bf16.mxu0 %v17451_v54  ;;  %v7242_v11 = vand.u32 4294901760, %v12570_v13 }
 0x818   :  { %14223 = vmatmul.mubr.f32.vlgmr.msra.gmra.mrb[18].mxu0 %v5419_v16  ;;  %v7354_v16 = vand.u32 4294901760, %v17504_v57  ;;  %v17517_v32 = vsub.f32 %v12570_v13, %v7242_v11  ;;  %v17547_v8 = vpack.c.bf16 %v7245_v45, %v7242_v11 }
 0x819   :  { %15609 = vmatpush3.bf16.msra.mxu0 %v17451_v54  ;;  %14233 = vmatprep.mubr.f32.mxu0 %v5410_v49  ;;  %v7306_v49 = vand.u32 4294901760, %v17507_v18 }
 0x81a   :  { %15611 = vmatprep.subr.bf16.mxu0 %v17461_v25  ;;  %v7355_v9 = vsub.f32 %v17504_v57, %v7354_v16 }
 0x81b   :  { %v7307_v35 = vsub.f32 %v17507_v18, %v7306_v49 }
 0x81c   :  { %v7356_v13 = vand.u32 4294901760, %v7355_v9 }
 0x81d   :  { %15613 = vmatpush3.bf16.msra.mxu0 %v17461_v25  ;;  %v7308_v42 = vand.u32 4294901760, %v7307_v35 }
 0x81e   :  { %15615 = vmatprep.subr.bf16.mxu0 %v15614_v52 }
 0x820   :  { %14234 = vmatmul.mubr.f32.vlgmr.msra.gmra.mrb[18].mxu0 %v5420_v50  ;;  %v17519_v50 = vsub.f32 %v12571_v0, %v7245_v45 }
 0x821   :  { %15617 = vmatpush3.bf16.msra.mxu0 %v15614_v52  ;;  %14244 = vmatprep.mubr.f32.mxu0 %v5408_v48  ;;  %v7233_v52 = vsel %vm1030_vm4, %v7218_v7, 0  ;;  %v7326_v7 = vand.u32 4294901760, %v7325_v51 }
 0x822   :  { %15619 = vmatprep.subr.bf16.mxu0 %v17465_v33  ;;  %v17531_v5 = vand.u32 4294901760, %v7233_v52 }
 0x825   :  { %15621 = vmatpush3.bf16.msra.mxu0 %v17465_v33  ;;  %v17526_v33 = vpack.c.bf16 %v7239_v58, %v7236_v41  ;;  %v7335_v41 = vsub.f32 %v7233_v52, %v17531_v5  ;;  %v7349_v58 = vand.u32 4294901760, %v7348_v31  ;;  %v7327_v31 = vsub.f32 %v7325_v51, %v7326_v7 }
 0x826   :  { %15623 = vmatprep.subr.bf16.mxu0 %v17451_v54 }
 0x827   :  { %v15854_v11 = vpack.c.bf16 %v7356_v13, %v7349_v58  ;;  %v7336_v45 = vand.u32 4294901760, %v7335_v41  ;;  %v7328_v40 = vand.u32 4294901760, %v7327_v31  ;;  %v15866_v58 = vpack.c.bf16 %v17519_v50, %v17517_v32 }
 0x828   :  { %14245 = vmatmul.mubr.f32.vlgmr.msra.gmra.mrb[18].mxu0 %v17472_v61 }
 0x829   :  { %15625 = vmatpush3.bf16.msra.mxu0 %v17451_v54  ;;  %14255 = vmatprep.mubr.f32.mxu0 %v5408_v48  ;;  %v7361_v54 = vand.u32 4294901760, %v17517_v32  ;;  %v7368_v48 = vand.u32 4294901760, %v17519_v50  ;;  %v7337_v35 = vsub.f32 %v7335_v41, %v7336_v45 }
 0x82a   :  { %15627 = vmatprep.subr.bf16.mxu0 %v17461_v25 }
 0x82b   :  { %v7362_v0 = vsub.f32 %v17517_v32, %v7361_v54  ;;  %v7369_v39 = vsub.f32 %v17519_v50, %v7368_v48 }
 0x82d   :  { %15629 = vmatpush3.bf16.msra.mxu0 %v17461_v25  ;;  %v7317_v25 = vsub.f32 %v17529_v22, %v7316_v6  ;;  %v7363_v20 = vand.u32 4294901760, %v7362_v0  ;;  %v7370_v52 = vand.u32 4294901760, %v7369_v39 }
 0x82e   :  { %15847 = vmatprep.subr.bf16.mxu0 %v17526_v33 }
 0x82f   :  { %v7318_v9 = vand.u32 4294901760, %v7317_v25  ;;  %v15858_v55 = vpack.c.bf16 %v7370_v52, %v7363_v20 }
 0x830   :  { %14256 = vmatmul.mubr.f32.vlgmr.msra.gmra.mrb[18].mxu0 %v17472_v61  ;;  %v7338_v61 = vand.u32 4294901760, %v7337_v35 }
 0x831   :  { %15849 = vmatpush3.bf16.msra.mxu0 %v17526_v33  ;;  %14536 = vmatprep.mubr.f32.mxu0 %v7308_v42  ;;  %v15862_v42 = vpack.c.bf16 %v17504_v57, %v17502_v23  ;;  %v217_v23 = vld [vmem:[%s18219_s8 + $0x28] sm:$0xff]  ;;  %v218_v57 = vld [vmem:[%s18219_s8 + $0x30] sm:$0xff] }
 0x832   :  { %15851 = vmatprep.subr.bf16.mxu0 %v17547_v8 }
 0x835   :  { %15853 = vmatpush3.bf16.msra.mxu0 %v17547_v8 }
 0x836   :  { %15855 = vmatprep.subr.bf16.mxu0 %v15854_v11 }
 0x838   :  { %14537 = vmatmul.mubr.f32.vlgmr.msra.gmra.mrb[20].mxu0 %v7318_v9 }
 0x839   :  { %14539 = vmatprep.mubr.f32.mxu0 %v7328_v40  ;;  %15857 = vmatpush3.bf16.msra.mxu0 %v15854_v11  ;;  %v15878_v40 = vpack.c.bf16 %v7354_v16, %v7347_v37  ;;  %v5883_v37 = vand.u32 4294901760, %v218_v57 }
 0x83a   :  { %15859 = vmatprep.subr.bf16.mxu0 %v15858_v55 }
 0x83c   :  { %14540 = vmatmul.mubr.f32.gmra.mrb[22].mxu0 %v7338_v61 }
 0x83d   :  { %15861 = vmatpush3.bf16.msra.mxu0 %v15858_v55  ;;  %14550 = vmatprep.mubr.f32.mxu0 %v17490_v44  ;;  %v15882_v55 = vpack.c.bf16 %v7368_v48, %v7361_v54  ;;  %v216_v48 = vld [vmem:[%s18219_s8 + $0x20] sm:$0xff] }
 0x83e   :  { %15863 = vmatprep.subr.bf16.mxu0 %v15862_v42 }
 0x840   :  { %14551 = vmatmul.mubr.f32.vlgmr.msra.gmra.mrb[20].mxu0 %v17511_v1 }
 0x841   :  { %14553 = vmatprep.mubr.f32.mxu0 %v17522_v2  ;;  %15865 = vmatpush3.bf16.msra.mxu0 %v15862_v42 }
 0x842   :  { %15867 = vmatprep.subr.bf16.mxu0 %v15866_v58 }
 0x844   :  { %14554 = vmatmul.mubr.f32.gmra.mrb[22].mxu0 %v17531_v5 }
 0x845   :  { %15869 = vmatpush3.bf16.msra.mxu0 %v15866_v58  ;;  %14564 = vmatprep.mubr.f32.mxu0 %v17507_v18  ;;  %v5880_v18 = vand.u32 4294901760, %v217_v23 }
 0x846   :  { %15871 = vmatprep.subr.bf16.mxu0 %v17526_v33 }
 0x847   :  { %v15630_v16 = vpack.c.bf16 %v5883_v37, %v5880_v18 }
 0x848   :  { %14565 = vmatmul.mubr.f32.vlgmr.msra.gmra.mrb[20].mxu0 %v17529_v22 }
 0x849   :  { %14567 = vmatprep.mubr.f32.mxu0 %v7325_v51  ;;  %15873 = vmatpush3.bf16.msra.mxu0 %v17526_v33  ;;  %v5332_v51 = vrot.slane %v216_v48, %v17063_v19  ;;  %v12600_v48 = vld [vmem:[%s18212_s9 + $0xb0] sm:$0xff] }
 0x84a   :  { %15875 = vmatprep.subr.bf16.mxu0 %v17547_v8  ;;  %15631 = vmatprep.subr.bf16.mxu1 %v15630_v16 }
 0x84b   :  { %15633 = vmatpush3.bf16.msra.mxu1 %v15630_v16 }
 0x84c   :  { %14568 = vmatmul.mubr.f32.gmra.mrb[22].mxu0 %v7335_v41 }
 0x84d   :  { %15877 = vmatpush3.bf16.msra.mxu0 %v17547_v8  ;;  %14578 = vmatprep.mubr.f32.mxu0 %v7306_v49 }
 0x84e   :  { %15879 = vmatprep.subr.bf16.mxu0 %v15878_v40 }
 0x850   :  { %14579 = vmatmul.mubr.f32.vlgmr.msra.gmra.mrb[20].mxu0 %v7316_v6 }
 0x851   :  { %14581 = vmatprep.mubr.f32.mxu0 %v7326_v7  ;;  %15881 = vmatpush3.bf16.msra.mxu0 %v15878_v40  ;;  %v12594_v40 = vld [vmem:[%s18212_s9 + $0x80] sm:$0xff] }
 0x852   :  { %15883 = vmatprep.subr.bf16.mxu0 %v15882_v55 }
 0x854   :  { %14582 = vmatmul.mubr.f32.gmra.mrb[22].mxu0 %v7336_v45 }
 0x855   :  { %15885 = vmatpush3.bf16.msra.mxu0 %v15882_v55  ;;  %14592 = vmatprep.mubr.f32.mxu0 %v17490_v44  ;;  %v12595_v55 = vld [vmem:[%s18212_s9 + $0x88] sm:$0xff] }
 0x856   :  { %15887 = vmatprep.subr.bf16.mxu0 %v17526_v33 }
 0x858   :  { %14593 = vmatmul.mubr.f32.vlgmr.msra.gmra.mrb[20].mxu0 %v17511_v1 }
 0x859   :  { %14595 = vmatprep.mubr.f32.mxu0 %v17522_v2  ;;  %15889 = vmatpush3.bf16.msra.mxu0 %v17526_v33 }
 0x85a   :  { %15891 = vmatprep.subr.bf16.mxu0 %v17547_v8 }
 0x85c   :  { %14596 = vmatmul.mubr.f32.gmra.mrb[22].mxu0 %v17531_v5 }
 0x85d   :  { %15893 = vmatpush3.bf16.msra.mxu0 %v17547_v8  ;;  %14606 = vmatprep.mubr.f32.mxu0 %v17490_v44  ;;  %v5968_v44 = vsub.f32 %v217_v23, %v5880_v18  ;;  %v6430_v23 = vand.u32 4294901760, %v12594_v40 }
 0x85f   :  { %v5969_v32 = vand.u32 4294901760, %v5968_v44 }
 0x860   :  { %14607 = vmatmul.mubr.f32.vlgmr.msra.gmra.mrb[20].mxu0 %v17511_v1  ;;  %v5975_v1 = vsub.f32 %v218_v57, %v5883_v37  ;;  %v6433_v57 = vand.u32 4294901760, %v12595_v55 }
 0x861   :  { %14609 = vmatprep.mubr.f32.mxu0 %v17522_v2  ;;  %v5970_v49 = vsub.f32 %v5968_v44, %v5969_v32 }
 0x862   :  { %v5976_v50 = vand.u32 4294901760, %v5975_v1  ;;  %v17612_v37 = vpack.c.bf16 %v6433_v57, %v6430_v23 }
 0x864   :  { %14610 = vmatmul.mubr.f32.gmra.mrb[22].mxu0 %v17531_v5  ;;  %v5977_v2 = vsub.f32 %v5975_v1, %v5976_v50  ;;  %v15638_v5 = vpack.c.bf16 %v5975_v1, %v5968_v44  ;;  %v15646_v54 = vpack.c.bf16 %v5976_v50, %v5969_v32  ;;  %v12596_v1 = vld [vmem:[%s18212_s9 + $0x90] sm:$0xff]  ;;  %v12597_v32 = vld [vmem:[%s18212_s9 + $0x98] sm:$0xff] }
 0x865   :  { %14614 = vmatprep.mubr.f32.mxu0 %v17169_v26  ;;  %v5971_v26 = vand.u32 4294901760, %v5970_v49  ;;  %v6436_v49 = vand.u32 4294901760, %v12596_v1 }
 0x866   :  { %v5978_v33 = vand.u32 4294901760, %v5977_v2  ;;  %v6439_v2 = vand.u32 4294901760, %v12597_v32 }
 0x868   :  { %v15634_v22 = vpack.c.bf16 %v5978_v33, %v5971_v26  ;;  %v12598_v33 = vld [vmem:[%s18212_s9 + $0xa0] sm:$0xff] }
 0x86a   :  { %15635 = vmatprep.subr.bf16.mxu1 %v15634_v22 }
 0x903   :  { %v14257_v8 = vpop.f32.mrb[18].mxu0 }
 0x904   :  { %v16222_v6 = vadd.f32 %v14257_v8, %v5332_v51  ;;  %v5857_v41 = vpop.f32.mrb[19].mxu0 }
 0x905   :  { %v16223_v13 = vadd.f32 %v5857_v41, %v5332_v51  ;;  %v12601_v51 = vld [vmem:[%s18212_s9 + $0xb8] sm:$0xff] }
 0x906   :  { %v5868_v0 = vmax.f32 %v16222_v6, 0.0  ;;  %v6448_v6 = vand.u32 4294901760, %v12600_v48  ;;  %v6451_v41 = vand.u32 4294901760, %v12601_v51 }
 0x907   :  { %v5867_v39 = vmax.f32 %v16223_v13, 0.0  ;;  %v12602_v13 = vld [vmem:[%s18212_s9 + $0xc0] sm:$0xff] }
 0x908   :  { %v5877_v7 = vsel %vm41_vm0, %v5868_v0, 0  ;;  %v12603_v0 = vld [vmem:[%s18212_s9 + $0xc8] sm:$0xff]  ;;  %v17730_v19 = vsub.f32 %v12600_v48, %v6448_v6 }
 0x909   :  { %v5956_v25 = vand.u32 4294901760, %v5877_v7  ;;  %v5874_v11 = vsel %vm41_vm0, %v5867_v39, 0  ;;  %v17654_v39 = vpack.c.bf16 %v6451_v41, %v6448_v6 }
 0x90a   :  { %v5946_v45 = vand.u32 4294901760, %v5874_v11  ;;  %v18266_v48 = vand.u32 4294901760, %v17730_v19 }
 0x90b   :  { %v5957_v20 = vsub.f32 %v5877_v7, %v5956_v25  ;;  %v6457_v7 = vand.u32 4294901760, %v12603_v0 }
 0x90c   :  { %v5947_v52 = vsub.f32 %v5874_v11, %v5946_v45  ;;  %v17664_v11 = vld [vmem:[%s18212_s9 + $0xd8] sm:$0xff] }
 0x90d   :  { %v5958_v31 = vand.u32 4294901760, %v5957_v20 }
 0x90e   :  { %v5948_v9 = vand.u32 4294901760, %v5947_v52 }
 0x90f   :  { %v5959_v35 = vsub.f32 %v5957_v20, %v5958_v31 }
 0x910   :  { %v5949_v61 = vsub.f32 %v5947_v52, %v5948_v9 }
 0x911   :  { %v5960_v58 = vand.u32 4294901760, %v5959_v35 }
 0x912   :  { %v5950_v42 = vand.u32 4294901760, %v5949_v61  ;;  %v6463_v61 = vand.u32 4294901760, %v17664_v11 }
 0x914   :  { %14262 = vmatprep.mubr.f32.mxu1 %v5950_v42  ;;  %v17701_v42 = vsub.f32 %v12597_v32, %v6439_v2 }
 0x915   :  { %14263 = vmatmul.mubr.f32.vlgmr.msra.gmra.mrb[8].mxu1 %v5960_v58  ;;  %v17706_v58 = vld [vmem:[%s18212_s9 + $0xf8] sm:$0xff] }
 0x916   :  { %14269 = vmatprep.mubr.f32.mxu1 %v5946_v45  ;;  %15637 = vmatpush3.bf16.msra.mxu1 %v15634_v22  ;;  %v12599_v22 = vld [vmem:[%s18212_s9 + $0xa8] sm:$0xff]  ;;  %v18265_v63 = vand.u32 4294901760, %v17706_v58 }
 0x917   :  { %15639 = vmatprep.subr.bf16.mxu1 %v15638_v5 }
 0x91d   :  { %14270 = vmatmul.mubr.f32.vlgmr.msra.gmra.mrb[8].mxu1 %v5956_v25 }
 0x91e   :  { %14276 = vmatprep.mubr.f32.mxu1 %v5947_v52  ;;  %15641 = vmatpush3.bf16.msra.mxu1 %v15638_v5  ;;  %v17633_v5 = vpack.c.bf16 %v6439_v2, %v6436_v49  ;;  %v17677_v52 = vsub.f32 %v12594_v40, %v6430_v23 }
 0x91f   :  { %15643 = vmatprep.subr.bf16.mxu1 %v15630_v16 }
 0x920   :  { %v18302_v15 = vand.u32 4294901760, %v17677_v52 }
 0x922   :  { %v6554_v32 = vsub.f32 %v17677_v52, %v18302_v15 }
 0x924   :  { %v6555_v15 = vand.u32 4294901760, %v6554_v32 }
 0x925   :  { %14277 = vmatmul.mubr.f32.vlgmr.msra.gmra.mrb[8].mxu1 %v5957_v20  ;;  %v17675_v20 = vld [vmem:[%s18212_s9 + $0xe8] sm:$0xff] }
 0x926   :  { %14283 = vmatprep.mubr.f32.mxu1 %v5948_v9  ;;  %15645 = vmatpush3.bf16.msra.mxu1 %v15630_v16 }
 0x927   :  { %15647 = vmatprep.subr.bf16.mxu1 %v15646_v54 }
 0x92d   :  { %14284 = vmatmul.mubr.f32.vlgmr.msra.gmra.mrb[8].mxu1 %v5958_v31  ;;  %v17679_v31 = vsub.f32 %v12595_v55, %v6433_v57  ;;  %v17691_v55 = vsub.f32 %v12596_v1, %v6436_v49  ;;  %v17699_v57 = vld [vmem:[%s18212_s9 + $0xf0] sm:$0xff]  ;;  %v18301_v1 = vand.u32 4294901760, %v17675_v20 }
 0x92e   :  { %14290 = vmatprep.mubr.f32.mxu1 %v5946_v45  ;;  %15649 = vmatpush3.bf16.msra.mxu1 %v15646_v54  ;;  %v6442_v54 = vand.u32 4294901760, %v12598_v33 }
 0x92f   :  { %15651 = vmatprep.subr.bf16.mxu1 %v15630_v16  ;;  %v18303_v2 = vand.u32 4294901760, %v17679_v31  ;;  %v18264_v60 = vand.u32 4294901760, %v17691_v55 }
 0x931   :  { %v6561_v21 = vsub.f32 %v17679_v31, %v18303_v2 }
 0x933   :  { %v17610_v18 = vpop.f32.mrb[20].mxu0  ;;  %v6562_v2 = vand.u32 4294901760, %v6561_v21 }
 0x934   :  { %v17614_v44 = vpop.f32.mrb[21].mxu0 }
 0x935   :  { %14291 = vmatmul.mubr.f32.vlgmr.msra.gmra.mrb[8].mxu1 %v5956_v25 }
 0x936   :  { %14297 = vmatprep.mubr.f32.mxu1 %v5946_v45  ;;  %15653 = vmatpush3.bf16.msra.mxu1 %v15630_v16  ;;  %v6445_v16 = vand.u32 4294901760, %v12599_v22  ;;  %v17670_v45 = vld [vmem:[%s18212_s9 + $0xe0] sm:$0xff] }
 0x937   :  { %v17622_v50 = vpop.f32.mrb[22].mxu0  ;;  %15655 = vmatprep.subr.bf16.mxu1 %v17612_v37  ;;  %v18300_v40 = vand.u32 4294901760, %v17670_v45 }
 0x938   :  { %18298 = vst [vmem:[#allocation23_spill] sm:$0xff] %v17622_v50  ;;  %v17625_v26 = vpop.f32.mrb[23].mxu0  ;;  %v17644_v8 = vpack.c.bf16 %v6445_v16, %v6442_v54  ;;  %v17728_v17 = vsub.f32 %v12599_v22, %v6445_v16  ;;  %v6568_v50 = vsub.f32 %v17691_v55, %v18264_v60  ;;  %v18305_v22 = vand.u32 4294901760, %v17701_v42 }
 0x939   :  { %18299 = vst [vmem:[#allocation24_spill] sm:$0xff] %v17625_v26  ;;  %v17712_v49 = vpack.c.bf16 %v18301_v1, %v18300_v40  ;;  %v17726_v1 = vsub.f32 %v12598_v33, %v6442_v54  ;;  %v17732_v26 = vsub.f32 %v12601_v51, %v6451_v41  ;;  %v18304_v40 = vand.u32 4294901760, %v17699_v57 }
 0x93a   :  { %v6575_v54 = vsub.f32 %v17701_v42, %v18305_v22  ;;  %v18268_v21 = vand.u32 4294901760, %v17728_v17  ;;  %v15686_v41 = vpack.c.bf16 %v6562_v2, %v6555_v15  ;;  %v6569_v32 = vand.u32 4294901760, %v6568_v50  ;;  %v12572_v22 = vld [vmem:[%s18214_s6 + $0xa8] sm:$0xff] }
 0x93b   :  { %v17743_v33 = vpack.c.bf16 %v18265_v63, %v18304_v40  ;;  %v18269_v16 = vand.u32 4294901760, %v17726_v1  ;;  %v18267_v51 = vand.u32 4294901760, %v17732_v26  ;;  %v17755_v40 = vsub.f32 %v12603_v0, %v6457_v7 }
 0x93c   :  { %v6576_v60 = vand.u32 4294901760, %v6575_v54  ;;  %v6596_v50 = vsub.f32 %v17730_v19, %v18266_v48  ;;  %v17783_v54 = vsub.f32 %v17664_v11, %v6463_v61 }
 0x93d   :  { %14298 = vmatmul.mubr.f32.vlgmr.msra.gmra.mrb[8].mxu1 %v5956_v25  ;;  %v17659_v25 = vld [vmem:[%s18212_s9 + $0xd0] sm:$0xff]  ;;  %v6582_v63 = vsub.f32 %v17726_v1, %v18269_v16  ;;  %v6603_v0 = vsub.f32 %v17732_v26, %v18267_v51  ;;  %v18270_v15 = vand.u32 4294901760, %v17755_v40 }
 0x93e   :  { %15657 = vmatpush3.bf16.msra.mxu1 %v17612_v37  ;;  %14332 = vmatprep.mubr.f32.mxu1 %v16685_v38  ;;  %v6454_v38 = vand.u32 4294901760, %v12602_v13  ;;  %v6460_v35 = vand.u32 4294901760, %v17659_v25  ;;  %v15690_v51 = vpack.c.bf16 %v6576_v60, %v6569_v32 }
 0x93f   :  { %15659 = vmatprep.subr.bf16.mxu1 %v17633_v5 }
 0x940   :  { %v17682_v9 = vpack.c.bf16 %v6457_v7, %v6454_v38  ;;  %v17694_v23 = vpack.c.bf16 %v6463_v61, %v6460_v35  ;;  %v17752_v6 = vsub.f32 %v12602_v13, %v6454_v38  ;;  %v6589_v13 = vsub.f32 %v17728_v17, %v18268_v21 }
 0x941   :  { %v17767_v38 = vand.u32 4294901760, %v12572_v22  ;;  %v17780_v2 = vsub.f32 %v17659_v25, %v6460_v35  ;;  %v6583_v21 = vand.u32 4294901760, %v6582_v63  ;;  %v6597_v25 = vand.u32 4294901760, %v6596_v50 }
 0x942   :  { %15661 = vmatpush3.bf16.msra.mxu1 %v17633_v5  ;;  %v6590_v16 = vand.u32 4294901760, %v6589_v13  ;;  %v6604_v35 = vand.u32 4294901760, %v6603_v0  ;;  %v18306_v11 = vand.u32 4294901760, %v17752_v6  ;;  %v6617_v63 = vsub.f32 %v17755_v40, %v18270_v15 }
 0x943   :  { %15663 = vmatprep.subr.bf16.mxu1 %v17644_v8  ;;  %14612 = vmatprep.subr.mxu0 %v17767_v38  ;;  %v7945_v48 = vsub.f32 %v12572_v22, %v17767_v38  ;;  %v6623_v60 = vand.u32 4294901760, %v17780_v2  ;;  %v18307_v22 = vand.u32 4294901760, %v17670_v45 }
 0x944   :  { %14613 = vmatpush3.msra.mxu0 %v17767_v38  ;;  %v6610_v61 = vsub.f32 %v17752_v6, %v18306_v11  ;;  %v15698_v11 = vpack.c.bf16 %v6604_v35, %v6597_v25  ;;  %v6618_v15 = vand.u32 4294901760, %v6617_v63  ;;  %v18310_v25 = vand.u32 4294901760, %v17706_v58 }
 0x945   :  { %14615 = vmatmul.mubr.f32.vlgmr.msra.gmra.mrb[24].mxu0 %v17172_v46  ;;  %v17788_v7 = vand.u32 4294901760, %v7945_v48  ;;  %v6630_v46 = vand.u32 4294901760, %v17783_v54  ;;  %v17805_v13 = vsub.f32 %v17670_v45, %v18307_v22 }
 0x946   :  { %15665 = vmatpush3.bf16.msra.mxu1 %v17644_v8  ;;  %14619 = vmatprep.mubr.f32.mxu0 %v17136_v12  ;;  %v17830_v35 = vsub.f32 %v17706_v58, %v18310_v25 }
 0x947   :  { %15667 = vmatprep.subr.bf16.mxu1 %v17654_v39  ;;  %v7947_v32 = vsub.f32 %v7945_v48, %v17788_v7  ;;  %v6631_v45 = vsub.f32 %v17783_v54, %v6630_v46 }
 0x949   :  { %v7948_v0 = vand.u32 4294901760, %v7947_v32  ;;  %v6632_v32 = vand.u32 4294901760, %v6631_v45 }
 0x94a   :  { %15669 = vmatpush3.bf16.msra.mxu1 %v17654_v39 }
 0x94b   :  { %15671 = vmatprep.subr.bf16.mxu1 %v17682_v9  ;;  %14617 = vmatprep.subr.mxu0 %v7948_v0 }
 0x94c   :  { %14618 = vmatpush3.msra.mxu0 %v7948_v0 }
 0x94d   :  { %14620 = vmatmul.mubr.f32.vlgmr.msra.gmra.mrb[24].mxu0 %v17139_v53  ;;  %14622 = vmatprep.subr.mxu0 %v7945_v48 }
 0x94e   :  { %15673 = vmatpush3.bf16.msra.mxu1 %v17682_v9  ;;  %14623 = vmatpush3.msra.mxu0 %v7945_v48 }
 0x94f   :  { %15675 = vmatprep.subr.bf16.mxu1 %v17694_v23  ;;  %14624 = vmatprep.mubr.f32.mxu0 %v17144_v43 }
 0x950   :  { %14627 = vmatprep.subr.mxu0 %v17767_v38 }
 0x952   :  { %15677 = vmatpush3.bf16.msra.mxu1 %v17694_v23 }
 0x953   :  { %15679 = vmatprep.subr.bf16.mxu1 %v17712_v49 }
 0x955   :  { %14625 = vmatmul.mubr.f32.vlgmr.msra.gmra.mrb[24].mxu0 %v17149_v56  ;;  %v15718_v56 = vpack.c.bf16 %v17679_v31, %v17677_v52 }
 0x956   :  { %15681 = vmatpush3.bf16.msra.mxu1 %v17712_v49  ;;  %14628 = vmatpush3.msra.mxu0 %v17767_v38 }
 0x957   :  { %15683 = vmatprep.subr.bf16.mxu1 %v17743_v33  ;;  %14629 = vmatprep.mubr.f32.mxu0 %v17154_v62  ;;  %v15722_v62 = vpack.c.bf16 %v17701_v42, %v17691_v55 }
 0x958   :  { %14632 = vmatprep.subr.mxu0 %v17788_v7 }
 0x95a   :  { %15685 = vmatpush3.bf16.msra.mxu1 %v17743_v33 }
 0x95b   :  { %15687 = vmatprep.subr.bf16.mxu1 %v15686_v41 }
 0x95d   :  { %14333 = vmatmul.mubr.f32.vlgmr.msra.gmra.mrb[10].mxu1 %v16843_v28  ;;  %v15694_v28 = vpack.c.bf16 %v6590_v16, %v6583_v21  ;;  %v6624_v16 = vsub.f32 %v17780_v2, %v6623_v60  ;;  %14630 = vmatmul.mubr.f32.vlgmr.msra.gmra.mrb[24].mxu0 %v17159_v27  ;;  %v15726_v27 = vpack.c.bf16 %v17728_v17, %v17726_v1 }
 0x95e   :  { %15689 = vmatpush3.bf16.msra.mxu1 %v15686_v41  ;;  %14335 = vmatprep.mubr.f32.mxu1 %v16859_v34  ;;  %v18308_v41 = vand.u32 4294901760, %v17675_v20  ;;  %v6611_v34 = vand.u32 4294901760, %v6610_v61 }
 0x95f   :  { %15691 = vmatprep.subr.bf16.mxu1 %v15690_v51  ;;  %v6625_v63 = vand.u32 4294901760, %v6624_v16  ;;  %14633 = vmatpush3.msra.mxu0 %v17788_v7  ;;  %v15730_v7 = vpack.c.bf16 %v17732_v26, %v17730_v19 }
 0x960   :  { %v17810_v50 = vsub.f32 %v17675_v20, %v18308_v41  ;;  %v6637_v20 = vand.u32 4294901760, %v17805_v13  ;;  %v15702_v61 = vpack.c.bf16 %v6618_v15, %v6611_v34  ;;  %v6658_v41 = vand.u32 4294901760, %v17830_v35  ;;  %14634 = vmatprep.mubr.f32.mxu0 %v17136_v12  ;;  %14637 = vmatprep.subr.mxu0 %v17767_v38 }
 0x961   :  { %14336 = vmatmul.mubr.f32.gmra.mrb[12].mxu1 %v16870_v36  ;;  %v18309_v36 = vand.u32 4294901760, %v17699_v57  ;;  %v15706_v15 = vpack.c.bf16 %v6632_v32, %v6625_v63  ;;  %v18316_v63 = vand.u32 4294901760, %v17701_v42  ;;  %v18322_v42 = vand.u32 4294901760, %v17730_v19 }
 0x962   :  { %15693 = vmatpush3.bf16.msra.mxu1 %v15690_v51  ;;  %14370 = vmatprep.mubr.f32.mxu1 %v16638_v24  ;;  %v6644_v21 = vand.u32 4294901760, %v17810_v50  ;;  %v6659_v34 = vsub.f32 %v17830_v35, %v6658_v41 }
 0x963   :  { %15695 = vmatprep.subr.bf16.mxu1 %v15694_v28  ;;  %v17825_v51 = vsub.f32 %v17699_v57, %v18309_v36  ;;  %v6638_v57 = vsub.f32 %v17805_v13, %v6637_v20  ;;  %v18312_v36 = vld [vmem:[#allocation2_spill] sm:$0xff] }
 0x964   :  { %v6645_v58 = vsub.f32 %v17810_v50, %v6644_v21  ;;  %v6660_v16 = vand.u32 4294901760, %v6659_v34  ;;  %v15806_v19 = vpack.c.bf16 %v6644_v21, %v6637_v20 }
 0x965   :  { %v6651_v22 = vand.u32 4294901760, %v17825_v51  ;;  %v6639_v48 = vand.u32 4294901760, %v6638_v57  ;;  %14635 = vmatmul.mubr.f32.vlgmr.msra.gmra.mrb[24].mxu0 %v17139_v53  ;;  %v18317_v57 = vld [vmem:[#allocation3_spill] sm:$0xff] }
 0x966   :  { %15697 = vmatpush3.bf16.msra.mxu1 %v15694_v28  ;;  %v6646_v28 = vand.u32 4294901760, %v6645_v58  ;;  %14638 = vmatpush3.msra.mxu0 %v17767_v38  ;;  %v15734_v38 = vpack.c.bf16 %v17755_v40, %v17752_v6  ;;  %v18318_v58 = vld [vmem:[#allocation4_spill] sm:$0xff] }
 0x967   :  { %15699 = vmatprep.subr.bf16.mxu1 %v15698_v11  ;;  %v6652_v0 = vsub.f32 %v17825_v51, %v6651_v22  ;;  %14639 = vmatprep.mubr.f32.mxu0 %v17136_v12  ;;  %v15738_v12 = vpack.c.bf16 %v17783_v54, %v17780_v2  ;;  %v18329_v54 = vld [vmem:[#allocation24_spill] sm:$0xff] }
 0x968   :  { %v15710_v43 = vpack.c.bf16 %v6646_v28, %v6639_v48  ;;  %v18321_v48 = vld [vmem:[#allocation6_spill] sm:$0xff] }
 0x96a   :  { %15701 = vmatpush3.bf16.msra.mxu1 %v15698_v11  ;;  %v6653_v11 = vand.u32 4294901760, %v6652_v0  ;;  %v18324_v0 = vand.u32 4294901760, %v17752_v6  ;;  %v18328_v6 = vld [vmem:[#allocation23_spill] sm:$0xff] }
 0x96b   :  { %15703 = vmatprep.subr.bf16.mxu1 %v15702_v61 }
 0x96c   :  { %v15714_v45 = vpack.c.bf16 %v6660_v16, %v6653_v11 }
 0x96d   :  { %14640 = vmatmul.mubr.f32.vlgmr.msra.gmra.mrb[24].mxu0 %v17139_v53  ;;  %v15746_v53 = vpack.c.bf16 %v17830_v35, %v17825_v51 }
 0x96e   :  { %15705 = vmatpush3.bf16.msra.mxu1 %v15702_v61  ;;  %14650 = vmatprep.mubr.f32.mxu0 %v17200_v29  ;;  %v18311_v29 = vld [vmem:[#allocation5_spill] sm:$0xff]  ;;  %v18315_v61 = vand.u32 4294901760, %v17691_v55  ;;  %v18323_v55 = vand.u32 4294901760, %v17732_v26  ;;  %v15810_v26 = vpack.c.bf16 %v6658_v41, %v6651_v22 }
 0x96f   :  { %15707 = vmatprep.subr.bf16.mxu1 %v15706_v15 }
 0x970   :  { %v15786_v32 = vpack.c.bf16 %v18316_v63, %v18315_v61  ;;  %v15794_v28 = vpack.c.bf16 %v18323_v55, %v18322_v42  ;;  %v18330_v63 = vld [vmem:[#allocation18_spill] sm:$0xff] }
 0x972   :  { %15709 = vmatpush3.bf16.msra.mxu1 %v15706_v15  ;;  %v18319_v15 = vand.u32 4294901760, %v17726_v1  ;;  %v18325_v1 = vand.u32 4294901760, %v17755_v40 }
 0x973   :  { %15711 = vmatprep.subr.bf16.mxu1 %v15710_v43 }
 0x974   :  { %v15798_v34 = vpack.c.bf16 %v18325_v1, %v18324_v0  ;;  %v18336_v0 = vld [vmem:[#allocation10_spill] sm:$0xff] }
 0x976   :  { %15713 = vmatpush3.bf16.msra.mxu1 %v15710_v43 }
 0x977   :  { %15715 = vmatprep.subr.bf16.mxu1 %v15714_v45 }
 0x97a   :  { %15717 = vmatpush3.bf16.msra.mxu1 %v15714_v45 }
 0x97b   :  { %15719 = vmatprep.subr.bf16.mxu1 %v15718_v56 }
 0x97d   :  { %14371 = vmatmul.mubr.f32.vlgmr.msra.gmra.mrb[10].mxu1 %v16714_v47 }
 0x97e   :  { %15721 = vmatpush3.bf16.msra.mxu1 %v15718_v56  ;;  %14373 = vmatprep.mubr.f32.mxu1 %v16771_v4 }
 0x97f   :  { %15723 = vmatprep.subr.bf16.mxu1 %v15722_v62 }
 0x981   :  { %14374 = vmatmul.mubr.f32.gmra.mrb[12].mxu1 %v16794_v14 }
 0x982   :  { %15725 = vmatpush3.bf16.msra.mxu1 %v15722_v62  ;;  %14408 = vmatprep.mubr.f32.mxu1 %v16656_v30  ;;  %v15742_v30 = vpack.c.bf16 %v17810_v50, %v17805_v13 }
 0x983   :  { %15727 = vmatprep.subr.bf16.mxu1 %v15726_v27 }
 0x986   :  { %15729 = vmatpush3.bf16.msra.mxu1 %v15726_v27 }
 0x987   :  { %15731 = vmatprep.subr.bf16.mxu1 %v15730_v7 }
 0x98a   :  { %15733 = vmatpush3.bf16.msra.mxu1 %v15730_v7 }
 0x98b   :  { %15735 = vmatprep.subr.bf16.mxu1 %v15734_v38 }
 0x98e   :  { %15737 = vmatpush3.bf16.msra.mxu1 %v15734_v38 }
 0x98f   :  { %15739 = vmatprep.subr.bf16.mxu1 %v15738_v12 }
 0x992   :  { %15741 = vmatpush3.bf16.msra.mxu1 %v15738_v12 }
 0x993   :  { %15743 = vmatprep.subr.bf16.mxu1 %v15742_v30 }
 0x996   :  { %15745 = vmatpush3.bf16.msra.mxu1 %v15742_v30 }
 0x997   :  { %15747 = vmatprep.subr.bf16.mxu1 %v15746_v53 }
 0x99a   :  { %15749 = vmatpush3.bf16.msra.mxu1 %v15746_v53 }
 0x99b   :  { %15751 = vmatprep.subr.bf16.mxu1 %v17612_v37 }
 0x99d   :  { %14409 = vmatmul.mubr.f32.vlgmr.msra.gmra.mrb[10].mxu1 %v16748_v59  ;;  %v18313_v59 = vand.u32 4294901760, %v17677_v52  ;;  %v18320_v52 = vand.u32 4294901760, %v17728_v17  ;;  %v15802_v17 = vpack.c.bf16 %v6630_v46, %v6623_v60 }
 0x99e   :  { %15753 = vmatpush3.bf16.msra.mxu1 %v17612_v37  ;;  %14411 = vmatprep.mubr.f32.mxu1 %v16785_v10  ;;  %v18314_v10 = vand.u32 4294901760, %v17679_v31 }
 0x99f   :  { %15755 = vmatprep.subr.bf16.mxu1 %v17633_v5  ;;  %v15790_v31 = vpack.c.bf16 %v18320_v52, %v18319_v15  ;;  %v18332_v15 = vld [vmem:[#allocation15_spill] sm:$0xff]  ;;  %v18333_v52 = vld [vmem:[#allocation9_spill] sm:$0xff] }
 0x9a0   :  { %v15782_v25 = vpack.c.bf16 %v18314_v10, %v18313_v59 }
 0x9a1   :  { %14412 = vmatmul.mubr.f32.gmra.mrb[12].mxu1 %v18311_v29 }
 0x9a2   :  { %15757 = vmatpush3.bf16.msra.mxu1 %v17633_v5  ;;  %14446 = vmatprep.mubr.f32.mxu1 %v18312_v36 }
 0x9a3   :  { %15759 = vmatprep.subr.bf16.mxu1 %v17644_v8 }
 0x9a6   :  { %15761 = vmatpush3.bf16.msra.mxu1 %v17644_v8 }
 0x9a7   :  { %15763 = vmatprep.subr.bf16.mxu1 %v17654_v39 }
 0x9aa   :  { %15765 = vmatpush3.bf16.msra.mxu1 %v17654_v39 }
 0x9ab   :  { %15767 = vmatprep.subr.bf16.mxu1 %v17682_v9 }
 0x9ae   :  { %15769 = vmatpush3.bf16.msra.mxu1 %v17682_v9 }
 0x9af   :  { %15771 = vmatprep.subr.bf16.mxu1 %v17694_v23 }
 0x9b2   :  { %15773 = vmatpush3.bf16.msra.mxu1 %v17694_v23 }
 0x9b3   :  { %15775 = vmatprep.subr.bf16.mxu1 %v17712_v49 }
 0x9b6   :  { %15777 = vmatpush3.bf16.msra.mxu1 %v17712_v49 }
 0x9b7   :  { %15779 = vmatprep.subr.bf16.mxu1 %v17743_v33 }
 0x9ba   :  { %15781 = vmatpush3.bf16.msra.mxu1 %v17743_v33 }
 0x9bb   :  { %15783 = vmatprep.subr.bf16.mxu1 %v15782_v25 }
 0x9bd   :  { %14447 = vmatmul.mubr.f32.vlgmr.msra.gmra.mrb[10].mxu1 %v18317_v57  ;;  %v18331_v57 = vld [vmem:[#allocation8_spill] sm:$0xff] }
 0x9be   :  { %15785 = vmatpush3.bf16.msra.mxu1 %v15782_v25  ;;  %14449 = vmatprep.mubr.f32.mxu1 %v18318_v58 }
 0x9bf   :  { %15787 = vmatprep.subr.bf16.mxu1 %v15786_v32 }
 0x9c1   :  { %14450 = vmatmul.mubr.f32.gmra.mrb[12].mxu1 %v18321_v48 }
 0x9c2   :  { %15789 = vmatpush3.bf16.msra.mxu1 %v15786_v32  ;;  %14484 = vmatprep.mubr.f32.mxu1 %v16638_v24 }
 0x9c3   :  { %15791 = vmatprep.subr.bf16.mxu1 %v15790_v31 }
 0x9c6   :  { %15793 = vmatpush3.bf16.msra.mxu1 %v15790_v31  ;;  %v18334_v31 = vsub.s32 3, %v17060_v3 }
 0x9c7   :  { %15795 = vmatprep.subr.bf16.mxu1 %v15794_v28 }
 0x9ca   :  { %15797 = vmatpush3.bf16.msra.mxu1 %v15794_v28  ;;  %v18335_v28 = vld [vmem:[#allocation16_spill] sm:$0xff] }
 0x9cb   :  { %15799 = vmatprep.subr.bf16.mxu1 %v15798_v34 }
 0x9ce   :  { %15801 = vmatpush3.bf16.msra.mxu1 %v15798_v34 }
 0x9cf   :  { %15803 = vmatprep.subr.bf16.mxu1 %v15802_v17 }
 0x9d2   :  { %15805 = vmatpush3.bf16.msra.mxu1 %v15802_v17 }
 0x9d3   :  { %15807 = vmatprep.subr.bf16.mxu1 %v15806_v19 }
 0x9d6   :  { %15809 = vmatpush3.bf16.msra.mxu1 %v15806_v19 }
 0x9d7   :  { %15811 = vmatprep.subr.bf16.mxu1 %v15810_v26 }
 0x9da   :  { %15813 = vmatpush3.bf16.msra.mxu1 %v15810_v26  ;;  %v18337_v26 = vld [vmem:[#allocation17_spill] sm:$0xff] }
 0x9db   :  { %15815 = vmatprep.subr.bf16.mxu1 %v17612_v37 }
 0x9dd   :  { %14485 = vmatmul.mubr.f32.vlgmr.msra.gmra.mrb[10].mxu1 %v16714_v47 }
 0x9de   :  { %15817 = vmatpush3.bf16.msra.mxu1 %v17612_v37  ;;  %14487 = vmatprep.mubr.f32.mxu1 %v16771_v4 }
 0x9df   :  { %15819 = vmatprep.subr.bf16.mxu1 %v17633_v5 }
 0x9e1   :  { %14488 = vmatmul.mubr.f32.gmra.mrb[12].mxu1 %v16794_v14 }
 0x9e2   :  { %15821 = vmatpush3.bf16.msra.mxu1 %v17633_v5  ;;  %14522 = vmatprep.mubr.f32.mxu1 %v16638_v24  ;;  %v18326_v24 = vld [vmem:[#allocation14_spill] sm:$0xff] }
 0x9e3   :  { %15823 = vmatprep.subr.bf16.mxu1 %v17644_v8 }
 0x9e6   :  { %15825 = vmatpush3.bf16.msra.mxu1 %v17644_v8  ;;  %v17965_v8 = vld [vmem:[%s18215_s7 + $0x8] sm:$0xff] }
 0x9e7   :  { %15827 = vmatprep.subr.bf16.mxu1 %v17654_v39  ;;  %v7856_v48 = vrot.slane %v17965_v8, %v18334_v31 }
 0x9ea   :  { %15829 = vmatpush3.bf16.msra.mxu1 %v17654_v39  ;;  %v18327_v39 = vsub.s32 2, %v17060_v3 }
 0x9eb   :  { %15831 = vmatprep.subr.bf16.mxu1 %v17682_v9 }
 0x9ee   :  { %15833 = vmatpush3.bf16.msra.mxu1 %v17682_v9  ;;  %v7222_v9 = vrot.slane %v17965_v8, %v18327_v39 }
 0x9ef   :  { %15835 = vmatprep.subr.bf16.mxu1 %v17694_v23 }
 0x9f0   :  { %v16232_v40 = vadd.f32 %v18328_v6, %v7222_v9  ;;  %v16233_v60 = vadd.f32 %v18329_v54, %v7222_v9  ;;  %v18339_v6 = vld [vmem:[#allocation11_spill] sm:$0xff]  ;;  %v18342_v54 = vld [vmem:[#allocation20_spill] sm:$0xff] }
 0x9f2   :  { %15837 = vmatpush3.bf16.msra.mxu1 %v17694_v23  ;;  %v16230_v23 = vadd.f32 %v17610_v18, %v7222_v9 }
 0x9f3   :  { %15839 = vmatprep.subr.bf16.mxu1 %v17712_v49 }
 0x9f6   :  { %15841 = vmatpush3.bf16.msra.mxu1 %v17712_v49 }
 0x9f7   :  { %15843 = vmatprep.subr.bf16.mxu1 %v17743_v33 }
 0x9fa   :  { %15845 = vmatpush3.bf16.msra.mxu1 %v17743_v33 }
 0x9fd   :  { %14523 = vmatmul.mubr.f32.vlgmr.msra.gmra.mrb[10].mxu1 %v16714_v47  ;;  %v16231_v47 = vadd.f32 %v17614_v44, %v7222_v9 }
 0x9fe   :  { %14525 = vmatprep.mubr.f32.mxu1 %v16771_v4 }
 0xa01   :  { %14526 = vmatmul.mubr.f32.gmra.mrb[12].mxu1 %v16794_v14 }
 0xa02   :  { %14820 = vmatprep.mubr.f32.mxu1 %v18326_v24 }
 0xa40   :  { %v14641_v37 = vpop.f32.mrb[24].mxu0 }
 0xa41   :  { %v8336_v5 = vpop.f32.mrb[25].mxu0  ;;  %v17986_v42 = vadd.f32 %v14641_v37, %v7856_v48 }
 0xa42   :  { %v17988_v55 = vadd.f32 %v8336_v5, %v7856_v48 }
 0xa43   :  { %v8878_v1 = vand.u32 4294901760, %v17986_v42 }
 0xa44   :  { %v8875_v34 = vand.u32 4294901760, %v17988_v55 }
 0xa45   :  { %v8970_v17 = vsub.f32 %v17986_v42, %v8878_v1 }
 0xa46   :  { %v8963_v19 = vsub.f32 %v17988_v55, %v8875_v34 }
 0xa47   :  { %v8971_v5 = vand.u32 4294901760, %v8970_v17 }
 0xa48   :  { %v8964_v37 = vand.u32 4294901760, %v8963_v19 }
 0xa49   :  { %v8972_v9 = vsub.f32 %v8970_v17, %v8971_v5 }
 0xa4a   :  { %v8965_v39 = vsub.f32 %v8963_v19, %v8964_v37 }
 0xad0   :  { %v14524_v4 = vpop.f32.mrb[10].mxu1 }
 0xad1   :  { %v7850_v49 = vmul.f32 %v16230_v23, %v14524_v4  ;;  %v7177_v14 = vpop.f32.mrb[11].mxu1  ;;  %v15942_v23 = vpack.c.bf16 %v8878_v1, %v8875_v34  ;;  %v8973_v4 = vand.u32 4294901760, %v8972_v9 }
 0xad2   :  { %v7849_v33 = vmul.f32 %v16231_v47, %v7177_v14  ;;  %v8966_v47 = vand.u32 4294901760, %v8965_v39  ;;  %v18338_v14 = vld [vmem:[#allocation22_spill] sm:$0xff] }
 0xad3   :  { %v8350_v2 = vand.u32 4294901760, %v7850_v49 }
 0xad4   :  { %v8347_v46 = vand.u32 4294901760, %v7849_v33  ;;  %v14527_v13 = vpop.f32.mrb[12].mxu1 }
 0xad5   :  { %v8444_v50 = vsub.f32 %v7850_v49, %v8350_v2  ;;  %v7852_v20 = vmul.f32 %v16232_v40, %v14527_v13  ;;  %v7189_v21 = vpop.f32.mrb[13].mxu1  ;;  %v15946_v49 = vpack.c.bf16 %v8973_v4, %v8966_v47  ;;  %v18340_v40 = vld [vmem:[#allocation19_spill] sm:$0xff]  ;;  %v12573_v13 = vld [vmem:[%s18214_s6 + $0xb0] sm:$0xff] }
 0xad6   :  { %v17974_v51 = vpack.c.bf16 %v8350_v2, %v8347_v46  ;;  %v8437_v35 = vsub.f32 %v7849_v33, %v8347_v46  ;;  %v7851_v18 = vmul.f32 %v16233_v60, %v7189_v21  ;;  %v15950_v33 = vpack.c.bf16 %v8970_v17, %v8963_v19  ;;  %v18341_v2 = vld [vmem:[#allocation12_spill] sm:$0xff]  ;;  %v18343_v46 = vld [vmem:[#allocation13_spill] sm:$0xff] }
 0xad7   :  { %v8445_v22 = vand.u32 4294901760, %v8444_v50  ;;  %v8356_v44 = vand.u32 4294901760, %v7852_v20  ;;  %v15958_v60 = vpack.c.bf16 %v8971_v5, %v8964_v37 }
 0xad8   :  { %v8438_v41 = vand.u32 4294901760, %v8437_v35  ;;  %v8353_v43 = vand.u32 4294901760, %v7851_v18  ;;  %15895 = vmatprep.subr.bf16.mxu0 %v17974_v51  ;;  %v15910_v11 = vpack.c.bf16 %v8444_v50, %v8437_v35 }
 0xad9   :  { %v8458_v16 = vsub.f32 %v7852_v20, %v8356_v44  ;;  %15897 = vmatpush3.bf16.msra.mxu0 %v17974_v51  ;;  %v8446_v45 = vsub.f32 %v8444_v50, %v8445_v22  ;;  %v12574_v50 = vld [vmem:[%s18214_s6 + $0xb8] sm:$0xff]  ;;  %v9387_v20 = vand.u32 4294901760, %v12573_v13 }
 0xada   :  { %v15898_v56 = vpack.c.bf16 %v8356_v44, %v8353_v43  ;;  %v8451_v62 = vsub.f32 %v7851_v18, %v8353_v43  ;;  %v8439_v27 = vsub.f32 %v8437_v35, %v8438_v41  ;;  %v15926_v7 = vpack.c.bf16 %v8445_v22, %v8438_v41  ;;  %v12576_v35 = vld [vmem:[%s18214_s6 + $0xc8] sm:$0xff] }
 0xadb   :  { %v8459_v38 = vand.u32 4294901760, %v8458_v16  ;;  %v8447_v12 = vand.u32 4294901760, %v8446_v45  ;;  %v9390_v21 = vand.u32 4294901760, %v12574_v50  ;;  %v9396_v22 = vand.u32 4294901760, %v12576_v35 }
 0xadc   :  { %v8452_v30 = vand.u32 4294901760, %v8451_v62  ;;  %15899 = vmatprep.subr.bf16.mxu0 %v15898_v56  ;;  %v8440_v53 = vand.u32 4294901760, %v8439_v27  ;;  %v15914_v29 = vpack.c.bf16 %v8458_v16, %v8451_v62  ;;  %v9477_v41 = vsub.f32 %v12573_v13, %v9387_v20 }
 0xadd   :  { %15901 = vmatpush3.bf16.msra.mxu0 %v15898_v56  ;;  %v8460_v36 = vsub.f32 %v8458_v16, %v8459_v38  ;;  %v18028_v44 = vpack.c.bf16 %v9390_v21, %v9387_v20  ;;  %v9484_v43 = vsub.f32 %v12574_v50, %v9390_v21 }
 0xade   :  { %v15902_v59 = vpack.c.bf16 %v8447_v12, %v8440_v53  ;;  %v8453_v10 = vsub.f32 %v8451_v62, %v8452_v30  ;;  %v15930_v25 = vpack.c.bf16 %v8459_v38, %v8452_v30  ;;  %v9478_v16 = vand.u32 4294901760, %v9477_v41 }
 0xadf   :  { %v8461_v61 = vand.u32 4294901760, %v8460_v36  ;;  %v9485_v45 = vand.u32 4294901760, %v9484_v43 }
 0xae0   :  { %14651 = vmatmul.mubr.f32.vlgmr.msra.gmra.mrb[26].mxu0 %v18330_v63  ;;  %15903 = vmatprep.subr.bf16.mxu0 %v15902_v59  ;;  %v8454_v32 = vand.u32 4294901760, %v8453_v10  ;;  %v15982_v63 = vpack.c.bf16 %v9484_v43, %v9477_v41 }
 0xae1   :  { %15905 = vmatpush3.bf16.msra.mxu0 %v15902_v59  ;;  %14661 = vmatprep.mubr.f32.mxu0 %v18331_v57  ;;  %v9486_v62 = vsub.f32 %v9484_v43, %v9485_v45 }
 0xae2   :  { %v15906_v58 = vpack.c.bf16 %v8461_v61, %v8454_v32 }
 0xae3   :  { %v9487_v12 = vand.u32 4294901760, %v9486_v62 }
 0xae4   :  { %15907 = vmatprep.subr.bf16.mxu0 %v15906_v58 }
 0xae5   :  { %15909 = vmatpush3.bf16.msra.mxu0 %v15906_v58 }
 0xae6   :  { %15911 = vmatprep.subr.bf16.mxu0 %v15910_v11 }
 0xae8   :  { %14662 = vmatmul.mubr.f32.vlgmr.msra.gmra.mrb[26].mxu0 %v18332_v15 }
 0xae9   :  { %15913 = vmatpush3.bf16.msra.mxu0 %v15910_v11  ;;  %14672 = vmatprep.mubr.f32.mxu0 %v18333_v52 }
 0xaea   :  { %15915 = vmatprep.subr.bf16.mxu0 %v15914_v29 }
 0xaed   :  { %15917 = vmatpush3.bf16.msra.mxu0 %v15914_v29 }
 0xaee   :  { %15919 = vmatprep.subr.bf16.mxu0 %v17974_v51 }
 0xaf0   :  { %14673 = vmatmul.mubr.f32.vlgmr.msra.gmra.mrb[26].mxu0 %v18335_v28 }
 0xaf1   :  { %15921 = vmatpush3.bf16.msra.mxu0 %v17974_v51  ;;  %14683 = vmatprep.mubr.f32.mxu0 %v18336_v0 }
 0xaf2   :  { %15923 = vmatprep.subr.bf16.mxu0 %v15898_v56 }
 0xaf5   :  { %15925 = vmatpush3.bf16.msra.mxu0 %v15898_v56 }
 0xaf6   :  { %15927 = vmatprep.subr.bf16.mxu0 %v15926_v7 }
 0xaf8   :  { %14684 = vmatmul.mubr.f32.vlgmr.msra.gmra.mrb[26].mxu0 %v18337_v26 }
 0xaf9   :  { %15929 = vmatpush3.bf16.msra.mxu0 %v15926_v7  ;;  %14694 = vmatprep.mubr.f32.mxu0 %v18331_v57  ;;  %v9498_v7 = vsub.f32 %v12576_v35, %v9396_v22 }
 0xafa   :  { %15931 = vmatprep.subr.bf16.mxu0 %v15930_v25 }
 0xafb   :  { %v9499_v53 = vand.u32 4294901760, %v9498_v7 }
 0xafd   :  { %15933 = vmatpush3.bf16.msra.mxu0 %v15930_v25  ;;  %v9500_v59 = vsub.f32 %v9498_v7, %v9499_v53 }
 0xafe   :  { %15935 = vmatprep.subr.bf16.mxu0 %v17974_v51 }
 0xaff   :  { %v9501_v25 = vand.u32 4294901760, %v9500_v59 }
 0xb00   :  { %14695 = vmatmul.mubr.f32.vlgmr.msra.gmra.mrb[26].mxu0 %v18332_v15 }
 0xb01   :  { %15937 = vmatpush3.bf16.msra.mxu0 %v17974_v51  ;;  %14705 = vmatprep.mubr.f32.mxu0 %v18331_v57  ;;  %v12575_v51 = vld [vmem:[%s18214_s6 + $0xc0] sm:$0xff]  ;;  %v15998_v57 = vpack.c.bf16 %v9485_v45, %v9478_v16 }
 0xb02   :  { %15939 = vmatprep.subr.bf16.mxu0 %v15898_v56  ;;  %v9393_v18 = vand.u32 4294901760, %v12575_v51 }
 0xb04   :  { %v18030_v11 = vpack.c.bf16 %v9396_v22, %v9393_v18  ;;  %v9491_v27 = vsub.f32 %v12575_v51, %v9393_v18 }
 0xb05   :  { %15941 = vmatpush3.bf16.msra.mxu0 %v15898_v56  ;;  %v9479_v56 = vsub.f32 %v9477_v41, %v9478_v16 }
 0xb06   :  { %15943 = vmatprep.subr.bf16.mxu0 %v15942_v23  ;;  %v9492_v30 = vand.u32 4294901760, %v9491_v27  ;;  %v15986_v32 = vpack.c.bf16 %v9498_v7, %v9491_v27 }
 0xb07   :  { %v9480_v38 = vand.u32 4294901760, %v9479_v56 }
 0xb08   :  { %14706 = vmatmul.mubr.f32.vlgmr.msra.gmra.mrb[26].mxu0 %v18332_v15  ;;  %v9493_v36 = vsub.f32 %v9491_v27, %v9492_v30  ;;  %v16002_v58 = vpack.c.bf16 %v9499_v53, %v9492_v30 }
 0xb09   :  { %15945 = vmatpush3.bf16.msra.mxu0 %v15942_v23  ;;  %14712 = vmatprep.mubr.f32.mxu0 %v18326_v24  ;;  %v18344_v24 = vld [vmem:[#allocation21_spill] sm:$0xff]  ;;  %v15974_v29 = vpack.c.bf16 %v9487_v12, %v9480_v38 }
 0xb0a   :  { %15947 = vmatprep.subr.bf16.mxu0 %v15946_v49  ;;  %v9494_v10 = vand.u32 4294901760, %v9493_v36 }
 0xb0c   :  { %14713 = vmatmul.mubr.f32.vlgmr.msra.gmra.mrb[28].mxu0 %v18338_v14  ;;  %v15978_v61 = vpack.c.bf16 %v9501_v25, %v9494_v10 }
 0xb0d   :  { %15949 = vmatpush3.bf16.msra.mxu0 %v15946_v49  ;;  %14719 = vmatprep.mubr.f32.mxu0 %v18339_v6 }
 0xb0e   :  { %15951 = vmatprep.subr.bf16.mxu0 %v15950_v33 }
 0xb14   :  { %14720 = vmatmul.mubr.f32.vlgmr.msra.gmra.mrb[28].mxu0 %v18340_v40 }
 0xb15   :  { %15953 = vmatpush3.bf16.msra.mxu0 %v15950_v33  ;;  %14726 = vmatprep.mubr.f32.mxu0 %v18341_v2 }
 0xb16   :  { %15955 = vmatprep.subr.bf16.mxu0 %v15942_v23 }
 0xb1c   :  { %14727 = vmatmul.mubr.f32.vlgmr.msra.gmra.mrb[28].mxu0 %v18342_v54 }
 0xb1d   :  { %15957 = vmatpush3.bf16.msra.mxu0 %v15942_v23  ;;  %14733 = vmatprep.mubr.f32.mxu0 %v18343_v46 }
 0xb1e   :  { %15959 = vmatprep.subr.bf16.mxu0 %v15958_v60 }
 0xb24   :  { %14734 = vmatmul.mubr.f32.vlgmr.msra.gmra.mrb[28].mxu0 %v18344_v24 }
 0xb25   :  { %15961 = vmatpush3.bf16.msra.mxu0 %v15958_v60  ;;  %14740 = vmatprep.mubr.f32.mxu0 %v18339_v6  ;;  %v18345_v60 = vsub.s32 5, %v17060_v3 }
 0xb26   :  { %15963 = vmatprep.subr.bf16.mxu0 %v15942_v23 }
 0xb27   :  { %v9379_v13 = vrot.slane %v17965_v8, %v18345_v60 }
 0xb2c   :  { %14741 = vmatmul.mubr.f32.vlgmr.msra.gmra.mrb[28].mxu0 %v18340_v40 }
 0xb2d   :  { %15965 = vmatpush3.bf16.msra.mxu0 %v15942_v23  ;;  %14747 = vmatprep.mubr.f32.mxu0 %v18339_v6 }
 0xb2e   :  { %15967 = vmatprep.subr.bf16.mxu0 %v18028_v44 }
 0xb34   :  { %14748 = vmatmul.mubr.f32.vlgmr.msra.gmra.mrb[28].mxu0 %v18340_v40 }
 0xb35   :  { %15969 = vmatpush3.bf16.msra.mxu0 %v18028_v44 }
 0xb36   :  { %15971 = vmatprep.subr.bf16.mxu0 %v18030_v11 }
 0xb39   :  { %15973 = vmatpush3.bf16.msra.mxu0 %v18030_v11 }
 0xb3a   :  { %15975 = vmatprep.subr.bf16.mxu0 %v15974_v29 }
 0xbdb   :  { %v14707_v15 = vpop.f32.mrb[26].mxu0 }
 0xbdc   :  { %v8864_v52 = vpop.f32.mrb[27].mxu0  ;;  %v18036_v31 = vadd.f32 nan, %v14707_v15 }
 0xbdd   :  { %v18038_v48 = vadd.f32 nan, %v8864_v52 }
 0xc07   :  { %v14749_v28 = vpop.f32.mrb[28].mxu0 }
 0xc08   :  { %v16236_v0 = vadd.f32 %v14749_v28, %v18036_v31  ;;  %v9366_v1 = vpop.f32.mrb[29].mxu0 }
 0xc09   :  { %v16237_v34 = vadd.f32 %v9366_v1, %v18038_v48 }
 0xc0a   :  { %v9384_v17 = vsel %vm1030_vm4, %v16236_v0, 0 }
 0xc0b   :  { %v9465_v19 = vand.u32 4294901760, %v9384_v17  ;;  %v9381_v26 = vsel %vm1030_vm4, %v16237_v34, 0 }
 0xc0c   :  { %v9455_v37 = vand.u32 4294901760, %v9381_v26 }
 0xc0d   :  { %v9466_v5 = vsub.f32 %v9384_v17, %v9465_v19 }
 0xc0e   :  { %v9456_v39 = vsub.f32 %v9381_v26, %v9455_v37 }
 0xc0f   :  { %v9467_v9 = vand.u32 4294901760, %v9466_v5 }
 0xc10   :  { %v9457_v23 = vand.u32 4294901760, %v9456_v39 }
 0xc11   :  { %v9468_v47 = vsub.f32 %v9466_v5, %v9467_v9 }
 0xc12   :  { %v9458_v4 = vsub.f32 %v9456_v39, %v9457_v23 }
 0xc13   :  { %v9469_v33 = vand.u32 4294901760, %v9468_v47 }
 0xc14   :  { %v9459_v49 = vand.u32 4294901760, %v9458_v4 }
 0xc16   :  { %14758 = vmatprep.mubr.f32.mxu0 %v9459_v49 }
 0xc17   :  { %14759 = vmatmul.mubr.f32.vlgmr.msra.gmra.mrb[30].mxu0 %v9469_v33 }
 0xc18   :  { %15977 = vmatpush3.bf16.msra.mxu0 %v15974_v29  ;;  %14769 = vmatprep.mubr.f32.mxu0 %v9455_v37 }
 0xc19   :  { %15979 = vmatprep.subr.bf16.mxu0 %v15978_v61 }
 0xc1c   :  { %15981 = vmatpush3.bf16.msra.mxu0 %v15978_v61 }
 0xc1d   :  { %15983 = vmatprep.subr.bf16.mxu0 %v15982_v63 }
 0xc1f   :  { %14770 = vmatmul.mubr.f32.vlgmr.msra.gmra.mrb[30].mxu0 %v9465_v19 }
 0xc20   :  { %15985 = vmatpush3.bf16.msra.mxu0 %v15982_v63  ;;  %14780 = vmatprep.mubr.f32.mxu0 %v9456_v39 }
 0xc21   :  { %15987 = vmatprep.subr.bf16.mxu0 %v15986_v32 }
 0xc24   :  { %15989 = vmatpush3.bf16.msra.mxu0 %v15986_v32 }
 0xc25   :  { %15991 = vmatprep.subr.bf16.mxu0 %v18028_v44 }
 0xc27   :  { %14781 = vmatmul.mubr.f32.vlgmr.msra.gmra.mrb[30].mxu0 %v9466_v5 }
 0xc28   :  { %15993 = vmatpush3.bf16.msra.mxu0 %v18028_v44  ;;  %14791 = vmatprep.mubr.f32.mxu0 %v9457_v23 }
 0xc29   :  { %15995 = vmatprep.subr.bf16.mxu0 %v18030_v11 }
 0xc2c   :  { %15997 = vmatpush3.bf16.msra.mxu0 %v18030_v11 }
 0xc2d   :  { %15999 = vmatprep.subr.bf16.mxu0 %v15998_v57 }
 0xc2f   :  { %14792 = vmatmul.mubr.f32.vlgmr.msra.gmra.mrb[30].mxu0 %v9467_v9 }
 0xc30   :  { %16001 = vmatpush3.bf16.msra.mxu0 %v15998_v57  ;;  %14802 = vmatprep.mubr.f32.mxu0 %v9455_v37 }
 0xc31   :  { %16003 = vmatprep.subr.bf16.mxu0 %v16002_v58 }
 0xc34   :  { %16005 = vmatpush3.bf16.msra.mxu0 %v16002_v58 }
 0xc35   :  { %16007 = vmatprep.subr.bf16.mxu0 %v18028_v44 }
 0xc37   :  { %14803 = vmatmul.mubr.f32.vlgmr.msra.gmra.mrb[30].mxu0 %v9465_v19 }
 0xc38   :  { %16009 = vmatpush3.bf16.msra.mxu0 %v18028_v44  ;;  %14813 = vmatprep.mubr.f32.mxu0 %v9455_v37 }
 0xc39   :  { %16011 = vmatprep.subr.bf16.mxu0 %v18030_v11 }
 0xc3c   :  { %16013 = vmatpush3.bf16.msra.mxu0 %v18030_v11 }
 0xc3f   :  { %14814 = vmatmul.mubr.f32.vlgmr.msra.gmra.mrb[30].mxu0 %v9465_v19 }
 0xd12   :  { %v14815_v50 = vpop.f32.mrb[30].mxu0 }
 0xd13   :  { %v16238_v20 = vadd.f32 %v14815_v50, %v9379_v13  ;;  %v9904_v21 = vpop.f32.mrb[31].mxu0 }
 0xd14   :  { %v16239_v51 = vadd.f32 %v9904_v21, %v9379_v13 }
 0xd15   :  { %v9915_v35 = vmax.f32 %v16238_v20, 0.0 }
 0xd16   :  { %v9914_v18 = vmax.f32 %v16239_v51, 0.0 }
 0xd17   :  { %v18056_v22 = vadd.f32 %v17986_v42, %v9915_v35 }
 0xd18   :  { %v18059_v44 = vadd.f32 %v17988_v55, %v9914_v18 }
 0xd19   :  { %v9922_v41 = vand.u32 4294901760, %v18056_v22 }
 0xd1a   :  { %v9919_v43 = vand.u32 4294901760, %v18059_v44 }
 0xd1b   :  { %v10014_v11 = vsub.f32 %v18056_v22, %v9922_v41 }
 0xd1c   :  { %v16014_v16 = vpack.c.bf16 %v9922_v41, %v9919_v43  ;;  %v10007_v45 = vsub.f32 %v18059_v44, %v9919_v43 }
 0xd1d   :  { %v10015_v56 = vand.u32 4294901760, %v10014_v11 }
 0xd1e   :  { %16015 = vmatprep.subr.bf16.mxu1 %v16014_v16  ;;  %v10008_v62 = vand.u32 4294901760, %v10007_v45  ;;  %v16022_v12 = vpack.c.bf16 %v10014_v11, %v10007_v45 }
 0xd1f   :  { %16017 = vmatpush3.bf16.msra.mxu1 %v16014_v16  ;;  %v10016_v27 = vsub.f32 %v10014_v11, %v10015_v56 }
 0xd20   :  { %v10009_v7 = vsub.f32 %v10007_v45, %v10008_v62  ;;  %v16030_v30 = vpack.c.bf16 %v10015_v56, %v10008_v62  ;;  %v12583_v45 = vld [vmem:[%s18214_s6 + $0x100] sm:$0xff] }
 0xd21   :  { %v10017_v42 = vand.u32 4294901760, %v10016_v27  ;;  %v12584_v27 = vld [vmem:[%s18214_s6 + $0x108] sm:$0xff] }
 0xd22   :  { %14821 = vmatmul.mubr.f32.vlgmr.msra.gmra.mrb[14].mxu1 %v18338_v14  ;;  %v10010_v55 = vand.u32 4294901760, %v10009_v7  ;;  %v12577_v14 = vld [vmem:[%s18214_s6 + $0xd0] sm:$0xff]  ;;  %v10979_v7 = vand.u32 4294901760, %v12583_v45 }
 0xd23   :  { %14827 = vmatprep.mubr.f32.mxu1 %v18339_v6 }
 0xd24   :  { %v16018_v38 = vpack.c.bf16 %v10017_v42, %v10010_v55  ;;  %v10982_v42 = vand.u32 4294901760, %v12584_v27 }
 0xd26   :  { %16019 = vmatprep.subr.bf16.mxu1 %v16018_v38 }
 0xd27   :  { %16021 = vmatpush3.bf16.msra.mxu1 %v16018_v38 }
 0xd28   :  { %16023 = vmatprep.subr.bf16.mxu1 %v16022_v12 }
 0xd2a   :  { %14828 = vmatmul.mubr.f32.vlgmr.msra.gmra.mrb[14].mxu1 %v18340_v40 }
 0xd2b   :  { %16025 = vmatpush3.bf16.msra.mxu1 %v16022_v12  ;;  %14834 = vmatprep.mubr.f32.mxu1 %v18341_v2  ;;  %v12578_v2 = vld [vmem:[%s18214_s6 + $0xd8] sm:$0xff] }
 0xd2c   :  { %16027 = vmatprep.subr.bf16.mxu1 %v16014_v16 }
 0xd32   :  { %14835 = vmatmul.mubr.f32.vlgmr.msra.gmra.mrb[14].mxu1 %v18342_v54  ;;  %v10431_v54 = vand.u32 4294901760, %v12577_v14 }
 0xd33   :  { %16029 = vmatpush3.bf16.msra.mxu1 %v16014_v16  ;;  %14841 = vmatprep.mubr.f32.mxu1 %v18343_v46  ;;  %v10434_v46 = vand.u32 4294901760, %v12578_v2 }
 0xd34   :  { %16031 = vmatprep.subr.bf16.mxu1 %v16030_v30  ;;  %v10521_v36 = vsub.f32 %v12577_v14, %v10431_v54 }
 0xd35   :  { %v18088_v29 = vpack.c.bf16 %v10434_v46, %v10431_v54  ;;  %v10528_v59 = vsub.f32 %v12578_v2, %v10434_v46 }
 0xd36   :  { %v10522_v25 = vand.u32 4294901760, %v10521_v36 }
 0xd37   :  { %16039 = vmatprep.subr.bf16.mxu0 %v18088_v29  ;;  %v10529_v61 = vand.u32 4294901760, %v10528_v59  ;;  %v16054_v5 = vpack.c.bf16 %v10528_v59, %v10521_v36 }
 0xd38   :  { %16041 = vmatpush3.bf16.msra.mxu0 %v18088_v29  ;;  %v10523_v63 = vsub.f32 %v10521_v36, %v10522_v25 }
 0xd39   :  { %v10530_v32 = vsub.f32 %v10528_v59, %v10529_v61  ;;  %v16070_v9 = vpack.c.bf16 %v10529_v61, %v10522_v25 }
 0xd3a   :  { %14842 = vmatmul.mubr.f32.vlgmr.msra.gmra.mrb[14].mxu1 %v18344_v24  ;;  %v12579_v24 = vld [vmem:[%s18214_s6 + $0xe0] sm:$0xff]  ;;  %v10524_v15 = vand.u32 4294901760, %v10523_v63 }
 0xd3b   :  { %16033 = vmatpush3.bf16.msra.mxu1 %v16030_v30  ;;  %14848 = vmatprep.mubr.f32.mxu1 %v18339_v6  ;;  %v10437_v53 = vand.u32 4294901760, %v12579_v24  ;;  %v10531_v52 = vand.u32 4294901760, %v10530_v32  ;;  %v18122_v30 = vpack.c.bf16 %v10982_v42, %v10979_v7 }
 0xd3c   :  { %16035 = vmatprep.subr.bf16.mxu1 %v16014_v16 }
 0xd3d   :  { %v10535_v57 = vsub.f32 %v12579_v24, %v10437_v53  ;;  %v16046_v1 = vpack.c.bf16 %v10531_v52, %v10524_v15  ;;  %v11077_v24 = vsub.f32 %v12583_v45, %v10979_v7 }
 0xd3f   :  { %v10536_v28 = vand.u32 4294901760, %v10535_v57 }
 0xd41   :  { %v10537_v34 = vsub.f32 %v10535_v57, %v10536_v28 }
 0xd42   :  { %14849 = vmatmul.mubr.f32.vlgmr.msra.gmra.mrb[14].mxu1 %v18340_v40 }
 0xd43   :  { %16037 = vmatpush3.bf16.msra.mxu1 %v16014_v16  ;;  %14855 = vmatprep.mubr.f32.mxu1 %v18339_v6  ;;  %v12580_v6 = vld [vmem:[%s18214_s6 + $0xe8] sm:$0xff]  ;;  %v10538_v19 = vand.u32 4294901760, %v10537_v34 }
 0xd4a   :  { %14856 = vmatmul.mubr.f32.vlgmr.msra.gmra.mrb[14].mxu1 %v18340_v40  ;;  %v10440_v40 = vand.u32 4294901760, %v12580_v6 }
 0xd4c   :  { %v18090_v10 = vpack.c.bf16 %v10440_v40, %v10437_v53  ;;  %v10542_v58 = vsub.f32 %v12580_v6, %v10440_v40  ;;  %v11084_v6 = vsub.f32 %v12584_v27, %v10982_v42 }
 0xd4e   :  { %16043 = vmatprep.subr.bf16.mxu0 %v18090_v10  ;;  %v10543_v0 = vand.u32 4294901760, %v10542_v58  ;;  %v16058_v39 = vpack.c.bf16 %v10542_v58, %v10535_v57  ;;  %v11085_v36 = vand.u32 4294901760, %v11084_v6 }
 0xd4f   :  { %16045 = vmatpush3.bf16.msra.mxu0 %v18090_v10 }
 0xd50   :  { %v10544_v17 = vsub.f32 %v10542_v58, %v10543_v0  ;;  %16047 = vmatprep.subr.bf16.mxu0 %v16046_v1  ;;  %v16074_v23 = vpack.c.bf16 %v10543_v0, %v10536_v28  ;;  %v11086_v25 = vsub.f32 %v11084_v6, %v11085_v36  ;;  %v16106_v58 = vpack.c.bf16 %v11084_v6, %v11077_v24 }
 0xd51   :  { %v18346_v28 = vsub.s32 6, %v17060_v3 }
 0xd52   :  { %v10545_v26 = vand.u32 4294901760, %v10544_v17  ;;  %v11087_v63 = vand.u32 4294901760, %v11086_v25  ;;  %v18347_v25 = vsub.s32 4, %v17060_v3 }
 0xd53   :  { %v10423_v0 = vrot.slane %v17965_v8, %v18346_v28 }
 0xd54   :  { %v16050_v37 = vpack.c.bf16 %v10545_v26, %v10538_v19 }
 0xe1d   :  { %v14857_v47 = vpop.f32.mrb[14].mxu1 }
 0xe1e   :  { %v16240_v4 = vadd.f32 %v14857_v47, %v18036_v31  ;;  %v10410_v49 = vpop.f32.mrb[15].mxu1  ;;  %v12581_v31 = vld [vmem:[%s18214_s6 + $0xf0] sm:$0xff] }
 0xe1f   :  { %v16241_v33 = vadd.f32 %v10410_v49, %v18038_v48  ;;  %v12582_v48 = vld [vmem:[%s18214_s6 + $0xf8] sm:$0xff]  ;;  %v10973_v56 = vand.u32 4294901760, %v12581_v31 }
 0xe20   :  { %v10428_v60 = vsel %vm1030_vm4, %v16240_v4, 0  ;;  %v10976_v62 = vand.u32 4294901760, %v12582_v48 }
 0xe21   :  { %v10509_v13 = vand.u32 4294901760, %v10428_v60  ;;  %v10425_v50 = vsel %vm1030_vm4, %v16241_v33, 0  ;;  %v11063_v38 = vsub.f32 %v12581_v31, %v10973_v56 }
 0xe22   :  { %v10499_v20 = vand.u32 4294901760, %v10425_v50  ;;  %v18120_v55 = vpack.c.bf16 %v10976_v62, %v10973_v56  ;;  %v11070_v12 = vsub.f32 %v12582_v48, %v10976_v62 }
 0xe23   :  { %v10510_v21 = vsub.f32 %v10428_v60, %v10509_v13  ;;  %v11064_v14 = vand.u32 4294901760, %v11063_v38 }
 0xe24   :  { %v10500_v51 = vsub.f32 %v10425_v50, %v10499_v20  ;;  %16087 = vmatprep.subr.bf16.mxu1 %v18120_v55  ;;  %v11071_v2 = vand.u32 4294901760, %v11070_v12  ;;  %v16102_v57 = vpack.c.bf16 %v11070_v12, %v11063_v38 }
 0xe25   :  { %v10511_v35 = vand.u32 4294901760, %v10510_v21  ;;  %16089 = vmatpush3.bf16.msra.mxu1 %v18120_v55  ;;  %v11065_v54 = vsub.f32 %v11063_v38, %v11064_v14 }
 0xe26   :  { %v10501_v18 = vand.u32 4294901760, %v10500_v51  ;;  %16091 = vmatprep.subr.bf16.mxu1 %v18122_v30  ;;  %v11072_v46 = vsub.f32 %v11070_v12, %v11071_v2  ;;  %v16118_v15 = vpack.c.bf16 %v11071_v2, %v11064_v14 }
 0xe27   :  { %v10512_v41 = vsub.f32 %v10510_v21, %v10511_v35  ;;  %v11066_v53 = vand.u32 4294901760, %v11065_v54 }
 0xe28   :  { %v10502_v43 = vsub.f32 %v10500_v51, %v10501_v18  ;;  %v11073_v40 = vand.u32 4294901760, %v11072_v46 }
 0xe29   :  { %v10513_v16 = vand.u32 4294901760, %v10512_v41  ;;  %16093 = vmatpush3.bf16.msra.mxu1 %v18122_v30  ;;  %v12588_v41 = vld [vmem:[%s18219_s8 + $0x50] sm:$0xff] }
 0xe2a   :  { %v10503_v11 = vand.u32 4294901760, %v10502_v43  ;;  %v16094_v59 = vpack.c.bf16 %v11073_v40, %v11066_v53  ;;  %v12589_v43 = vld [vmem:[%s18219_s8 + $0x58] sm:$0xff] }
 0xe2c   :  { %14866 = vmatprep.mubr.f32.mxu0 %v10503_v11  ;;  %16095 = vmatprep.subr.bf16.mxu1 %v16094_v59  ;;  %v11519_v11 = vand.u32 4294901760, %v12588_v41 }
 0xe2d   :  { %14867 = vmatmul.mubr.f32.vlgmr.msra.gmra.mrb[32].mxu0 %v10513_v16  ;;  %v11522_v16 = vand.u32 4294901760, %v12589_v43 }
 0xe2e   :  { %16049 = vmatpush3.bf16.msra.mxu0 %v16046_v1  ;;  %14877 = vmatprep.mubr.f32.mxu0 %v10499_v20 }
 0xe2f   :  { %16051 = vmatprep.subr.bf16.mxu0 %v16050_v37  ;;  %v18157_v56 = vpack.c.bf16 %v11522_v16, %v11519_v11  ;;  %v11624_v38 = vsub.f32 %v12589_v43, %v11522_v16  ;;  %v18348_v43 = vld [vmem:[#allocation7_spill] sm:$0xff] }
 0xe31   :  { %v11625_v2 = vand.u32 4294901760, %v11624_v38 }
 0xe32   :  { %16053 = vmatpush3.bf16.msra.mxu0 %v16050_v37 }
 0xe33   :  { %16055 = vmatprep.subr.bf16.mxu0 %v16054_v5 }
 0xe35   :  { %14878 = vmatmul.mubr.f32.vlgmr.msra.gmra.mrb[32].mxu0 %v10509_v13 }
 0xe36   :  { %16057 = vmatpush3.bf16.msra.mxu0 %v16054_v5  ;;  %14888 = vmatprep.mubr.f32.mxu0 %v10500_v51 }
 0xe37   :  { %16059 = vmatprep.subr.bf16.mxu0 %v16058_v39 }
 0xe3a   :  { %16061 = vmatpush3.bf16.msra.mxu0 %v16058_v39 }
 0xe3b   :  { %16063 = vmatprep.subr.bf16.mxu0 %v18088_v29 }
 0xe3d   :  { %14889 = vmatmul.mubr.f32.vlgmr.msra.gmra.mrb[32].mxu0 %v10510_v21 }
 0xe3e   :  { %16065 = vmatpush3.bf16.msra.mxu0 %v18088_v29  ;;  %14899 = vmatprep.mubr.f32.mxu0 %v10501_v18 }
 0xe3f   :  { %16067 = vmatprep.subr.bf16.mxu0 %v18090_v10 }
 0xe42   :  { %16069 = vmatpush3.bf16.msra.mxu0 %v18090_v10 }
 0xe43   :  { %16071 = vmatprep.subr.bf16.mxu0 %v16070_v9 }
 0xe45   :  { %14900 = vmatmul.mubr.f32.vlgmr.msra.gmra.mrb[32].mxu0 %v10511_v35 }
 0xe46   :  { %16073 = vmatpush3.bf16.msra.mxu0 %v16070_v9  ;;  %14910 = vmatprep.mubr.f32.mxu0 %v10499_v20 }
 0xe47   :  { %16075 = vmatprep.subr.bf16.mxu0 %v16074_v23 }
 0xe4a   :  { %16077 = vmatpush3.bf16.msra.mxu0 %v16074_v23 }
 0xe4b   :  { %16079 = vmatprep.subr.bf16.mxu0 %v18088_v29 }
 0xe4d   :  { %14911 = vmatmul.mubr.f32.vlgmr.msra.gmra.mrb[32].mxu0 %v10509_v13 }
 0xe4e   :  { %16081 = vmatpush3.bf16.msra.mxu0 %v18088_v29  ;;  %14921 = vmatprep.mubr.f32.mxu0 %v10499_v20  ;;  %v11078_v29 = vand.u32 4294901760, %v11077_v24 }
 0xe4f   :  { %16083 = vmatprep.subr.bf16.mxu0 %v18090_v10 }
 0xe50   :  { %v16122_v52 = vpack.c.bf16 %v11085_v36, %v11078_v29 }
 0xe52   :  { %16085 = vmatpush3.bf16.msra.mxu0 %v18090_v10  ;;  %v11079_v10 = vsub.f32 %v11077_v24, %v11078_v29  ;;  %v11626_v24 = vsub.f32 %v11624_v38, %v11625_v2 }
 0xe54   :  { %v11080_v61 = vand.u32 4294901760, %v11079_v10  ;;  %v11627_v53 = vand.u32 4294901760, %v11626_v24 }
 0xe55   :  { %14922 = vmatmul.mubr.f32.vlgmr.msra.gmra.mrb[32].mxu0 %v10509_v13 }
 0xe56   :  { %v16098_v32 = vpack.c.bf16 %v11087_v63, %v11080_v61  ;;  %v10965_v61 = vrot.slane %v17965_v8, %v18347_v25 }
 0xf28   :  { %v14923_v1 = vpop.f32.mrb[32].mxu0 }
 0xf29   :  { %v16242_v34 = vadd.f32 %v14923_v1, %v10423_v0  ;;  %v10948_v17 = vpop.f32.mrb[33].mxu0 }
 0xf2a   :  { %v16243_v19 = vadd.f32 %v10948_v17, %v10423_v0 }
 0xf2b   :  { %v10959_v26 = vmax.f32 %v16242_v34, 0.0 }
 0xf2c   :  { %v10958_v37 = vmax.f32 %v16243_v19, 0.0 }
 0xf2d   :  { %v10961_v5 = vadd.f32 %v10959_v26, %v18056_v22  ;;  %v12586_v22 = vld [vmem:[%s18219_s8 + $0x40] sm:$0xff] }
 0xf2e   :  { %v10960_v39 = vadd.f32 %v10958_v37, %v18059_v44  ;;  %v12587_v44 = vld [vmem:[%s18219_s8 + $0x48] sm:$0xff]  ;;  %v11513_v35 = vand.u32 4294901760, %v12586_v22 }
 0xf2f   :  { %v10970_v9 = vsel %vm1030_vm4, %v10961_v5, 0  ;;  %v11516_v18 = vand.u32 4294901760, %v12587_v44 }
 0xf30   :  { %v11051_v23 = vand.u32 4294901760, %v10970_v9  ;;  %v10967_v47 = vsel %vm1030_vm4, %v10960_v39, 0  ;;  %v11603_v48 = vsub.f32 %v12586_v22, %v11513_v35 }
 0xf31   :  { %v11041_v4 = vand.u32 4294901760, %v10967_v47  ;;  %v18155_v31 = vpack.c.bf16 %v11516_v18, %v11513_v35  ;;  %v11610_v45 = vsub.f32 %v12587_v44, %v11516_v18 }
 0xf32   :  { %v11052_v49 = vsub.f32 %v10970_v9, %v11051_v23  ;;  %v11604_v62 = vand.u32 4294901760, %v11603_v48  ;;  %v12591_v9 = vld [vmem:[%s18219_s8 + $0x68] sm:$0xff] }
 0xf33   :  { %v11042_v33 = vsub.f32 %v10967_v47, %v11041_v4  ;;  %16135 = vmatprep.subr.bf16.mxu0 %v18155_v31  ;;  %v11611_v27 = vand.u32 4294901760, %v11610_v45  ;;  %v16150_v29 = vpack.c.bf16 %v11610_v45, %v11603_v48  ;;  %v12053_v47 = vand.u32 4294901760, %v12591_v9 }
 0xf34   :  { %v11053_v60 = vand.u32 4294901760, %v11052_v49  ;;  %16137 = vmatpush3.bf16.msra.mxu0 %v18155_v31  ;;  %v11605_v7 = vsub.f32 %v11603_v48, %v11604_v62 }
 0xf35   :  { %v11043_v13 = vand.u32 4294901760, %v11042_v33  ;;  %16139 = vmatprep.subr.bf16.mxu0 %v18157_v56  ;;  %v11612_v42 = vsub.f32 %v11610_v45, %v11611_v27 }
 0xf36   :  { %v11054_v50 = vsub.f32 %v11052_v49, %v11053_v60  ;;  %v11606_v12 = vand.u32 4294901760, %v11605_v7 }
 0xf37   :  { %v11044_v20 = vsub.f32 %v11042_v33, %v11043_v13 }
 0xf38   :  { %v11055_v51 = vand.u32 4294901760, %v11054_v50  ;;  %16141 = vmatpush3.bf16.msra.mxu0 %v18157_v56 }
 0xf39   :  { %v11045_v21 = vand.u32 4294901760, %v11044_v20 }
 0xf3b   :  { %14932 = vmatprep.mubr.f32.mxu1 %v11045_v21 }
 0xf3c   :  { %14933 = vmatmul.mubr.f32.vlgmr.msra.gmra.mrb[16].mxu1 %v11055_v51 }
 0xf3d   :  { %16097 = vmatpush3.bf16.msra.mxu1 %v16094_v59  ;;  %14943 = vmatprep.mubr.f32.mxu1 %v11041_v4  ;;  %v16166_v59 = vpack.c.bf16 %v11611_v27, %v11604_v62 }
 0xf3e   :  { %16099 = vmatprep.subr.bf16.mxu1 %v16098_v32 }
 0xf41   :  { %16101 = vmatpush3.bf16.msra.mxu1 %v16098_v32 }
 0xf42   :  { %16103 = vmatprep.subr.bf16.mxu1 %v16102_v57 }
 0xf44   :  { %14944 = vmatmul.mubr.f32.vlgmr.msra.gmra.mrb[16].mxu1 %v11051_v23 }
 0xf45   :  { %16105 = vmatpush3.bf16.msra.mxu1 %v16102_v57  ;;  %14954 = vmatprep.mubr.f32.mxu1 %v11042_v33  ;;  %v12141_v33 = vsub.f32 %v12591_v9, %v12053_v47 }
 0xf46   :  { %16107 = vmatprep.subr.bf16.mxu1 %v16106_v58 }
 0xf49   :  { %16109 = vmatpush3.bf16.msra.mxu1 %v16106_v58 }
 0xf4a   :  { %16111 = vmatprep.subr.bf16.mxu1 %v18120_v55 }
 0xf4c   :  { %14955 = vmatmul.mubr.f32.vlgmr.msra.gmra.mrb[16].mxu1 %v11052_v49 }
 0xf4d   :  { %16113 = vmatpush3.bf16.msra.mxu1 %v18120_v55  ;;  %14965 = vmatprep.mubr.f32.mxu1 %v11043_v13  ;;  %v12142_v13 = vand.u32 4294901760, %v12141_v33 }
 0xf4e   :  { %16115 = vmatprep.subr.bf16.mxu1 %v18122_v30 }
 0xf4f   :  { %v12143_v20 = vsub.f32 %v12141_v33, %v12142_v13 }
 0xf51   :  { %16117 = vmatpush3.bf16.msra.mxu1 %v18122_v30  ;;  %v12144_v51 = vand.u32 4294901760, %v12143_v20 }
 0xf52   :  { %16119 = vmatprep.subr.bf16.mxu1 %v16118_v15 }
 0xf54   :  { %14966 = vmatmul.mubr.f32.vlgmr.msra.gmra.mrb[16].mxu1 %v11053_v60 }
 0xf55   :  { %16121 = vmatpush3.bf16.msra.mxu1 %v16118_v15  ;;  %14976 = vmatprep.mubr.f32.mxu1 %v11041_v4 }
 0xf56   :  { %16123 = vmatprep.subr.bf16.mxu1 %v16122_v52 }
 0xf59   :  { %16125 = vmatpush3.bf16.msra.mxu1 %v16122_v52 }
 0xf5a   :  { %16127 = vmatprep.subr.bf16.mxu1 %v18120_v55 }
 0xf5c   :  { %14977 = vmatmul.mubr.f32.vlgmr.msra.gmra.mrb[16].mxu1 %v11051_v23 }
 0xf5d   :  { %16129 = vmatpush3.bf16.msra.mxu1 %v18120_v55  ;;  %14987 = vmatprep.mubr.f32.mxu1 %v11041_v4  ;;  %v11617_v55 = vsub.f32 %v12588_v41, %v11519_v11  ;;  %v12590_v41 = vld [vmem:[%s18219_s8 + $0x60] sm:$0xff] }
 0xf5e   :  { %16131 = vmatprep.subr.bf16.mxu1 %v18122_v30  ;;  %v11505_v11 = vrot.slane %v12590_v41, %v18348_v43 }
 0xf5f   :  { %v11618_v14 = vand.u32 4294901760, %v11617_v55  ;;  %v16154_v36 = vpack.c.bf16 %v11624_v38, %v11617_v55 }
 0xf61   :  { %16133 = vmatpush3.bf16.msra.mxu1 %v18122_v30  ;;  %v11613_v30 = vand.u32 4294901760, %v11612_v42  ;;  %v11619_v46 = vsub.f32 %v11617_v55, %v11618_v14  ;;  %v16170_v10 = vpack.c.bf16 %v11625_v2, %v11618_v14 }
 0xf63   :  { %v16142_v54 = vpack.c.bf16 %v11613_v30, %v11606_v12  ;;  %v11620_v6 = vand.u32 4294901760, %v11619_v46 }
 0xf64   :  { %14988 = vmatmul.mubr.f32.vlgmr.msra.gmra.mrb[16].mxu1 %v11051_v23  ;;  %v12592_v23 = vld [vmem:[%s18219_s8 + $0x70] sm:$0xff] }
 0xf65   :  { %16143 = vmatprep.subr.bf16.mxu0 %v16142_v54  ;;  %v16146_v40 = vpack.c.bf16 %v11627_v53, %v11620_v6  ;;  %v12056_v4 = vand.u32 4294901760, %v12592_v23  ;;  %v219_v6 = vld [vmem:[%s18219_s8 + $0x38] sm:$0xff] }
 0xf66   :  { %v5872_v53 = vrot.slane %v219_v6, %v18348_v43 }
 0xf67   :  { %v16182_v49 = vpack.c.bf16 %v12056_v4, %v12053_v47  ;;  %v12148_v60 = vsub.f32 %v12592_v23, %v12056_v4 }
 0xf69   :  { %16183 = vmatprep.subr.bf16.mxu1 %v16182_v49  ;;  %v12149_v50 = vand.u32 4294901760, %v12148_v60  ;;  %v16190_v35 = vpack.c.bf16 %v12148_v60, %v12141_v33 }
 0xf6a   :  { %16185 = vmatpush3.bf16.msra.mxu1 %v16182_v49 }
 0xf6b   :  { %v12150_v21 = vsub.f32 %v12148_v60, %v12149_v50  ;;  %v16198_v18 = vpack.c.bf16 %v12149_v50, %v12142_v13 }
 0xf6d   :  { %v12151_v22 = vand.u32 4294901760, %v12150_v21 }
 0xf6f   :  { %v16186_v44 = vpack.c.bf16 %v12151_v22, %v12144_v51 }
 0xf71   :  { %16187 = vmatprep.subr.bf16.mxu1 %v16186_v44 }
0x1037   :  { %v14989_v63 = vpop.f32.mrb[16].mxu1 }
0x1038   :  { %v16244_v32 = vadd.f32 %v14989_v63, %v10965_v61  ;;  %v11490_v57 = vpop.f32.mrb[17].mxu1 }
0x1039   :  { %v16245_v58 = vadd.f32 %v11490_v57, %v10965_v61 }
0x103a   :  { %v11501_v15 = vmax.f32 %v16244_v32, 0.0 }
0x103b   :  { %v11500_v52 = vmax.f32 %v16245_v58, 0.0 }
0x103c   :  { %v11510_v28 = vsel %vm1030_vm4, %v11501_v15, 0 }
0x103d   :  { %v11591_v0 = vand.u32 4294901760, %v11510_v28  ;;  %v11507_v1 = vsel %vm1030_vm4, %v11500_v52, 0 }
0x103e   :  { %v11581_v34 = vand.u32 4294901760, %v11507_v1 }
0x103f   :  { %v11592_v17 = vsub.f32 %v11510_v28, %v11591_v0 }
0x1040   :  { %v11582_v19 = vsub.f32 %v11507_v1, %v11581_v34 }
0x1041   :  { %v11593_v26 = vand.u32 4294901760, %v11592_v17 }
0x1042   :  { %v11583_v37 = vand.u32 4294901760, %v11582_v19 }
0x1043   :  { %v11594_v5 = vsub.f32 %v11592_v17, %v11593_v26 }
0x1044   :  { %v11584_v3 = vsub.f32 %v11582_v19, %v11583_v37 }
0x1045   :  { %v11595_v8 = vand.u32 4294901760, %v11594_v5 }
0x1046   :  { %v11585_v39 = vand.u32 4294901760, %v11584_v3 }
0x1048   :  { %14998 = vmatprep.mubr.f32.mxu0 %v11585_v39 }
0x1049   :  { %14999 = vmatmul.mubr.f32.vlgmr.msra.gmra.mrb[34].mxu0 %v11595_v8 }
0x104a   :  { %16145 = vmatpush3.bf16.msra.mxu0 %v16142_v54  ;;  %15009 = vmatprep.mubr.f32.mxu0 %v11581_v34 }
0x104b   :  { %16147 = vmatprep.subr.bf16.mxu0 %v16146_v40 }
0x104e   :  { %16149 = vmatpush3.bf16.msra.mxu0 %v16146_v40  ;;  %v12593_v40 = vld [vmem:[%s18219_s8 + $0x78] sm:$0xff] }
0x104f   :  { %16151 = vmatprep.subr.bf16.mxu0 %v16150_v29 }
0x1051   :  { %15010 = vmatmul.mubr.f32.vlgmr.msra.gmra.mrb[34].mxu0 %v11591_v0 }
0x1052   :  { %16153 = vmatpush3.bf16.msra.mxu0 %v16150_v29  ;;  %15020 = vmatprep.mubr.f32.mxu0 %v11582_v19  ;;  %v12045_v29 = vrot.slane %v12593_v40, %v18348_v43 }
0x1053   :  { %16155 = vmatprep.subr.bf16.mxu0 %v16154_v36 }
0x1056   :  { %16157 = vmatpush3.bf16.msra.mxu0 %v16154_v36  ;;  %v16520_v36 = vld [vmem:[%s18210_s5 + $0x8] sm:$0xff] }
0x1057   :  { %16159 = vmatprep.subr.bf16.mxu0 %v18155_v31 }
0x1059   :  { %15021 = vmatmul.mubr.f32.vlgmr.msra.gmra.mrb[34].mxu0 %v11592_v17 }
0x105a   :  { %16161 = vmatpush3.bf16.msra.mxu0 %v18155_v31  ;;  %15031 = vmatprep.mubr.f32.mxu0 %v11583_v37 }
0x105b   :  { %16163 = vmatprep.subr.bf16.mxu0 %v18157_v56 }
0x105e   :  { %16165 = vmatpush3.bf16.msra.mxu0 %v18157_v56 }
0x105f   :  { %16167 = vmatprep.subr.bf16.mxu0 %v16166_v59 }
0x1061   :  { %15032 = vmatmul.mubr.f32.vlgmr.msra.gmra.mrb[34].mxu0 %v11593_v26 }
0x1062   :  { %16169 = vmatpush3.bf16.msra.mxu0 %v16166_v59  ;;  %15042 = vmatprep.mubr.f32.mxu0 %v11581_v34  ;;  %v16224_v59 = vadd.f32 %v16520_v36, %v5872_v53 }
0x1063   :  { %16171 = vmatprep.subr.bf16.mxu0 %v16170_v10 }
0x1064   :  { %v16225_v61 = vadd.f32 %v16224_v59, %v12045_v29 }
0x1066   :  { %16173 = vmatpush3.bf16.msra.mxu0 %v16170_v10  ;;  %v16521_v10 = vld [vmem:[%s18210_s5] sm:$0xff] }
0x1067   :  { %16175 = vmatprep.subr.bf16.mxu0 %v18155_v31  ;;  %v16227_v25 = vadd.f32 %v16521_v10, %v5872_v53 }
0x1069   :  { %15043 = vmatmul.mubr.f32.vlgmr.msra.gmra.mrb[34].mxu0 %v11591_v0  ;;  %v16228_v63 = vadd.f32 %v16227_v25, %v12045_v29 }
0x106a   :  { %16177 = vmatpush3.bf16.msra.mxu0 %v18155_v31  ;;  %15053 = vmatprep.mubr.f32.mxu0 %v11581_v34 }
0x106b   :  { %16179 = vmatprep.subr.bf16.mxu0 %v18157_v56 }
0x106e   :  { %16181 = vmatpush3.bf16.msra.mxu0 %v18157_v56 }
0x1071   :  { %15054 = vmatmul.mubr.f32.vlgmr.msra.gmra.mrb[34].mxu0 %v11591_v0 }
0x1144   :  { %v15055_v16 = vpop.f32.mrb[34].mxu0 }
0x1145   :  { %v16246_v31 = vadd.f32 %v15055_v16, %v11505_v11  ;;  %v12030_v48 = vpop.f32.mrb[35].mxu0 }
0x1146   :  { %v16247_v45 = vadd.f32 %v12030_v48, %v11505_v11 }
0x1147   :  { %v12041_v56 = vmax.f32 %v16246_v31, 0.0 }
0x1148   :  { %v12040_v62 = vmax.f32 %v16247_v45, 0.0 }
0x1149   :  { %v12050_v27 = vsel %vm41_vm0, %v12041_v56, 0 }
0x114a   :  { %v12129_v7 = vand.u32 4294901760, %v12050_v27  ;;  %v12047_v42 = vsel %vm41_vm0, %v12040_v62, 0 }
0x114b   :  { %v12119_v55 = vand.u32 4294901760, %v12047_v42 }
0x114c   :  { %v12130_v38 = vsub.f32 %v12050_v27, %v12129_v7 }
0x114d   :  { %v12120_v12 = vsub.f32 %v12047_v42, %v12119_v55 }
0x114e   :  { %v12131_v30 = vand.u32 4294901760, %v12130_v38 }
0x114f   :  { %v12121_v14 = vand.u32 4294901760, %v12120_v12 }
0x1150   :  { %v12132_v2 = vsub.f32 %v12130_v38, %v12131_v30 }
0x1151   :  { %v12122_v54 = vsub.f32 %v12120_v12, %v12121_v14 }
0x1152   :  { %v12133_v24 = vand.u32 4294901760, %v12132_v2 }
0x1153   :  { %v12123_v46 = vand.u32 4294901760, %v12122_v54 }
0x1155   :  { %15060 = vmatprep.mubr.f32.mxu1 %v12123_v46 }
0x1156   :  { %15061 = vmatmul.mubr.f32.vlgmr.msra.gmra.mrb[8].mxu1 %v12133_v24 }
0x1157   :  { %15067 = vmatprep.mubr.f32.mxu1 %v12119_v55  ;;  %16189 = vmatpush3.bf16.msra.mxu1 %v16186_v44 }
0x1158   :  { %16191 = vmatprep.subr.bf16.mxu1 %v16190_v35 }
0x115e   :  { %15068 = vmatmul.mubr.f32.vlgmr.msra.gmra.mrb[8].mxu1 %v12129_v7 }
0x115f   :  { %15074 = vmatprep.mubr.f32.mxu1 %v12120_v12  ;;  %16193 = vmatpush3.bf16.msra.mxu1 %v16190_v35 }
0x1160   :  { %16195 = vmatprep.subr.bf16.mxu1 %v16182_v49 }
0x1166   :  { %15075 = vmatmul.mubr.f32.vlgmr.msra.gmra.mrb[8].mxu1 %v12130_v38 }
0x1167   :  { %15081 = vmatprep.mubr.f32.mxu1 %v12121_v14  ;;  %16197 = vmatpush3.bf16.msra.mxu1 %v16182_v49 }
0x1168   :  { %16199 = vmatprep.subr.bf16.mxu1 %v16198_v18 }
0x116e   :  { %15082 = vmatmul.mubr.f32.vlgmr.msra.gmra.mrb[8].mxu1 %v12131_v30 }
0x116f   :  { %15088 = vmatprep.mubr.f32.mxu1 %v12119_v55  ;;  %16201 = vmatpush3.bf16.msra.mxu1 %v16198_v18 }
0x1170   :  { %16203 = vmatprep.subr.bf16.mxu1 %v16182_v49 }
0x1176   :  { %15089 = vmatmul.mubr.f32.vlgmr.msra.gmra.mrb[8].mxu1 %v12129_v7 }
0x1177   :  { %15095 = vmatprep.mubr.f32.mxu1 %v12119_v55  ;;  %16205 = vmatpush3.bf16.msra.mxu1 %v16182_v49 }
0x117e   :  { %15096 = vmatmul.mubr.f32.vlgmr.msra.gmra.mrb[8].mxu1 %v12129_v7 }
0x1251   :  { %v15097_v32 = vpop.f32.mrb[8].mxu1 }
0x1252   :  { %v16226_v57 = vadd.f32 %v16225_v61, %v15097_v32  ;;  %v12544_v58 = vpop.f32.mrb[9].mxu1 }
0x1253   :  { %v16229_v15 = vadd.f32 %v16228_v63, %v12544_v58 }
0x1254   :  { %v12557_v52 = vsub.f32 %v16226_v57, %v16520_v36 }
0x1255   :  { %v12556_v28 = vsub.f32 %v16229_v15, %v16521_v10 }
0x1256   :  { %12559 = vst.msk [vmem:[%s18220_s10 + $0x8] sm:$0xff] %vm143_vm1, %v12557_v52 }
0x1257   :  { %12558 = vst.msk [vmem:[%s18220_s10] sm:$0xff] %vm143_vm1, %v12556_v28 }

</bundles_post_ra>
